<compile_context>
chip_gen: v7x
topology: tpu7x:2x2x1
jax: 0.10.0
libtpu: 0.0.40
codegen_flags: <defaults>
</compile_context>

<pallas_src>
import jax
import jax.numpy as jnp
from jax.experimental import pallas as pl
from jax.experimental.pallas import tpu as pltpu

C_OUT = 2048  # fixed by the module (nn.Linear(..., 2048))


def film_kernel(gamma_ref, beta_ref, fm_ref, out_ref):
    """One grid step: one (tB, tC, tHW) tile of the feature map.

    gamma_ref : (tB, tC, 1)    per-channel scale (broadcast over lanes)
    beta_ref  : (tB, tC, 1)    per-channel shift
    fm_ref    : (tB, tC, tHW)  feature-map tile (C on sublanes, HW on lanes)
    out_ref   : (tB, tC, tHW)  output tile
    """
    fm = fm_ref[...].astype(jnp.float32)
    out_ref[...] = (fm * gamma_ref[...] + beta_ref[...]).astype(out_ref.dtype)


def _pick_tile(dim, preferred, align):
    """Largest tile <= `preferred` that is a multiple of `align` and divides
    `dim` if possible; else `preferred` (Pallas masks the ragged tail)."""
    if dim <= preferred:
        return dim
    for t in range(preferred, align - 1, -align):
        if dim % t == 0:
            return t
    return preferred


def resnet_film_layer(feature_map_nchw, condition_vector, w_h, b_h, w_a, b_a):
    """feature_map_nchw: (B, 2048, H, W); condition_vector: (B, K).

    w_h, w_a: (2048, K) PyTorch-layout Linear weights; b_h, b_a: (2048,)
    Returns: (B, 2048, H, W)
    """
    B, C, H, W = feature_map_nchw.shape
    assert C == C_OUT
    HW = H * W

    # Hoisted FiLM parameters: two small matmuls in plain XLA (f32 accum).
    gamma = (condition_vector @ w_h.T + b_h).astype(jnp.float32)   # (B, C)
    beta = (condition_vector @ w_a.T + b_a).astype(jnp.float32)    # (B, C)
    gamma3 = gamma.reshape(B, C, 1)
    beta3 = beta.reshape(B, C, 1)

    # Free reshape (no data movement): NCHW -> (B, C, HW).
    fm = feature_map_nchw.reshape(B, C, HW)

    # Tile sizes: C on sublanes (mult of 8), HW on lanes (mult of 128 or full).
    t_c = _pick_tile(C, 512, 8)
    t_hw = _pick_tile(HW, 512, 128)

    # If the (tC, tHW) slab is small (small feature maps), block several batch
    # elements per grid step to amortize the fixed per-step pipeline overhead.
    itemsize = jnp.dtype(feature_map_nchw.dtype).itemsize
    per_b_bytes = t_c * t_hw * itemsize
    t_b = 1
    if per_b_bytes < (1 << 20):                      # < 1 MiB per batch element
        cand = max(1, (1 << 21) // per_b_bytes)      # target ~2 MiB blocks
        for d in range(min(B, cand), 0, -1):
            if B % d == 0:
                t_b = d
                break

    grid = (pl.cdiv(B, t_b), pl.cdiv(C, t_c), pl.cdiv(HW, t_hw))

    out = pl.pallas_call(
        film_kernel,
        out_shape=jax.ShapeDtypeStruct((B, C, HW), feature_map_nchw.dtype),
        grid_spec=pltpu.PrefetchScalarGridSpec(
            num_scalar_prefetch=0,
            grid=grid,
            in_specs=[
                pl.BlockSpec((t_b, t_c, 1), lambda b, ci, hi: (b, ci, 0)),     # gamma
                pl.BlockSpec((t_b, t_c, 1), lambda b, ci, hi: (b, ci, 0)),     # beta
                pl.BlockSpec((t_b, t_c, t_hw), lambda b, ci, hi: (b, ci, hi)),  # fm
            ],
            out_specs=pl.BlockSpec((t_b, t_c, t_hw), lambda b, ci, hi: (b, ci, hi)),
        ),
        compiler_params=pltpu.CompilerParams(
            dimension_semantics=("parallel", "parallel", "parallel"),
            vmem_limit_bytes=32 * 1024 * 1024,
        ),
    )(gamma3, beta3, fm)

    # Free reshape back: (B, C, HW) -> NCHW.
    return out.reshape(B, C, H, W)


if __name__ == "__main__":
    # Small shapes consistent with the module: C is fixed at 2048 by the Linears.
    B, K, H, W = 2, 8, 16, 16

    key = jax.random.PRNGKey(0)
    k_fm, k_cond, k_wh, k_bh, k_wa, k_ba = jax.random.split(key, 6)

    feature_map = jax.random.normal(k_fm, (B, C_OUT, H, W), dtype=jnp.float32)
    condition_vector = jax.random.normal(k_cond, (B, K), dtype=jnp.float32)

    # Deterministic nn.Linear-style init: U(-1/sqrt(K), 1/sqrt(K))
    bound = 1.0 / (K ** 0.5)
    w_h = jax.random.uniform(k_wh, (C_OUT, K), jnp.float32, -bound, bound)
    b_h = jax.random.uniform(k_bh, (C_OUT,), jnp.float32, -bound, bound)
    w_a = jax.random.uniform(k_wa, (C_OUT, K), jnp.float32, -bound, bound)
    b_a = jax.random.uniform(k_ba, (C_OUT,), jnp.float32, -bound, bound)

    out = resnet_film_layer(feature_map, condition_vector, w_h, b_h, w_a, b_a)
    out = jax.block_until_ready(out)

    # Pure-JAX reference check
    gamma_ref = condition_vector @ w_h.T + b_h      # (B, C)
    beta_ref = condition_vector @ w_a.T + b_a       # (B, C)
    ref = feature_map * gamma_ref[:, :, None, None] + beta_ref[:, :, None, None]

    assert out.shape == (B, C_OUT, H, W)
    assert jnp.allclose(out, ref, atol=1e-5, rtol=1e-5)
    print("KERNEL_OK")
</pallas_src>

<mosaic_0001>
module attributes {stable_mosaic.version = 11 : i64} {
  func.func @film_kernel(%arg0: i32, %arg1: i32, %arg2: i32, %arg3: memref<2x512x1xf32, #tpu.memory_space<vmem>>, %arg4: memref<2x512x1xf32, #tpu.memory_space<vmem>>, %arg5: memref<2x512x256xf32, #tpu.memory_space<vmem>>, %arg6: memref<2x512x256xf32, #tpu.memory_space<vmem>>) attributes {dimension_semantics = [#tpu.dimension_semantics<parallel>, #tpu.dimension_semantics<parallel>, #tpu.dimension_semantics<parallel>], iteration_bounds = array<i64: 1, 4, 1>, scalar_prefetch = 0 : i64, scratch_operands = 0 : i64, tpu.core_type = #tpu.core_type<tc>, window_params = [{transform_indices = @transform_0, window_bounds = array<i64: 2, 512, 1>}, {transform_indices = @transform_1, window_bounds = array<i64: 2, 512, 1>}, {transform_indices = @transform_2, window_bounds = array<i64: 2, 512, 256>}, {transform_indices = @transform_3, window_bounds = array<i64: 2, 512, 256>}]} {
    %c0 = arith.constant 0 : index
    %c0_0 = arith.constant 0 : index
    %c0_1 = arith.constant 0 : index
    %0 = vector.load %arg5[%c0, %c0_0, %c0_1] : memref<2x512x256xf32, #tpu.memory_space<vmem>>, vector<2x512x256xf32>
    %c0_2 = arith.constant 0 : index
    %c0_3 = arith.constant 0 : index
    %c0_4 = arith.constant 0 : index
    %1 = vector.load %arg3[%c0_2, %c0_3, %c0_4] : memref<2x512x1xf32, #tpu.memory_space<vmem>>, vector<2x512x1xf32>
    %2 = vector.broadcast %1 : vector<2x512x1xf32> to vector<2x512x256xf32>
    %3 = arith.mulf %0, %2 : vector<2x512x256xf32>
    %c0_5 = arith.constant 0 : index
    %c0_6 = arith.constant 0 : index
    %c0_7 = arith.constant 0 : index
    %4 = vector.load %arg4[%c0_5, %c0_6, %c0_7] : memref<2x512x1xf32, #tpu.memory_space<vmem>>, vector<2x512x1xf32>
    %5 = vector.broadcast %4 : vector<2x512x1xf32> to vector<2x512x256xf32>
    %6 = arith.addf %3, %5 : vector<2x512x256xf32>
    %c0_8 = arith.constant 0 : index
    %c0_9 = arith.constant 0 : index
    %c0_10 = arith.constant 0 : index
    %7 = vector.load %arg6[%c0_8, %c0_9, %c0_10] : memref<2x512x256xf32, #tpu.memory_space<vmem>>, vector<2x512x256xf32>
    tpu.vector_store %arg6[%c0_8, %c0_9, %c0_10], %6 {strides = array<i32>} : memref<2x512x256xf32, #tpu.memory_space<vmem>>, vector<2x512x256xf32>,
    return
  }
  func.func @transform_0(%arg0: i32, %arg1: i32, %arg2: i32) -> (i32, i32, i32) {
    %c0_i32 = arith.constant 0 : i32
    %c0_i32_0 = arith.constant 0 : i32
    return %arg0, %arg1, %c0_i32 : i32, i32, i32
  }
  func.func @transform_1(%arg0: i32, %arg1: i32, %arg2: i32) -> (i32, i32, i32) {
    %c0_i32 = arith.constant 0 : i32
    %c0_i32_0 = arith.constant 0 : i32
    return %arg0, %arg1, %c0_i32 : i32, i32, i32
  }
  func.func @transform_2(%arg0: i32, %arg1: i32, %arg2: i32) -> (i32, i32, i32) {
    %c0_i32 = arith.constant 0 : i32
    return %arg0, %arg1, %arg2 : i32, i32, i32
  }
  func.func @transform_3(%arg0: i32, %arg1: i32, %arg2: i32) -> (i32, i32, i32) {
    %c0_i32 = arith.constant 0 : i32
    return %arg0, %arg1, %arg2 : i32, i32, i32
  }
}

</mosaic_0001>

<bundles_post_ra>
// kernel: tpu_custom_call.1
= control target key start
LH: loop header
LB: loop body
LE: loop exit
PB: predicated region body
PF: predicated region fallthrough
CT: control target
= control target key end

     0   :  { %8 = vsyncpa [#allocation6], 0  ;;  %s7261_s0 = inlined_call_operand.vmem [shape: f32[2,2048,1], index: 0, kind: input, shape index: {}]   ;;  %s7262_s1 = inlined_call_operand.vmem [shape: f32[2,2048,1], index: 1, kind: input, shape index: {}]   ;;  %s7263_s2 = inlined_call_operand.vmem [shape: f32[2,2048,256], index: 2, kind: input, shape index: {}]   ;;  %s7264_s3 = inlined_call_operand.hbm [shape: f32[2,2048,256], index: 3, kind: output, shape index: {}]  }
   0x1   :  { %10 = vsyncpa [#allocation6 + $0x1], 0  ;;  %s4800_s12 = smov 0   ;;  %s4802_s13 = smov 0  }
   0x2   :  { %s4804_s14 = smov 0   ;;  %s4806_s15 = smov 0  }
   0x3   :  { %s4808_s16 = smov 0   ;;  %s4810_s17 = smov 0  }
   0x4 LB: > { %s4618_s18 = sadd.s32 4294967295, %s4770_s17   ;;  %s4619_s19 = sadd.s32 4294967294, %s4770_s17   ;;  %s4770_s17 = sphi %s4810_s17, %s16_s17   ;;  %s4766_s16 = sphi %s4808_s16, %s7515_s16   ;;  %s4762_s15 = sphi %s4806_s15, %s7514_s15   ;;  %s4758_s14 = sphi %s4804_s14, %s7513_s14   ;;  %s4754_s13 = sphi %s4802_s13, %s7512_s13   ;;  %s4750_s12 = sphi %s4800_s12, %s7511_s12  }
   0x5   : > { %s31_s20 = sadd.s32 1, %s4766_s16  ;;  %s44_s21 = sadd.s32 1, %s4758_s14 }
   0x6   : > { %p33_p0 = scmp.ge.s32.totalorder %s31_s20, 4  ;;  %p51_p1 = scmp.ne.s32.totalorder %s4758_s14, %s4754_s13 }
   0x7   : > { %p52_p2 = scmp.eq.s32.totalorder %s4770_s17, 0  ;;  %p143_p3 = scmp.eq.s32.totalorder %s4618_s18, 3 }
   0x8   : > { %s7517_s20 = smov (%p33_p0, %s31_s20), 0  ;;  %p148_p6 = scmp.ne.s32.totalorder %s4754_s13, %s4750_s12 }
   0x9   : > { %p4839_p4 = por %p52_p2, %p51_p1  ;;  %p4843_p5 = por %p143_p3, %p51_p1 }
   0xa   : > { %s40_s24 = ssub.s32 %s4766_s16, %s7517_s20  ;;  %p149_p8 = scmp.eq.s32.totalorder %s4619_s19, 3 }
   0xb   : > { %p42_p7 = scmp.eq.s32.totalorder %s40_s24, 0  ;;  %p4621_p10 = scmp.ge.s32.totalorder %s4770_s17, 4 }
   0xc   : > { %p4854_p9 = por %p149_p8, %p148_p6 }
   0xd   : > { %s4852_s25 = scalar_select %p42_p7, %s4758_s14, %s44_s21  }
   0xe   : > { %165 = sbr.rel (%p4621_p10) target bundleno = 289 (0x121), region = 16 }
  0x15   : > { %168 = sbr.rel (!%p4839_p4) target bundleno = 89 (0x59), region = 20  ;;  %s170_s27 = sand.u32 (%p4839_p4), 1, %s4758_s14  }
  0x16   : > { %s4643_s28 = sshll.u32 (%p4839_p4), %s4766_s16, 9  ;;  %s4622_s29 = sshll.u32 (%p4839_p4), %s170_s27, 10 }
  0x17   : > { %s4866_s5 = scalar_lea.vmem (%p4839_p4), %s7261_s0, %s4643_s28  ;;  %s4871_s6 = scalar_lea.vmem (%p4839_p4), [#allocation2], %s4622_s29 }
  0x18   : > { %v460_v0 = vld [vmem:[%s4866_s5] sm:$0xff] (%p4839_p4)  ;;  %v462_v1 = vld [vmem:[%s4866_s5 + $0x8] sm:$0xff] (%p4839_p4)  ;;  %v464_v2 = vld [vmem:[%s4866_s5 + $0x10] sm:$0xff] (%p4839_p4) }
  0x19   : > { %461 = vst [vmem:[%s4871_s6] sm:$0xff] (%p4839_p4), %v460_v0  ;;  %463 = vst [vmem:[%s4871_s6 + $0x8] sm:$0xff] (%p4839_p4), %v462_v1  ;;  %v466_v3 = vld [vmem:[%s4866_s5 + $0x18] sm:$0xff] (%p4839_p4)  ;;  %v468_v4 = vld [vmem:[%s4866_s5 + $0x20] sm:$0xff] (%p4839_p4) }
  0x1a   : > { %465 = vst [vmem:[%s4871_s6 + $0x10] sm:$0xff] (%p4839_p4), %v464_v2  ;;  %v470_v5 = vld [vmem:[%s4866_s5 + $0x28] sm:$0xff] (%p4839_p4)  ;;  %467 = vst [vmem:[%s4871_s6 + $0x18] sm:$0xff] (%p4839_p4), %v466_v3  ;;  %v472_v6 = vld [vmem:[%s4866_s5 + $0x30] sm:$0xff] (%p4839_p4) }
  0x1b   : > { %469 = vst [vmem:[%s4871_s6 + $0x20] sm:$0xff] (%p4839_p4), %v468_v4  ;;  %471 = vst [vmem:[%s4871_s6 + $0x28] sm:$0xff] (%p4839_p4), %v470_v5  ;;  %v474_v7 = vld [vmem:[%s4866_s5 + $0x38] sm:$0xff] (%p4839_p4)  ;;  %v476_v8 = vld [vmem:[%s4866_s5 + $0x40] sm:$0xff] (%p4839_p4) }
  0x1c   : > { %473 = vst [vmem:[%s4871_s6 + $0x30] sm:$0xff] %v472_v6  ;;  %475 = vst [vmem:[%s4871_s6 + $0x38] sm:$0xff] %v474_v7  ;;  %v478_v9 = vld [vmem:[%s4866_s5 + $0x48] sm:$0xff]  ;;  %v480_v10 = vld [vmem:[%s4866_s5 + $0x50] sm:$0xff] }
  0x1d   : > { %477 = vst [vmem:[%s4871_s6 + $0x40] sm:$0xff] %v476_v8  ;;  %v482_v11 = vld [vmem:[%s4866_s5 + $0x58] sm:$0xff]  ;;  %479 = vst [vmem:[%s4871_s6 + $0x48] sm:$0xff] %v478_v9  ;;  %v484_v12 = vld [vmem:[%s4866_s5 + $0x60] sm:$0xff] }
  0x1e   : > { %481 = vst [vmem:[%s4871_s6 + $0x50] sm:$0xff] %v480_v10  ;;  %483 = vst [vmem:[%s4871_s6 + $0x58] sm:$0xff] %v482_v11  ;;  %v486_v13 = vld [vmem:[%s4866_s5 + $0x68] sm:$0xff]  ;;  %v488_v14 = vld [vmem:[%s4866_s5 + $0x70] sm:$0xff] }
  0x1f   : > { %485 = vst [vmem:[%s4871_s6 + $0x60] sm:$0xff] %v484_v12  ;;  %487 = vst [vmem:[%s4871_s6 + $0x68] sm:$0xff] %v486_v13  ;;  %v490_v15 = vld [vmem:[%s4866_s5 + $0x78] sm:$0xff]  ;;  %v492_v16 = vld [vmem:[%s4866_s5 + $0x80] sm:$0xff] }
  0x20   : > { %489 = vst [vmem:[%s4871_s6 + $0x70] sm:$0xff] %v488_v14  ;;  %v494_v17 = vld [vmem:[%s4866_s5 + $0x88] sm:$0xff]  ;;  %491 = vst [vmem:[%s4871_s6 + $0x78] sm:$0xff] %v490_v15  ;;  %v496_v18 = vld [vmem:[%s4866_s5 + $0x90] sm:$0xff] }
  0x21   : > { %493 = vst [vmem:[%s4871_s6 + $0x80] sm:$0xff] %v492_v16  ;;  %495 = vst [vmem:[%s4871_s6 + $0x88] sm:$0xff] %v494_v17  ;;  %v498_v19 = vld [vmem:[%s4866_s5 + $0x98] sm:$0xff]  ;;  %v500_v20 = vld [vmem:[%s4866_s5 + $0xa0] sm:$0xff] }
  0x22   : > { %497 = vst [vmem:[%s4871_s6 + $0x90] sm:$0xff] %v496_v18  ;;  %499 = vst [vmem:[%s4871_s6 + $0x98] sm:$0xff] %v498_v19  ;;  %v502_v21 = vld [vmem:[%s4866_s5 + $0xa8] sm:$0xff]  ;;  %v504_v22 = vld [vmem:[%s4866_s5 + $0xb0] sm:$0xff] }
  0x23   : > { %501 = vst [vmem:[%s4871_s6 + $0xa0] sm:$0xff] %v500_v20  ;;  %v506_v23 = vld [vmem:[%s4866_s5 + $0xb8] sm:$0xff]  ;;  %503 = vst [vmem:[%s4871_s6 + $0xa8] sm:$0xff] %v502_v21  ;;  %v508_v24 = vld [vmem:[%s4866_s5 + $0xc0] sm:$0xff] }
  0x24   : > { %505 = vst [vmem:[%s4871_s6 + $0xb0] sm:$0xff] %v504_v22  ;;  %507 = vst [vmem:[%s4871_s6 + $0xb8] sm:$0xff] %v506_v23  ;;  %v510_v25 = vld [vmem:[%s4866_s5 + $0xc8] sm:$0xff]  ;;  %v512_v26 = vld [vmem:[%s4866_s5 + $0xd0] sm:$0xff] }
  0x25   : > { %509 = vst [vmem:[%s4871_s6 + $0xc0] sm:$0xff] %v508_v24  ;;  %511 = vst [vmem:[%s4871_s6 + $0xc8] sm:$0xff] %v510_v25  ;;  %v514_v27 = vld [vmem:[%s4866_s5 + $0xd8] sm:$0xff]  ;;  %v516_v28 = vld [vmem:[%s4866_s5 + $0xe0] sm:$0xff] }
  0x26   : > { %513 = vst [vmem:[%s4871_s6 + $0xd0] sm:$0xff] %v512_v26  ;;  %v518_v29 = vld [vmem:[%s4866_s5 + $0xe8] sm:$0xff]  ;;  %515 = vst [vmem:[%s4871_s6 + $0xd8] sm:$0xff] %v514_v27  ;;  %v520_v30 = vld [vmem:[%s4866_s5 + $0xf0] sm:$0xff] }
  0x27   : > { %517 = vst [vmem:[%s4871_s6 + $0xe0] sm:$0xff] %v516_v28  ;;  %519 = vst [vmem:[%s4871_s6 + $0xe8] sm:$0xff] %v518_v29  ;;  %v522_v31 = vld [vmem:[%s4866_s5 + $0xf8] sm:$0xff]  ;;  %v524_v32 = vld [vmem:[%s4866_s5 + $0x100] sm:$0xff] }
  0x28   : > { %521 = vst [vmem:[%s4871_s6 + $0xf0] sm:$0xff] %v520_v30  ;;  %523 = vst [vmem:[%s4871_s6 + $0xf8] sm:$0xff] %v522_v31  ;;  %v526_v33 = vld [vmem:[%s4866_s5 + $0x108] sm:$0xff]  ;;  %v528_v34 = vld [vmem:[%s4866_s5 + $0x110] sm:$0xff] }
  0x29   : > { %525 = vst [vmem:[%s4871_s6 + $0x100] sm:$0xff] %v524_v32  ;;  %v530_v35 = vld [vmem:[%s4866_s5 + $0x118] sm:$0xff]  ;;  %527 = vst [vmem:[%s4871_s6 + $0x108] sm:$0xff] %v526_v33  ;;  %v532_v36 = vld [vmem:[%s4866_s5 + $0x120] sm:$0xff] }
  0x2a   : > { %529 = vst [vmem:[%s4871_s6 + $0x110] sm:$0xff] %v528_v34  ;;  %531 = vst [vmem:[%s4871_s6 + $0x118] sm:$0xff] %v530_v35  ;;  %v534_v37 = vld [vmem:[%s4866_s5 + $0x128] sm:$0xff]  ;;  %v536_v38 = vld [vmem:[%s4866_s5 + $0x130] sm:$0xff] }
  0x2b   : > { %533 = vst [vmem:[%s4871_s6 + $0x120] sm:$0xff] %v532_v36  ;;  %535 = vst [vmem:[%s4871_s6 + $0x128] sm:$0xff] %v534_v37  ;;  %v538_v39 = vld [vmem:[%s4866_s5 + $0x138] sm:$0xff]  ;;  %v540_v40 = vld [vmem:[%s4866_s5 + $0x140] sm:$0xff] }
  0x2c   : > { %537 = vst [vmem:[%s4871_s6 + $0x130] sm:$0xff] %v536_v38  ;;  %v542_v41 = vld [vmem:[%s4866_s5 + $0x148] sm:$0xff]  ;;  %539 = vst [vmem:[%s4871_s6 + $0x138] sm:$0xff] %v538_v39  ;;  %v544_v42 = vld [vmem:[%s4866_s5 + $0x150] sm:$0xff] }
  0x2d   : > { %541 = vst [vmem:[%s4871_s6 + $0x140] sm:$0xff] %v540_v40  ;;  %543 = vst [vmem:[%s4871_s6 + $0x148] sm:$0xff] %v542_v41  ;;  %v546_v43 = vld [vmem:[%s4866_s5 + $0x158] sm:$0xff]  ;;  %v548_v44 = vld [vmem:[%s4866_s5 + $0x160] sm:$0xff] }
  0x2e   : > { %545 = vst [vmem:[%s4871_s6 + $0x150] sm:$0xff] %v544_v42  ;;  %547 = vst [vmem:[%s4871_s6 + $0x158] sm:$0xff] %v546_v43  ;;  %v550_v45 = vld [vmem:[%s4866_s5 + $0x168] sm:$0xff]  ;;  %v552_v46 = vld [vmem:[%s4866_s5 + $0x170] sm:$0xff] }
  0x2f   : > { %549 = vst [vmem:[%s4871_s6 + $0x160] sm:$0xff] %v548_v44  ;;  %v554_v47 = vld [vmem:[%s4866_s5 + $0x178] sm:$0xff]  ;;  %551 = vst [vmem:[%s4871_s6 + $0x168] sm:$0xff] %v550_v45  ;;  %v556_v48 = vld [vmem:[%s4866_s5 + $0x180] sm:$0xff] }
  0x30   : > { %553 = vst [vmem:[%s4871_s6 + $0x170] sm:$0xff] %v552_v46  ;;  %555 = vst [vmem:[%s4871_s6 + $0x178] sm:$0xff] %v554_v47  ;;  %v558_v49 = vld [vmem:[%s4866_s5 + $0x188] sm:$0xff]  ;;  %v560_v50 = vld [vmem:[%s4866_s5 + $0x190] sm:$0xff] }
  0x31   : > { %557 = vst [vmem:[%s4871_s6 + $0x180] sm:$0xff] %v556_v48  ;;  %559 = vst [vmem:[%s4871_s6 + $0x188] sm:$0xff] %v558_v49  ;;  %v562_v51 = vld [vmem:[%s4866_s5 + $0x198] sm:$0xff]  ;;  %v564_v52 = vld [vmem:[%s4866_s5 + $0x1a0] sm:$0xff] }
  0x32   : > { %561 = vst [vmem:[%s4871_s6 + $0x190] sm:$0xff] %v560_v50  ;;  %v566_v53 = vld [vmem:[%s4866_s5 + $0x1a8] sm:$0xff]  ;;  %563 = vst [vmem:[%s4871_s6 + $0x198] sm:$0xff] %v562_v51  ;;  %v568_v54 = vld [vmem:[%s4866_s5 + $0x1b0] sm:$0xff] }
  0x33   : > { %565 = vst [vmem:[%s4871_s6 + $0x1a0] sm:$0xff] %v564_v52  ;;  %567 = vst [vmem:[%s4871_s6 + $0x1a8] sm:$0xff] %v566_v53  ;;  %v570_v55 = vld [vmem:[%s4866_s5 + $0x1b8] sm:$0xff]  ;;  %v572_v56 = vld [vmem:[%s4866_s5 + $0x1c0] sm:$0xff] }
  0x34   : > { %569 = vst [vmem:[%s4871_s6 + $0x1b0] sm:$0xff] %v568_v54  ;;  %571 = vst [vmem:[%s4871_s6 + $0x1b8] sm:$0xff] %v570_v55  ;;  %v574_v57 = vld [vmem:[%s4866_s5 + $0x1c8] sm:$0xff]  ;;  %v576_v58 = vld [vmem:[%s4866_s5 + $0x1d0] sm:$0xff] }
  0x35   : > { %573 = vst [vmem:[%s4871_s6 + $0x1c0] sm:$0xff] %v572_v56  ;;  %v578_v59 = vld [vmem:[%s4866_s5 + $0x1d8] sm:$0xff]  ;;  %575 = vst [vmem:[%s4871_s6 + $0x1c8] sm:$0xff] %v574_v57  ;;  %v580_v60 = vld [vmem:[%s4866_s5 + $0x1e0] sm:$0xff] }
  0x36   : > { %577 = vst [vmem:[%s4871_s6 + $0x1d0] sm:$0xff] %v576_v58  ;;  %579 = vst [vmem:[%s4871_s6 + $0x1d8] sm:$0xff] %v578_v59  ;;  %v582_v61 = vld [vmem:[%s4866_s5 + $0x1e8] sm:$0xff]  ;;  %v584_v62 = vld [vmem:[%s4866_s5 + $0x1f0] sm:$0xff] }
  0x37   : > { %581 = vst [vmem:[%s4871_s6 + $0x1e0] sm:$0xff] %v580_v60  ;;  %583 = vst [vmem:[%s4871_s6 + $0x1e8] sm:$0xff] %v582_v61  ;;  %v586_v63 = vld [vmem:[%s4866_s5 + $0x1f8] sm:$0xff]  ;;  %v588_v0 = vld [vmem:[%s4866_s5 + $0x800] sm:$0xff] }
  0x38   : > { %585 = vst [vmem:[%s4871_s6 + $0x1f0] sm:$0xff] %v584_v62  ;;  %v590_v1 = vld [vmem:[%s4866_s5 + $0x808] sm:$0xff]  ;;  %587 = vst [vmem:[%s4871_s6 + $0x1f8] sm:$0xff] %v586_v63  ;;  %v592_v2 = vld [vmem:[%s4866_s5 + $0x810] sm:$0xff] }
  0x39   : > { %589 = vst [vmem:[%s4871_s6 + $0x200] sm:$0xff] %v588_v0  ;;  %591 = vst [vmem:[%s4871_s6 + $0x208] sm:$0xff] %v590_v1  ;;  %v594_v3 = vld [vmem:[%s4866_s5 + $0x818] sm:$0xff]  ;;  %v596_v4 = vld [vmem:[%s4866_s5 + $0x820] sm:$0xff] }
  0x3a   : > { %593 = vst [vmem:[%s4871_s6 + $0x210] sm:$0xff] %v592_v2  ;;  %595 = vst [vmem:[%s4871_s6 + $0x218] sm:$0xff] %v594_v3  ;;  %v598_v5 = vld [vmem:[%s4866_s5 + $0x828] sm:$0xff]  ;;  %v600_v6 = vld [vmem:[%s4866_s5 + $0x830] sm:$0xff] }
  0x3b   : > { %597 = vst [vmem:[%s4871_s6 + $0x220] sm:$0xff] %v596_v4  ;;  %v602_v7 = vld [vmem:[%s4866_s5 + $0x838] sm:$0xff]  ;;  %599 = vst [vmem:[%s4871_s6 + $0x228] sm:$0xff] %v598_v5  ;;  %v604_v8 = vld [vmem:[%s4866_s5 + $0x840] sm:$0xff] }
  0x3c   : > { %601 = vst [vmem:[%s4871_s6 + $0x230] sm:$0xff] %v600_v6  ;;  %603 = vst [vmem:[%s4871_s6 + $0x238] sm:$0xff] %v602_v7  ;;  %v606_v9 = vld [vmem:[%s4866_s5 + $0x848] sm:$0xff]  ;;  %v608_v10 = vld [vmem:[%s4866_s5 + $0x850] sm:$0xff] }
  0x3d   : > { %605 = vst [vmem:[%s4871_s6 + $0x240] sm:$0xff] %v604_v8  ;;  %607 = vst [vmem:[%s4871_s6 + $0x248] sm:$0xff] %v606_v9  ;;  %v610_v11 = vld [vmem:[%s4866_s5 + $0x858] sm:$0xff]  ;;  %v612_v12 = vld [vmem:[%s4866_s5 + $0x860] sm:$0xff] }
  0x3e   : > { %609 = vst [vmem:[%s4871_s6 + $0x250] sm:$0xff] %v608_v10  ;;  %v614_v13 = vld [vmem:[%s4866_s5 + $0x868] sm:$0xff]  ;;  %611 = vst [vmem:[%s4871_s6 + $0x258] sm:$0xff] %v610_v11  ;;  %v616_v14 = vld [vmem:[%s4866_s5 + $0x870] sm:$0xff] }
  0x3f   : > { %613 = vst [vmem:[%s4871_s6 + $0x260] sm:$0xff] %v612_v12  ;;  %615 = vst [vmem:[%s4871_s6 + $0x268] sm:$0xff] %v614_v13  ;;  %v618_v15 = vld [vmem:[%s4866_s5 + $0x878] sm:$0xff]  ;;  %v620_v16 = vld [vmem:[%s4866_s5 + $0x880] sm:$0xff] }
  0x40   : > { %617 = vst [vmem:[%s4871_s6 + $0x270] sm:$0xff] %v616_v14  ;;  %619 = vst [vmem:[%s4871_s6 + $0x278] sm:$0xff] %v618_v15  ;;  %v622_v17 = vld [vmem:[%s4866_s5 + $0x888] sm:$0xff]  ;;  %v624_v18 = vld [vmem:[%s4866_s5 + $0x890] sm:$0xff] }
  0x41   : > { %621 = vst [vmem:[%s4871_s6 + $0x280] sm:$0xff] %v620_v16  ;;  %v626_v19 = vld [vmem:[%s4866_s5 + $0x898] sm:$0xff]  ;;  %623 = vst [vmem:[%s4871_s6 + $0x288] sm:$0xff] %v622_v17  ;;  %v628_v20 = vld [vmem:[%s4866_s5 + $0x8a0] sm:$0xff] }
  0x42   : > { %625 = vst [vmem:[%s4871_s6 + $0x290] sm:$0xff] %v624_v18  ;;  %627 = vst [vmem:[%s4871_s6 + $0x298] sm:$0xff] %v626_v19  ;;  %v630_v21 = vld [vmem:[%s4866_s5 + $0x8a8] sm:$0xff]  ;;  %v632_v22 = vld [vmem:[%s4866_s5 + $0x8b0] sm:$0xff] }
  0x43   : > { %629 = vst [vmem:[%s4871_s6 + $0x2a0] sm:$0xff] %v628_v20  ;;  %631 = vst [vmem:[%s4871_s6 + $0x2a8] sm:$0xff] %v630_v21  ;;  %v634_v23 = vld [vmem:[%s4866_s5 + $0x8b8] sm:$0xff]  ;;  %v636_v24 = vld [vmem:[%s4866_s5 + $0x8c0] sm:$0xff] }
  0x44   : > { %633 = vst [vmem:[%s4871_s6 + $0x2b0] sm:$0xff] %v632_v22  ;;  %v638_v25 = vld [vmem:[%s4866_s5 + $0x8c8] sm:$0xff]  ;;  %635 = vst [vmem:[%s4871_s6 + $0x2b8] sm:$0xff] %v634_v23  ;;  %v640_v26 = vld [vmem:[%s4866_s5 + $0x8d0] sm:$0xff] }
  0x45   : > { %637 = vst [vmem:[%s4871_s6 + $0x2c0] sm:$0xff] %v636_v24  ;;  %639 = vst [vmem:[%s4871_s6 + $0x2c8] sm:$0xff] %v638_v25  ;;  %v642_v27 = vld [vmem:[%s4866_s5 + $0x8d8] sm:$0xff]  ;;  %v644_v28 = vld [vmem:[%s4866_s5 + $0x8e0] sm:$0xff] }
  0x46   : > { %641 = vst [vmem:[%s4871_s6 + $0x2d0] sm:$0xff] %v640_v26  ;;  %643 = vst [vmem:[%s4871_s6 + $0x2d8] sm:$0xff] %v642_v27  ;;  %v646_v29 = vld [vmem:[%s4866_s5 + $0x8e8] sm:$0xff]  ;;  %v648_v30 = vld [vmem:[%s4866_s5 + $0x8f0] sm:$0xff] }
  0x47   : > { %645 = vst [vmem:[%s4871_s6 + $0x2e0] sm:$0xff] %v644_v28  ;;  %v650_v31 = vld [vmem:[%s4866_s5 + $0x8f8] sm:$0xff]  ;;  %647 = vst [vmem:[%s4871_s6 + $0x2e8] sm:$0xff] %v646_v29  ;;  %v652_v32 = vld [vmem:[%s4866_s5 + $0x900] sm:$0xff] }
  0x48   : > { %649 = vst [vmem:[%s4871_s6 + $0x2f0] sm:$0xff] %v648_v30  ;;  %651 = vst [vmem:[%s4871_s6 + $0x2f8] sm:$0xff] %v650_v31  ;;  %v654_v33 = vld [vmem:[%s4866_s5 + $0x908] sm:$0xff]  ;;  %v656_v34 = vld [vmem:[%s4866_s5 + $0x910] sm:$0xff] }
  0x49   : > { %653 = vst [vmem:[%s4871_s6 + $0x300] sm:$0xff] %v652_v32  ;;  %655 = vst [vmem:[%s4871_s6 + $0x308] sm:$0xff] %v654_v33  ;;  %v658_v35 = vld [vmem:[%s4866_s5 + $0x918] sm:$0xff]  ;;  %v660_v36 = vld [vmem:[%s4866_s5 + $0x920] sm:$0xff] }
  0x4a   : > { %657 = vst [vmem:[%s4871_s6 + $0x310] sm:$0xff] %v656_v34  ;;  %v662_v37 = vld [vmem:[%s4866_s5 + $0x928] sm:$0xff]  ;;  %659 = vst [vmem:[%s4871_s6 + $0x318] sm:$0xff] %v658_v35  ;;  %v664_v38 = vld [vmem:[%s4866_s5 + $0x930] sm:$0xff] }
  0x4b   : > { %661 = vst [vmem:[%s4871_s6 + $0x320] sm:$0xff] %v660_v36  ;;  %663 = vst [vmem:[%s4871_s6 + $0x328] sm:$0xff] %v662_v37  ;;  %v666_v39 = vld [vmem:[%s4866_s5 + $0x938] sm:$0xff]  ;;  %v668_v40 = vld [vmem:[%s4866_s5 + $0x940] sm:$0xff] }
  0x4c   : > { %665 = vst [vmem:[%s4871_s6 + $0x330] sm:$0xff] %v664_v38  ;;  %667 = vst [vmem:[%s4871_s6 + $0x338] sm:$0xff] %v666_v39  ;;  %v670_v41 = vld [vmem:[%s4866_s5 + $0x948] sm:$0xff]  ;;  %v672_v42 = vld [vmem:[%s4866_s5 + $0x950] sm:$0xff] }
  0x4d   : > { %669 = vst [vmem:[%s4871_s6 + $0x340] sm:$0xff] %v668_v40  ;;  %v674_v43 = vld [vmem:[%s4866_s5 + $0x958] sm:$0xff]  ;;  %671 = vst [vmem:[%s4871_s6 + $0x348] sm:$0xff] %v670_v41  ;;  %v676_v44 = vld [vmem:[%s4866_s5 + $0x960] sm:$0xff] }
  0x4e   : > { %673 = vst [vmem:[%s4871_s6 + $0x350] sm:$0xff] %v672_v42  ;;  %675 = vst [vmem:[%s4871_s6 + $0x358] sm:$0xff] %v674_v43  ;;  %v678_v45 = vld [vmem:[%s4866_s5 + $0x968] sm:$0xff]  ;;  %v680_v46 = vld [vmem:[%s4866_s5 + $0x970] sm:$0xff] }
  0x4f   : > { %677 = vst [vmem:[%s4871_s6 + $0x360] sm:$0xff] %v676_v44  ;;  %679 = vst [vmem:[%s4871_s6 + $0x368] sm:$0xff] %v678_v45  ;;  %v682_v47 = vld [vmem:[%s4866_s5 + $0x978] sm:$0xff]  ;;  %v684_v48 = vld [vmem:[%s4866_s5 + $0x980] sm:$0xff] }
  0x50   : > { %681 = vst [vmem:[%s4871_s6 + $0x370] sm:$0xff] %v680_v46  ;;  %v686_v49 = vld [vmem:[%s4866_s5 + $0x988] sm:$0xff]  ;;  %683 = vst [vmem:[%s4871_s6 + $0x378] sm:$0xff] %v682_v47  ;;  %v688_v50 = vld [vmem:[%s4866_s5 + $0x990] sm:$0xff] }
  0x51   : > { %685 = vst [vmem:[%s4871_s6 + $0x380] sm:$0xff] %v684_v48  ;;  %687 = vst [vmem:[%s4871_s6 + $0x388] sm:$0xff] %v686_v49  ;;  %v690_v51 = vld [vmem:[%s4866_s5 + $0x998] sm:$0xff]  ;;  %v692_v52 = vld [vmem:[%s4866_s5 + $0x9a0] sm:$0xff] }
  0x52   : > { %689 = vst [vmem:[%s4871_s6 + $0x390] sm:$0xff] %v688_v50  ;;  %691 = vst [vmem:[%s4871_s6 + $0x398] sm:$0xff] %v690_v51  ;;  %v694_v53 = vld [vmem:[%s4866_s5 + $0x9a8] sm:$0xff]  ;;  %v696_v54 = vld [vmem:[%s4866_s5 + $0x9b0] sm:$0xff] }
  0x53   : > { %693 = vst [vmem:[%s4871_s6 + $0x3a0] sm:$0xff] %v692_v52  ;;  %v698_v55 = vld [vmem:[%s4866_s5 + $0x9b8] sm:$0xff]  ;;  %695 = vst [vmem:[%s4871_s6 + $0x3a8] sm:$0xff] %v694_v53  ;;  %v700_v56 = vld [vmem:[%s4866_s5 + $0x9c0] sm:$0xff] }
  0x54   : > { %697 = vst [vmem:[%s4871_s6 + $0x3b0] sm:$0xff] %v696_v54  ;;  %699 = vst [vmem:[%s4871_s6 + $0x3b8] sm:$0xff] %v698_v55  ;;  %v702_v57 = vld [vmem:[%s4866_s5 + $0x9c8] sm:$0xff]  ;;  %v704_v58 = vld [vmem:[%s4866_s5 + $0x9d0] sm:$0xff] }
  0x55   : > { %701 = vst [vmem:[%s4871_s6 + $0x3c0] sm:$0xff] %v700_v56  ;;  %703 = vst [vmem:[%s4871_s6 + $0x3c8] sm:$0xff] %v702_v57  ;;  %v706_v59 = vld [vmem:[%s4866_s5 + $0x9d8] sm:$0xff]  ;;  %v708_v60 = vld [vmem:[%s4866_s5 + $0x9e0] sm:$0xff] }
  0x56   : > { %705 = vst [vmem:[%s4871_s6 + $0x3d0] sm:$0xff] %v704_v58  ;;  %v710_v61 = vld [vmem:[%s4866_s5 + $0x9e8] sm:$0xff]  ;;  %707 = vst [vmem:[%s4871_s6 + $0x3d8] sm:$0xff] %v706_v59  ;;  %v712_v62 = vld [vmem:[%s4866_s5 + $0x9f0] sm:$0xff] }
  0x57   : > { %709 = vst [vmem:[%s4871_s6 + $0x3e0] sm:$0xff] %v708_v60  ;;  %711 = vst [vmem:[%s4871_s6 + $0x3e8] sm:$0xff] %v710_v61  ;;  %v714_v63 = vld [vmem:[%s4866_s5 + $0x9f8] sm:$0xff] }
  0x58   : > { %713 = vst [vmem:[%s4871_s6 + $0x3f0] sm:$0xff] %v712_v62  ;;  %715 = vst [vmem:[%s4871_s6 + $0x3f8] sm:$0xff] %v714_v63 }
  0x59 PF: > { %721 = sbr.rel (!%p4839_p4) target bundleno = 157 (0x9d), region = 58  ;;  %s723_s7 = sand.u32 (%p4839_p4), 1, %s4758_s14  }
  0x5a   : > { %s4644_s8 = sshll.u32 (%p4839_p4), %s4766_s16, 9  ;;  %s4625_s9 = sshll.u32 (%p4839_p4), %s723_s7, 10 }
  0x5b   : > { %s5133_s18 = scalar_lea.vmem (%p4839_p4), %s7262_s1, %s4644_s8  ;;  %s5138_s19 = scalar_lea.vmem (%p4839_p4), [#allocation3], %s4625_s9 }
  0x5c   : > { %v1013_v0 = vld [vmem:[%s5133_s18] sm:$0xff] (%p4839_p4)  ;;  %v1015_v1 = vld [vmem:[%s5133_s18 + $0x8] sm:$0xff] (%p4839_p4)  ;;  %v1017_v2 = vld [vmem:[%s5133_s18 + $0x10] sm:$0xff] (%p4839_p4) }
  0x5d   : > { %1014 = vst [vmem:[%s5138_s19] sm:$0xff] (%p4839_p4), %v1013_v0  ;;  %1016 = vst [vmem:[%s5138_s19 + $0x8] sm:$0xff] (%p4839_p4), %v1015_v1  ;;  %v1019_v3 = vld [vmem:[%s5133_s18 + $0x18] sm:$0xff] (%p4839_p4)  ;;  %v1021_v4 = vld [vmem:[%s5133_s18 + $0x20] sm:$0xff] (%p4839_p4) }
  0x5e   : > { %1018 = vst [vmem:[%s5138_s19 + $0x10] sm:$0xff] (%p4839_p4), %v1017_v2  ;;  %v1023_v5 = vld [vmem:[%s5133_s18 + $0x28] sm:$0xff] (%p4839_p4)  ;;  %1020 = vst [vmem:[%s5138_s19 + $0x18] sm:$0xff] (%p4839_p4), %v1019_v3  ;;  %v1025_v6 = vld [vmem:[%s5133_s18 + $0x30] sm:$0xff] (%p4839_p4) }
  0x5f   : > { %1022 = vst [vmem:[%s5138_s19 + $0x20] sm:$0xff] (%p4839_p4), %v1021_v4  ;;  %1024 = vst [vmem:[%s5138_s19 + $0x28] sm:$0xff] (%p4839_p4), %v1023_v5  ;;  %v1027_v7 = vld [vmem:[%s5133_s18 + $0x38] sm:$0xff] (%p4839_p4)  ;;  %v1029_v8 = vld [vmem:[%s5133_s18 + $0x40] sm:$0xff] (%p4839_p4) }
  0x60   : > { %1026 = vst [vmem:[%s5138_s19 + $0x30] sm:$0xff] %v1025_v6  ;;  %1028 = vst [vmem:[%s5138_s19 + $0x38] sm:$0xff] %v1027_v7  ;;  %v1031_v9 = vld [vmem:[%s5133_s18 + $0x48] sm:$0xff]  ;;  %v1033_v10 = vld [vmem:[%s5133_s18 + $0x50] sm:$0xff] }
  0x61   : > { %1030 = vst [vmem:[%s5138_s19 + $0x40] sm:$0xff] %v1029_v8  ;;  %v1035_v11 = vld [vmem:[%s5133_s18 + $0x58] sm:$0xff]  ;;  %1032 = vst [vmem:[%s5138_s19 + $0x48] sm:$0xff] %v1031_v9  ;;  %v1037_v12 = vld [vmem:[%s5133_s18 + $0x60] sm:$0xff] }
  0x62   : > { %1034 = vst [vmem:[%s5138_s19 + $0x50] sm:$0xff] %v1033_v10  ;;  %1036 = vst [vmem:[%s5138_s19 + $0x58] sm:$0xff] %v1035_v11  ;;  %v1039_v13 = vld [vmem:[%s5133_s18 + $0x68] sm:$0xff]  ;;  %v1041_v14 = vld [vmem:[%s5133_s18 + $0x70] sm:$0xff] }
  0x63   : > { %1038 = vst [vmem:[%s5138_s19 + $0x60] sm:$0xff] %v1037_v12  ;;  %1040 = vst [vmem:[%s5138_s19 + $0x68] sm:$0xff] %v1039_v13  ;;  %v1043_v15 = vld [vmem:[%s5133_s18 + $0x78] sm:$0xff]  ;;  %v1045_v16 = vld [vmem:[%s5133_s18 + $0x80] sm:$0xff] }
  0x64   : > { %1042 = vst [vmem:[%s5138_s19 + $0x70] sm:$0xff] %v1041_v14  ;;  %v1047_v17 = vld [vmem:[%s5133_s18 + $0x88] sm:$0xff]  ;;  %1044 = vst [vmem:[%s5138_s19 + $0x78] sm:$0xff] %v1043_v15  ;;  %v1049_v18 = vld [vmem:[%s5133_s18 + $0x90] sm:$0xff] }
  0x65   : > { %1046 = vst [vmem:[%s5138_s19 + $0x80] sm:$0xff] %v1045_v16  ;;  %1048 = vst [vmem:[%s5138_s19 + $0x88] sm:$0xff] %v1047_v17  ;;  %v1051_v19 = vld [vmem:[%s5133_s18 + $0x98] sm:$0xff]  ;;  %v1053_v20 = vld [vmem:[%s5133_s18 + $0xa0] sm:$0xff] }
  0x66   : > { %1050 = vst [vmem:[%s5138_s19 + $0x90] sm:$0xff] %v1049_v18  ;;  %1052 = vst [vmem:[%s5138_s19 + $0x98] sm:$0xff] %v1051_v19  ;;  %v1055_v21 = vld [vmem:[%s5133_s18 + $0xa8] sm:$0xff]  ;;  %v1057_v22 = vld [vmem:[%s5133_s18 + $0xb0] sm:$0xff] }
  0x67   : > { %1054 = vst [vmem:[%s5138_s19 + $0xa0] sm:$0xff] %v1053_v20  ;;  %v1059_v23 = vld [vmem:[%s5133_s18 + $0xb8] sm:$0xff]  ;;  %1056 = vst [vmem:[%s5138_s19 + $0xa8] sm:$0xff] %v1055_v21  ;;  %v1061_v24 = vld [vmem:[%s5133_s18 + $0xc0] sm:$0xff] }
  0x68   : > { %1058 = vst [vmem:[%s5138_s19 + $0xb0] sm:$0xff] %v1057_v22  ;;  %1060 = vst [vmem:[%s5138_s19 + $0xb8] sm:$0xff] %v1059_v23  ;;  %v1063_v25 = vld [vmem:[%s5133_s18 + $0xc8] sm:$0xff]  ;;  %v1065_v26 = vld [vmem:[%s5133_s18 + $0xd0] sm:$0xff] }
  0x69   : > { %1062 = vst [vmem:[%s5138_s19 + $0xc0] sm:$0xff] %v1061_v24  ;;  %1064 = vst [vmem:[%s5138_s19 + $0xc8] sm:$0xff] %v1063_v25  ;;  %v1067_v27 = vld [vmem:[%s5133_s18 + $0xd8] sm:$0xff]  ;;  %v1069_v28 = vld [vmem:[%s5133_s18 + $0xe0] sm:$0xff] }
  0x6a   : > { %1066 = vst [vmem:[%s5138_s19 + $0xd0] sm:$0xff] %v1065_v26  ;;  %v1071_v29 = vld [vmem:[%s5133_s18 + $0xe8] sm:$0xff]  ;;  %1068 = vst [vmem:[%s5138_s19 + $0xd8] sm:$0xff] %v1067_v27  ;;  %v1073_v30 = vld [vmem:[%s5133_s18 + $0xf0] sm:$0xff] }
  0x6b   : > { %1070 = vst [vmem:[%s5138_s19 + $0xe0] sm:$0xff] %v1069_v28  ;;  %1072 = vst [vmem:[%s5138_s19 + $0xe8] sm:$0xff] %v1071_v29  ;;  %v1075_v31 = vld [vmem:[%s5133_s18 + $0xf8] sm:$0xff]  ;;  %v1077_v32 = vld [vmem:[%s5133_s18 + $0x100] sm:$0xff] }
  0x6c   : > { %1074 = vst [vmem:[%s5138_s19 + $0xf0] sm:$0xff] %v1073_v30  ;;  %1076 = vst [vmem:[%s5138_s19 + $0xf8] sm:$0xff] %v1075_v31  ;;  %v1079_v33 = vld [vmem:[%s5133_s18 + $0x108] sm:$0xff]  ;;  %v1081_v34 = vld [vmem:[%s5133_s18 + $0x110] sm:$0xff] }
  0x6d   : > { %1078 = vst [vmem:[%s5138_s19 + $0x100] sm:$0xff] %v1077_v32  ;;  %v1083_v35 = vld [vmem:[%s5133_s18 + $0x118] sm:$0xff]  ;;  %1080 = vst [vmem:[%s5138_s19 + $0x108] sm:$0xff] %v1079_v33  ;;  %v1085_v36 = vld [vmem:[%s5133_s18 + $0x120] sm:$0xff] }
  0x6e   : > { %1082 = vst [vmem:[%s5138_s19 + $0x110] sm:$0xff] %v1081_v34  ;;  %1084 = vst [vmem:[%s5138_s19 + $0x118] sm:$0xff] %v1083_v35  ;;  %v1087_v37 = vld [vmem:[%s5133_s18 + $0x128] sm:$0xff]  ;;  %v1089_v38 = vld [vmem:[%s5133_s18 + $0x130] sm:$0xff] }
  0x6f   : > { %1086 = vst [vmem:[%s5138_s19 + $0x120] sm:$0xff] %v1085_v36  ;;  %1088 = vst [vmem:[%s5138_s19 + $0x128] sm:$0xff] %v1087_v37  ;;  %v1091_v39 = vld [vmem:[%s5133_s18 + $0x138] sm:$0xff]  ;;  %v1093_v40 = vld [vmem:[%s5133_s18 + $0x140] sm:$0xff] }
  0x70   : > { %1090 = vst [vmem:[%s5138_s19 + $0x130] sm:$0xff] %v1089_v38  ;;  %v1095_v41 = vld [vmem:[%s5133_s18 + $0x148] sm:$0xff]  ;;  %1092 = vst [vmem:[%s5138_s19 + $0x138] sm:$0xff] %v1091_v39  ;;  %v1097_v42 = vld [vmem:[%s5133_s18 + $0x150] sm:$0xff] }
  0x71   : > { %1094 = vst [vmem:[%s5138_s19 + $0x140] sm:$0xff] %v1093_v40  ;;  %1096 = vst [vmem:[%s5138_s19 + $0x148] sm:$0xff] %v1095_v41  ;;  %v1099_v43 = vld [vmem:[%s5133_s18 + $0x158] sm:$0xff]  ;;  %v1101_v44 = vld [vmem:[%s5133_s18 + $0x160] sm:$0xff] }
  0x72   : > { %1098 = vst [vmem:[%s5138_s19 + $0x150] sm:$0xff] %v1097_v42  ;;  %1100 = vst [vmem:[%s5138_s19 + $0x158] sm:$0xff] %v1099_v43  ;;  %v1103_v45 = vld [vmem:[%s5133_s18 + $0x168] sm:$0xff]  ;;  %v1105_v46 = vld [vmem:[%s5133_s18 + $0x170] sm:$0xff] }
  0x73   : > { %1102 = vst [vmem:[%s5138_s19 + $0x160] sm:$0xff] %v1101_v44  ;;  %v1107_v47 = vld [vmem:[%s5133_s18 + $0x178] sm:$0xff]  ;;  %1104 = vst [vmem:[%s5138_s19 + $0x168] sm:$0xff] %v1103_v45  ;;  %v1109_v48 = vld [vmem:[%s5133_s18 + $0x180] sm:$0xff] }
  0x74   : > { %1106 = vst [vmem:[%s5138_s19 + $0x170] sm:$0xff] %v1105_v46  ;;  %1108 = vst [vmem:[%s5138_s19 + $0x178] sm:$0xff] %v1107_v47  ;;  %v1111_v49 = vld [vmem:[%s5133_s18 + $0x188] sm:$0xff]  ;;  %v1113_v50 = vld [vmem:[%s5133_s18 + $0x190] sm:$0xff] }
  0x75   : > { %1110 = vst [vmem:[%s5138_s19 + $0x180] sm:$0xff] %v1109_v48  ;;  %1112 = vst [vmem:[%s5138_s19 + $0x188] sm:$0xff] %v1111_v49  ;;  %v1115_v51 = vld [vmem:[%s5133_s18 + $0x198] sm:$0xff]  ;;  %v1117_v52 = vld [vmem:[%s5133_s18 + $0x1a0] sm:$0xff] }
  0x76   : > { %1114 = vst [vmem:[%s5138_s19 + $0x190] sm:$0xff] %v1113_v50  ;;  %v1119_v53 = vld [vmem:[%s5133_s18 + $0x1a8] sm:$0xff]  ;;  %1116 = vst [vmem:[%s5138_s19 + $0x198] sm:$0xff] %v1115_v51  ;;  %v1121_v54 = vld [vmem:[%s5133_s18 + $0x1b0] sm:$0xff] }
  0x77   : > { %1118 = vst [vmem:[%s5138_s19 + $0x1a0] sm:$0xff] %v1117_v52  ;;  %1120 = vst [vmem:[%s5138_s19 + $0x1a8] sm:$0xff] %v1119_v53  ;;  %v1123_v55 = vld [vmem:[%s5133_s18 + $0x1b8] sm:$0xff]  ;;  %v1125_v56 = vld [vmem:[%s5133_s18 + $0x1c0] sm:$0xff] }
  0x78   : > { %1122 = vst [vmem:[%s5138_s19 + $0x1b0] sm:$0xff] %v1121_v54  ;;  %1124 = vst [vmem:[%s5138_s19 + $0x1b8] sm:$0xff] %v1123_v55  ;;  %v1127_v57 = vld [vmem:[%s5133_s18 + $0x1c8] sm:$0xff]  ;;  %v1129_v58 = vld [vmem:[%s5133_s18 + $0x1d0] sm:$0xff] }
  0x79   : > { %1126 = vst [vmem:[%s5138_s19 + $0x1c0] sm:$0xff] %v1125_v56  ;;  %v1131_v59 = vld [vmem:[%s5133_s18 + $0x1d8] sm:$0xff]  ;;  %1128 = vst [vmem:[%s5138_s19 + $0x1c8] sm:$0xff] %v1127_v57  ;;  %v1133_v60 = vld [vmem:[%s5133_s18 + $0x1e0] sm:$0xff] }
  0x7a   : > { %1130 = vst [vmem:[%s5138_s19 + $0x1d0] sm:$0xff] %v1129_v58  ;;  %1132 = vst [vmem:[%s5138_s19 + $0x1d8] sm:$0xff] %v1131_v59  ;;  %v1135_v61 = vld [vmem:[%s5133_s18 + $0x1e8] sm:$0xff]  ;;  %v1137_v62 = vld [vmem:[%s5133_s18 + $0x1f0] sm:$0xff] }
  0x7b   : > { %1134 = vst [vmem:[%s5138_s19 + $0x1e0] sm:$0xff] %v1133_v60  ;;  %1136 = vst [vmem:[%s5138_s19 + $0x1e8] sm:$0xff] %v1135_v61  ;;  %v1139_v63 = vld [vmem:[%s5133_s18 + $0x1f8] sm:$0xff]  ;;  %v1141_v0 = vld [vmem:[%s5133_s18 + $0x800] sm:$0xff] }
  0x7c   : > { %1138 = vst [vmem:[%s5138_s19 + $0x1f0] sm:$0xff] %v1137_v62  ;;  %v1143_v1 = vld [vmem:[%s5133_s18 + $0x808] sm:$0xff]  ;;  %1140 = vst [vmem:[%s5138_s19 + $0x1f8] sm:$0xff] %v1139_v63  ;;  %v1145_v2 = vld [vmem:[%s5133_s18 + $0x810] sm:$0xff] }
  0x7d   : > { %1142 = vst [vmem:[%s5138_s19 + $0x200] sm:$0xff] %v1141_v0  ;;  %1144 = vst [vmem:[%s5138_s19 + $0x208] sm:$0xff] %v1143_v1  ;;  %v1147_v3 = vld [vmem:[%s5133_s18 + $0x818] sm:$0xff]  ;;  %v1149_v4 = vld [vmem:[%s5133_s18 + $0x820] sm:$0xff] }
  0x7e   : > { %1146 = vst [vmem:[%s5138_s19 + $0x210] sm:$0xff] %v1145_v2  ;;  %1148 = vst [vmem:[%s5138_s19 + $0x218] sm:$0xff] %v1147_v3  ;;  %v1151_v5 = vld [vmem:[%s5133_s18 + $0x828] sm:$0xff]  ;;  %v1153_v6 = vld [vmem:[%s5133_s18 + $0x830] sm:$0xff] }
  0x7f   : > { %1150 = vst [vmem:[%s5138_s19 + $0x220] sm:$0xff] %v1149_v4  ;;  %v1155_v7 = vld [vmem:[%s5133_s18 + $0x838] sm:$0xff]  ;;  %1152 = vst [vmem:[%s5138_s19 + $0x228] sm:$0xff] %v1151_v5  ;;  %v1157_v8 = vld [vmem:[%s5133_s18 + $0x840] sm:$0xff] }
  0x80   : > { %1154 = vst [vmem:[%s5138_s19 + $0x230] sm:$0xff] %v1153_v6  ;;  %1156 = vst [vmem:[%s5138_s19 + $0x238] sm:$0xff] %v1155_v7  ;;  %v1159_v9 = vld [vmem:[%s5133_s18 + $0x848] sm:$0xff]  ;;  %v1161_v10 = vld [vmem:[%s5133_s18 + $0x850] sm:$0xff] }
  0x81   : > { %1158 = vst [vmem:[%s5138_s19 + $0x240] sm:$0xff] %v1157_v8  ;;  %1160 = vst [vmem:[%s5138_s19 + $0x248] sm:$0xff] %v1159_v9  ;;  %v1163_v11 = vld [vmem:[%s5133_s18 + $0x858] sm:$0xff]  ;;  %v1165_v12 = vld [vmem:[%s5133_s18 + $0x860] sm:$0xff] }
  0x82   : > { %1162 = vst [vmem:[%s5138_s19 + $0x250] sm:$0xff] %v1161_v10  ;;  %v1167_v13 = vld [vmem:[%s5133_s18 + $0x868] sm:$0xff]  ;;  %1164 = vst [vmem:[%s5138_s19 + $0x258] sm:$0xff] %v1163_v11  ;;  %v1169_v14 = vld [vmem:[%s5133_s18 + $0x870] sm:$0xff] }
  0x83   : > { %1166 = vst [vmem:[%s5138_s19 + $0x260] sm:$0xff] %v1165_v12  ;;  %1168 = vst [vmem:[%s5138_s19 + $0x268] sm:$0xff] %v1167_v13  ;;  %v1171_v15 = vld [vmem:[%s5133_s18 + $0x878] sm:$0xff]  ;;  %v1173_v16 = vld [vmem:[%s5133_s18 + $0x880] sm:$0xff] }
  0x84   : > { %1170 = vst [vmem:[%s5138_s19 + $0x270] sm:$0xff] %v1169_v14  ;;  %1172 = vst [vmem:[%s5138_s19 + $0x278] sm:$0xff] %v1171_v15  ;;  %v1175_v17 = vld [vmem:[%s5133_s18 + $0x888] sm:$0xff]  ;;  %v1177_v18 = vld [vmem:[%s5133_s18 + $0x890] sm:$0xff] }
  0x85   : > { %1174 = vst [vmem:[%s5138_s19 + $0x280] sm:$0xff] %v1173_v16  ;;  %v1179_v19 = vld [vmem:[%s5133_s18 + $0x898] sm:$0xff]  ;;  %1176 = vst [vmem:[%s5138_s19 + $0x288] sm:$0xff] %v1175_v17  ;;  %v1181_v20 = vld [vmem:[%s5133_s18 + $0x8a0] sm:$0xff] }
  0x86   : > { %1178 = vst [vmem:[%s5138_s19 + $0x290] sm:$0xff] %v1177_v18  ;;  %1180 = vst [vmem:[%s5138_s19 + $0x298] sm:$0xff] %v1179_v19  ;;  %v1183_v21 = vld [vmem:[%s5133_s18 + $0x8a8] sm:$0xff]  ;;  %v1185_v22 = vld [vmem:[%s5133_s18 + $0x8b0] sm:$0xff] }
  0x87   : > { %1182 = vst [vmem:[%s5138_s19 + $0x2a0] sm:$0xff] %v1181_v20  ;;  %1184 = vst [vmem:[%s5138_s19 + $0x2a8] sm:$0xff] %v1183_v21  ;;  %v1187_v23 = vld [vmem:[%s5133_s18 + $0x8b8] sm:$0xff]  ;;  %v1189_v24 = vld [vmem:[%s5133_s18 + $0x8c0] sm:$0xff] }
  0x88   : > { %1186 = vst [vmem:[%s5138_s19 + $0x2b0] sm:$0xff] %v1185_v22  ;;  %v1191_v25 = vld [vmem:[%s5133_s18 + $0x8c8] sm:$0xff]  ;;  %1188 = vst [vmem:[%s5138_s19 + $0x2b8] sm:$0xff] %v1187_v23  ;;  %v1193_v26 = vld [vmem:[%s5133_s18 + $0x8d0] sm:$0xff] }
  0x89   : > { %1190 = vst [vmem:[%s5138_s19 + $0x2c0] sm:$0xff] %v1189_v24  ;;  %1192 = vst [vmem:[%s5138_s19 + $0x2c8] sm:$0xff] %v1191_v25  ;;  %v1195_v27 = vld [vmem:[%s5133_s18 + $0x8d8] sm:$0xff]  ;;  %v1197_v28 = vld [vmem:[%s5133_s18 + $0x8e0] sm:$0xff] }
  0x8a   : > { %1194 = vst [vmem:[%s5138_s19 + $0x2d0] sm:$0xff] %v1193_v26  ;;  %1196 = vst [vmem:[%s5138_s19 + $0x2d8] sm:$0xff] %v1195_v27  ;;  %v1199_v29 = vld [vmem:[%s5133_s18 + $0x8e8] sm:$0xff]  ;;  %v1201_v30 = vld [vmem:[%s5133_s18 + $0x8f0] sm:$0xff] }
  0x8b   : > { %1198 = vst [vmem:[%s5138_s19 + $0x2e0] sm:$0xff] %v1197_v28  ;;  %v1203_v31 = vld [vmem:[%s5133_s18 + $0x8f8] sm:$0xff]  ;;  %1200 = vst [vmem:[%s5138_s19 + $0x2e8] sm:$0xff] %v1199_v29  ;;  %v1205_v32 = vld [vmem:[%s5133_s18 + $0x900] sm:$0xff] }
  0x8c   : > { %1202 = vst [vmem:[%s5138_s19 + $0x2f0] sm:$0xff] %v1201_v30  ;;  %1204 = vst [vmem:[%s5138_s19 + $0x2f8] sm:$0xff] %v1203_v31  ;;  %v1207_v33 = vld [vmem:[%s5133_s18 + $0x908] sm:$0xff]  ;;  %v1209_v34 = vld [vmem:[%s5133_s18 + $0x910] sm:$0xff] }
  0x8d   : > { %1206 = vst [vmem:[%s5138_s19 + $0x300] sm:$0xff] %v1205_v32  ;;  %1208 = vst [vmem:[%s5138_s19 + $0x308] sm:$0xff] %v1207_v33  ;;  %v1211_v35 = vld [vmem:[%s5133_s18 + $0x918] sm:$0xff]  ;;  %v1213_v36 = vld [vmem:[%s5133_s18 + $0x920] sm:$0xff] }
  0x8e   : > { %1210 = vst [vmem:[%s5138_s19 + $0x310] sm:$0xff] %v1209_v34  ;;  %v1215_v37 = vld [vmem:[%s5133_s18 + $0x928] sm:$0xff]  ;;  %1212 = vst [vmem:[%s5138_s19 + $0x318] sm:$0xff] %v1211_v35  ;;  %v1217_v38 = vld [vmem:[%s5133_s18 + $0x930] sm:$0xff] }
  0x8f   : > { %1214 = vst [vmem:[%s5138_s19 + $0x320] sm:$0xff] %v1213_v36  ;;  %1216 = vst [vmem:[%s5138_s19 + $0x328] sm:$0xff] %v1215_v37  ;;  %v1219_v39 = vld [vmem:[%s5133_s18 + $0x938] sm:$0xff]  ;;  %v1221_v40 = vld [vmem:[%s5133_s18 + $0x940] sm:$0xff] }
  0x90   : > { %1218 = vst [vmem:[%s5138_s19 + $0x330] sm:$0xff] %v1217_v38  ;;  %1220 = vst [vmem:[%s5138_s19 + $0x338] sm:$0xff] %v1219_v39  ;;  %v1223_v41 = vld [vmem:[%s5133_s18 + $0x948] sm:$0xff]  ;;  %v1225_v42 = vld [vmem:[%s5133_s18 + $0x950] sm:$0xff] }
  0x91   : > { %1222 = vst [vmem:[%s5138_s19 + $0x340] sm:$0xff] %v1221_v40  ;;  %v1227_v43 = vld [vmem:[%s5133_s18 + $0x958] sm:$0xff]  ;;  %1224 = vst [vmem:[%s5138_s19 + $0x348] sm:$0xff] %v1223_v41  ;;  %v1229_v44 = vld [vmem:[%s5133_s18 + $0x960] sm:$0xff] }
  0x92   : > { %1226 = vst [vmem:[%s5138_s19 + $0x350] sm:$0xff] %v1225_v42  ;;  %1228 = vst [vmem:[%s5138_s19 + $0x358] sm:$0xff] %v1227_v43  ;;  %v1231_v45 = vld [vmem:[%s5133_s18 + $0x968] sm:$0xff]  ;;  %v1233_v46 = vld [vmem:[%s5133_s18 + $0x970] sm:$0xff] }
  0x93   : > { %1230 = vst [vmem:[%s5138_s19 + $0x360] sm:$0xff] %v1229_v44  ;;  %1232 = vst [vmem:[%s5138_s19 + $0x368] sm:$0xff] %v1231_v45  ;;  %v1235_v47 = vld [vmem:[%s5133_s18 + $0x978] sm:$0xff]  ;;  %v1237_v48 = vld [vmem:[%s5133_s18 + $0x980] sm:$0xff] }
  0x94   : > { %1234 = vst [vmem:[%s5138_s19 + $0x370] sm:$0xff] %v1233_v46  ;;  %v1239_v49 = vld [vmem:[%s5133_s18 + $0x988] sm:$0xff]  ;;  %1236 = vst [vmem:[%s5138_s19 + $0x378] sm:$0xff] %v1235_v47  ;;  %v1241_v50 = vld [vmem:[%s5133_s18 + $0x990] sm:$0xff] }
  0x95   : > { %1238 = vst [vmem:[%s5138_s19 + $0x380] sm:$0xff] %v1237_v48  ;;  %1240 = vst [vmem:[%s5138_s19 + $0x388] sm:$0xff] %v1239_v49  ;;  %v1243_v51 = vld [vmem:[%s5133_s18 + $0x998] sm:$0xff]  ;;  %v1245_v52 = vld [vmem:[%s5133_s18 + $0x9a0] sm:$0xff] }
  0x96   : > { %1242 = vst [vmem:[%s5138_s19 + $0x390] sm:$0xff] %v1241_v50  ;;  %1244 = vst [vmem:[%s5138_s19 + $0x398] sm:$0xff] %v1243_v51  ;;  %v1247_v53 = vld [vmem:[%s5133_s18 + $0x9a8] sm:$0xff]  ;;  %v1249_v54 = vld [vmem:[%s5133_s18 + $0x9b0] sm:$0xff] }
  0x97   : > { %1246 = vst [vmem:[%s5138_s19 + $0x3a0] sm:$0xff] %v1245_v52  ;;  %v1251_v55 = vld [vmem:[%s5133_s18 + $0x9b8] sm:$0xff]  ;;  %1248 = vst [vmem:[%s5138_s19 + $0x3a8] sm:$0xff] %v1247_v53  ;;  %v1253_v56 = vld [vmem:[%s5133_s18 + $0x9c0] sm:$0xff] }
  0x98   : > { %1250 = vst [vmem:[%s5138_s19 + $0x3b0] sm:$0xff] %v1249_v54  ;;  %1252 = vst [vmem:[%s5138_s19 + $0x3b8] sm:$0xff] %v1251_v55  ;;  %v1255_v57 = vld [vmem:[%s5133_s18 + $0x9c8] sm:$0xff]  ;;  %v1257_v58 = vld [vmem:[%s5133_s18 + $0x9d0] sm:$0xff] }
  0x99   : > { %1254 = vst [vmem:[%s5138_s19 + $0x3c0] sm:$0xff] %v1253_v56  ;;  %1256 = vst [vmem:[%s5138_s19 + $0x3c8] sm:$0xff] %v1255_v57  ;;  %v1259_v59 = vld [vmem:[%s5133_s18 + $0x9d8] sm:$0xff]  ;;  %v1261_v60 = vld [vmem:[%s5133_s18 + $0x9e0] sm:$0xff] }
  0x9a   : > { %1258 = vst [vmem:[%s5138_s19 + $0x3d0] sm:$0xff] %v1257_v58  ;;  %v1263_v61 = vld [vmem:[%s5133_s18 + $0x9e8] sm:$0xff]  ;;  %1260 = vst [vmem:[%s5138_s19 + $0x3d8] sm:$0xff] %v1259_v59  ;;  %v1265_v62 = vld [vmem:[%s5133_s18 + $0x9f0] sm:$0xff] }
  0x9b   : > { %1262 = vst [vmem:[%s5138_s19 + $0x3e0] sm:$0xff] %v1261_v60  ;;  %1264 = vst [vmem:[%s5138_s19 + $0x3e8] sm:$0xff] %v1263_v61  ;;  %v1267_v63 = vld [vmem:[%s5133_s18 + $0x9f8] sm:$0xff] }
  0x9c   : > { %1266 = vst [vmem:[%s5138_s19 + $0x3f0] sm:$0xff] %v1265_v62  ;;  %1268 = vst [vmem:[%s5138_s19 + $0x3f8] sm:$0xff] %v1267_v63 }
  0x9d PF: > { %1274 = sbr.rel (!%p4839_p4) target bundleno = 289 (0x121), region = 96  ;;  %s1276_s21 = sand.u32 (%p4839_p4), 1, %s4758_s14  }
  0x9e   : > { %s4646_s24 = sshll.u32 (%p4839_p4), %s4766_s16, 10  ;;  %s4628_s27 = sshll.u32 (%p4839_p4), %s1276_s21, 11 }
  0x9f   : > { %s5400_s30 = scalar_lea.vmem (%p4839_p4), %s7263_s2, %s4646_s24  ;;  %s5405_s22 = scalar_lea.vmem (%p4839_p4), [#allocation4], %s4628_s27 }
  0xa0   : > { %v1300_v0 = vld [vmem:[%s5400_s30] sm:$0xff] (%p4839_p4)  ;;  %v1302_v1 = vld [vmem:[%s5400_s30 + $0x8] sm:$0xff] (%p4839_p4)  ;;  %v1304_v2 = vld [vmem:[%s5400_s30 + $0x10] sm:$0xff] (%p4839_p4) }
  0xa1   : > { %1301 = vst [vmem:[%s5405_s22] sm:$0xff] (%p4839_p4), %v1300_v0  ;;  %1303 = vst [vmem:[%s5405_s22 + $0x8] sm:$0xff] (%p4839_p4), %v1302_v1  ;;  %v1306_v3 = vld [vmem:[%s5400_s30 + $0x18] sm:$0xff] (%p4839_p4)  ;;  %v1308_v4 = vld [vmem:[%s5400_s30 + $0x20] sm:$0xff] (%p4839_p4) }
  0xa2   : > { %1305 = vst [vmem:[%s5405_s22 + $0x10] sm:$0xff] (%p4839_p4), %v1304_v2  ;;  %v1310_v5 = vld [vmem:[%s5400_s30 + $0x28] sm:$0xff] (%p4839_p4)  ;;  %1307 = vst [vmem:[%s5405_s22 + $0x18] sm:$0xff] (%p4839_p4), %v1306_v3  ;;  %v1312_v6 = vld [vmem:[%s5400_s30 + $0x30] sm:$0xff] (%p4839_p4) }
  0xa3   : > { %1309 = vst [vmem:[%s5405_s22 + $0x20] sm:$0xff] (%p4839_p4), %v1308_v4  ;;  %1311 = vst [vmem:[%s5405_s22 + $0x28] sm:$0xff] (%p4839_p4), %v1310_v5  ;;  %v1314_v7 = vld [vmem:[%s5400_s30 + $0x38] sm:$0xff] (%p4839_p4)  ;;  %v1316_v8 = vld [vmem:[%s5400_s30 + $0x40] sm:$0xff] (%p4839_p4) }
  0xa4   : > { %1313 = vst [vmem:[%s5405_s22 + $0x30] sm:$0xff] %v1312_v6  ;;  %1315 = vst [vmem:[%s5405_s22 + $0x38] sm:$0xff] %v1314_v7  ;;  %v1318_v9 = vld [vmem:[%s5400_s30 + $0x48] sm:$0xff]  ;;  %v1320_v10 = vld [vmem:[%s5400_s30 + $0x50] sm:$0xff] }
  0xa5   : > { %1317 = vst [vmem:[%s5405_s22 + $0x40] sm:$0xff] %v1316_v8  ;;  %v1322_v11 = vld [vmem:[%s5400_s30 + $0x58] sm:$0xff]  ;;  %1319 = vst [vmem:[%s5405_s22 + $0x48] sm:$0xff] %v1318_v9  ;;  %v1324_v12 = vld [vmem:[%s5400_s30 + $0x60] sm:$0xff] }
  0xa6   : > { %1321 = vst [vmem:[%s5405_s22 + $0x50] sm:$0xff] %v1320_v10  ;;  %1323 = vst [vmem:[%s5405_s22 + $0x58] sm:$0xff] %v1322_v11  ;;  %v1326_v13 = vld [vmem:[%s5400_s30 + $0x68] sm:$0xff]  ;;  %v1328_v14 = vld [vmem:[%s5400_s30 + $0x70] sm:$0xff] }
  0xa7   : > { %1325 = vst [vmem:[%s5405_s22 + $0x60] sm:$0xff] %v1324_v12  ;;  %1327 = vst [vmem:[%s5405_s22 + $0x68] sm:$0xff] %v1326_v13  ;;  %v1330_v15 = vld [vmem:[%s5400_s30 + $0x78] sm:$0xff]  ;;  %v1332_v16 = vld [vmem:[%s5400_s30 + $0x80] sm:$0xff] }
  0xa8   : > { %1329 = vst [vmem:[%s5405_s22 + $0x70] sm:$0xff] %v1328_v14  ;;  %v1334_v17 = vld [vmem:[%s5400_s30 + $0x88] sm:$0xff]  ;;  %1331 = vst [vmem:[%s5405_s22 + $0x78] sm:$0xff] %v1330_v15  ;;  %v1336_v18 = vld [vmem:[%s5400_s30 + $0x90] sm:$0xff] }
  0xa9   : > { %1333 = vst [vmem:[%s5405_s22 + $0x80] sm:$0xff] %v1332_v16  ;;  %1335 = vst [vmem:[%s5405_s22 + $0x88] sm:$0xff] %v1334_v17  ;;  %v1338_v19 = vld [vmem:[%s5400_s30 + $0x98] sm:$0xff]  ;;  %v1340_v20 = vld [vmem:[%s5400_s30 + $0xa0] sm:$0xff] }
  0xaa   : > { %1337 = vst [vmem:[%s5405_s22 + $0x90] sm:$0xff] %v1336_v18  ;;  %1339 = vst [vmem:[%s5405_s22 + $0x98] sm:$0xff] %v1338_v19  ;;  %v1342_v21 = vld [vmem:[%s5400_s30 + $0xa8] sm:$0xff]  ;;  %v1344_v22 = vld [vmem:[%s5400_s30 + $0xb0] sm:$0xff] }
  0xab   : > { %1341 = vst [vmem:[%s5405_s22 + $0xa0] sm:$0xff] %v1340_v20  ;;  %v1346_v23 = vld [vmem:[%s5400_s30 + $0xb8] sm:$0xff]  ;;  %1343 = vst [vmem:[%s5405_s22 + $0xa8] sm:$0xff] %v1342_v21  ;;  %v1348_v24 = vld [vmem:[%s5400_s30 + $0xc0] sm:$0xff] }
  0xac   : > { %1345 = vst [vmem:[%s5405_s22 + $0xb0] sm:$0xff] %v1344_v22  ;;  %1347 = vst [vmem:[%s5405_s22 + $0xb8] sm:$0xff] %v1346_v23  ;;  %v1350_v25 = vld [vmem:[%s5400_s30 + $0xc8] sm:$0xff]  ;;  %v1352_v26 = vld [vmem:[%s5400_s30 + $0xd0] sm:$0xff] }
  0xad   : > { %1349 = vst [vmem:[%s5405_s22 + $0xc0] sm:$0xff] %v1348_v24  ;;  %1351 = vst [vmem:[%s5405_s22 + $0xc8] sm:$0xff] %v1350_v25  ;;  %v1354_v27 = vld [vmem:[%s5400_s30 + $0xd8] sm:$0xff]  ;;  %v1356_v28 = vld [vmem:[%s5400_s30 + $0xe0] sm:$0xff] }
  0xae   : > { %1353 = vst [vmem:[%s5405_s22 + $0xd0] sm:$0xff] %v1352_v26  ;;  %v1358_v29 = vld [vmem:[%s5400_s30 + $0xe8] sm:$0xff]  ;;  %1355 = vst [vmem:[%s5405_s22 + $0xd8] sm:$0xff] %v1354_v27  ;;  %v1360_v30 = vld [vmem:[%s5400_s30 + $0xf0] sm:$0xff] }
  0xaf   : > { %1357 = vst [vmem:[%s5405_s22 + $0xe0] sm:$0xff] %v1356_v28  ;;  %1359 = vst [vmem:[%s5405_s22 + $0xe8] sm:$0xff] %v1358_v29  ;;  %v1362_v31 = vld [vmem:[%s5400_s30 + $0xf8] sm:$0xff]  ;;  %v1364_v32 = vld [vmem:[%s5400_s30 + $0x100] sm:$0xff] }
  0xb0   : > { %1361 = vst [vmem:[%s5405_s22 + $0xf0] sm:$0xff] %v1360_v30  ;;  %1363 = vst [vmem:[%s5405_s22 + $0xf8] sm:$0xff] %v1362_v31  ;;  %v1366_v33 = vld [vmem:[%s5400_s30 + $0x108] sm:$0xff]  ;;  %v1368_v34 = vld [vmem:[%s5400_s30 + $0x110] sm:$0xff] }
  0xb1   : > { %1365 = vst [vmem:[%s5405_s22 + $0x100] sm:$0xff] %v1364_v32  ;;  %v1370_v35 = vld [vmem:[%s5400_s30 + $0x118] sm:$0xff]  ;;  %1367 = vst [vmem:[%s5405_s22 + $0x108] sm:$0xff] %v1366_v33  ;;  %v1372_v36 = vld [vmem:[%s5400_s30 + $0x120] sm:$0xff] }
  0xb2   : > { %1369 = vst [vmem:[%s5405_s22 + $0x110] sm:$0xff] %v1368_v34  ;;  %1371 = vst [vmem:[%s5405_s22 + $0x118] sm:$0xff] %v1370_v35  ;;  %v1374_v37 = vld [vmem:[%s5400_s30 + $0x128] sm:$0xff]  ;;  %v1376_v38 = vld [vmem:[%s5400_s30 + $0x130] sm:$0xff] }
  0xb3   : > { %1373 = vst [vmem:[%s5405_s22 + $0x120] sm:$0xff] %v1372_v36  ;;  %1375 = vst [vmem:[%s5405_s22 + $0x128] sm:$0xff] %v1374_v37  ;;  %v1378_v39 = vld [vmem:[%s5400_s30 + $0x138] sm:$0xff]  ;;  %v1380_v40 = vld [vmem:[%s5400_s30 + $0x140] sm:$0xff] }
  0xb4   : > { %1377 = vst [vmem:[%s5405_s22 + $0x130] sm:$0xff] %v1376_v38  ;;  %v1382_v41 = vld [vmem:[%s5400_s30 + $0x148] sm:$0xff]  ;;  %1379 = vst [vmem:[%s5405_s22 + $0x138] sm:$0xff] %v1378_v39  ;;  %v1384_v42 = vld [vmem:[%s5400_s30 + $0x150] sm:$0xff] }
  0xb5   : > { %1381 = vst [vmem:[%s5405_s22 + $0x140] sm:$0xff] %v1380_v40  ;;  %1383 = vst [vmem:[%s5405_s22 + $0x148] sm:$0xff] %v1382_v41  ;;  %v1386_v43 = vld [vmem:[%s5400_s30 + $0x158] sm:$0xff]  ;;  %v1388_v44 = vld [vmem:[%s5400_s30 + $0x160] sm:$0xff] }
  0xb6   : > { %1385 = vst [vmem:[%s5405_s22 + $0x150] sm:$0xff] %v1384_v42  ;;  %1387 = vst [vmem:[%s5405_s22 + $0x158] sm:$0xff] %v1386_v43  ;;  %v1390_v45 = vld [vmem:[%s5400_s30 + $0x168] sm:$0xff]  ;;  %v1392_v46 = vld [vmem:[%s5400_s30 + $0x170] sm:$0xff] }
  0xb7   : > { %1389 = vst [vmem:[%s5405_s22 + $0x160] sm:$0xff] %v1388_v44  ;;  %v1394_v47 = vld [vmem:[%s5400_s30 + $0x178] sm:$0xff]  ;;  %1391 = vst [vmem:[%s5405_s22 + $0x168] sm:$0xff] %v1390_v45  ;;  %v1396_v48 = vld [vmem:[%s5400_s30 + $0x180] sm:$0xff] }
  0xb8   : > { %1393 = vst [vmem:[%s5405_s22 + $0x170] sm:$0xff] %v1392_v46  ;;  %1395 = vst [vmem:[%s5405_s22 + $0x178] sm:$0xff] %v1394_v47  ;;  %v1398_v49 = vld [vmem:[%s5400_s30 + $0x188] sm:$0xff]  ;;  %v1400_v50 = vld [vmem:[%s5400_s30 + $0x190] sm:$0xff] }
  0xb9   : > { %1397 = vst [vmem:[%s5405_s22 + $0x180] sm:$0xff] %v1396_v48  ;;  %1399 = vst [vmem:[%s5405_s22 + $0x188] sm:$0xff] %v1398_v49  ;;  %v1402_v51 = vld [vmem:[%s5400_s30 + $0x198] sm:$0xff]  ;;  %v1404_v52 = vld [vmem:[%s5400_s30 + $0x1a0] sm:$0xff] }
  0xba   : > { %1401 = vst [vmem:[%s5405_s22 + $0x190] sm:$0xff] %v1400_v50  ;;  %v1406_v53 = vld [vmem:[%s5400_s30 + $0x1a8] sm:$0xff]  ;;  %1403 = vst [vmem:[%s5405_s22 + $0x198] sm:$0xff] %v1402_v51  ;;  %v1408_v54 = vld [vmem:[%s5400_s30 + $0x1b0] sm:$0xff] }
  0xbb   : > { %1405 = vst [vmem:[%s5405_s22 + $0x1a0] sm:$0xff] %v1404_v52  ;;  %1407 = vst [vmem:[%s5405_s22 + $0x1a8] sm:$0xff] %v1406_v53  ;;  %v1410_v55 = vld [vmem:[%s5400_s30 + $0x1b8] sm:$0xff]  ;;  %v1412_v56 = vld [vmem:[%s5400_s30 + $0x1c0] sm:$0xff] }
  0xbc   : > { %1409 = vst [vmem:[%s5405_s22 + $0x1b0] sm:$0xff] %v1408_v54  ;;  %1411 = vst [vmem:[%s5405_s22 + $0x1b8] sm:$0xff] %v1410_v55  ;;  %v1414_v57 = vld [vmem:[%s5400_s30 + $0x1c8] sm:$0xff]  ;;  %v1416_v58 = vld [vmem:[%s5400_s30 + $0x1d0] sm:$0xff] }
  0xbd   : > { %1413 = vst [vmem:[%s5405_s22 + $0x1c0] sm:$0xff] %v1412_v56  ;;  %v1418_v59 = vld [vmem:[%s5400_s30 + $0x1d8] sm:$0xff]  ;;  %1415 = vst [vmem:[%s5405_s22 + $0x1c8] sm:$0xff] %v1414_v57  ;;  %v1420_v60 = vld [vmem:[%s5400_s30 + $0x1e0] sm:$0xff] }
  0xbe   : > { %1417 = vst [vmem:[%s5405_s22 + $0x1d0] sm:$0xff] %v1416_v58  ;;  %1419 = vst [vmem:[%s5405_s22 + $0x1d8] sm:$0xff] %v1418_v59  ;;  %v1422_v61 = vld [vmem:[%s5400_s30 + $0x1e8] sm:$0xff]  ;;  %v1424_v62 = vld [vmem:[%s5400_s30 + $0x1f0] sm:$0xff] }
  0xbf   : > { %1421 = vst [vmem:[%s5405_s22 + $0x1e0] sm:$0xff] %v1420_v60  ;;  %1423 = vst [vmem:[%s5405_s22 + $0x1e8] sm:$0xff] %v1422_v61  ;;  %v1426_v63 = vld [vmem:[%s5400_s30 + $0x1f8] sm:$0xff]  ;;  %v1428_v0 = vld [vmem:[%s5400_s30 + $0x200] sm:$0xff] }
  0xc0   : > { %1425 = vst [vmem:[%s5405_s22 + $0x1f0] sm:$0xff] %v1424_v62  ;;  %v1430_v1 = vld [vmem:[%s5400_s30 + $0x208] sm:$0xff]  ;;  %1427 = vst [vmem:[%s5405_s22 + $0x1f8] sm:$0xff] %v1426_v63  ;;  %v1432_v2 = vld [vmem:[%s5400_s30 + $0x210] sm:$0xff] }
  0xc1   : > { %1429 = vst [vmem:[%s5405_s22 + $0x200] sm:$0xff] %v1428_v0  ;;  %1431 = vst [vmem:[%s5405_s22 + $0x208] sm:$0xff] %v1430_v1  ;;  %v1434_v3 = vld [vmem:[%s5400_s30 + $0x218] sm:$0xff]  ;;  %v1436_v4 = vld [vmem:[%s5400_s30 + $0x220] sm:$0xff] }
  0xc2   : > { %1433 = vst [vmem:[%s5405_s22 + $0x210] sm:$0xff] %v1432_v2  ;;  %1435 = vst [vmem:[%s5405_s22 + $0x218] sm:$0xff] %v1434_v3  ;;  %v1438_v5 = vld [vmem:[%s5400_s30 + $0x228] sm:$0xff]  ;;  %v1440_v6 = vld [vmem:[%s5400_s30 + $0x230] sm:$0xff] }
  0xc3   : > { %1437 = vst [vmem:[%s5405_s22 + $0x220] sm:$0xff] %v1436_v4  ;;  %v1442_v7 = vld [vmem:[%s5400_s30 + $0x238] sm:$0xff]  ;;  %1439 = vst [vmem:[%s5405_s22 + $0x228] sm:$0xff] %v1438_v5  ;;  %v1444_v8 = vld [vmem:[%s5400_s30 + $0x240] sm:$0xff] }
  0xc4   : > { %1441 = vst [vmem:[%s5405_s22 + $0x230] sm:$0xff] %v1440_v6  ;;  %1443 = vst [vmem:[%s5405_s22 + $0x238] sm:$0xff] %v1442_v7  ;;  %v1446_v9 = vld [vmem:[%s5400_s30 + $0x248] sm:$0xff]  ;;  %v1448_v10 = vld [vmem:[%s5400_s30 + $0x250] sm:$0xff] }
  0xc5   : > { %1445 = vst [vmem:[%s5405_s22 + $0x240] sm:$0xff] %v1444_v8  ;;  %1447 = vst [vmem:[%s5405_s22 + $0x248] sm:$0xff] %v1446_v9  ;;  %v1450_v11 = vld [vmem:[%s5400_s30 + $0x258] sm:$0xff]  ;;  %v1452_v12 = vld [vmem:[%s5400_s30 + $0x260] sm:$0xff] }
  0xc6   : > { %1449 = vst [vmem:[%s5405_s22 + $0x250] sm:$0xff] %v1448_v10  ;;  %v1454_v13 = vld [vmem:[%s5400_s30 + $0x268] sm:$0xff]  ;;  %1451 = vst [vmem:[%s5405_s22 + $0x258] sm:$0xff] %v1450_v11  ;;  %v1456_v14 = vld [vmem:[%s5400_s30 + $0x270] sm:$0xff] }
  0xc7   : > { %1453 = vst [vmem:[%s5405_s22 + $0x260] sm:$0xff] %v1452_v12  ;;  %1455 = vst [vmem:[%s5405_s22 + $0x268] sm:$0xff] %v1454_v13  ;;  %v1458_v15 = vld [vmem:[%s5400_s30 + $0x278] sm:$0xff]  ;;  %v1460_v16 = vld [vmem:[%s5400_s30 + $0x280] sm:$0xff] }
  0xc8   : > { %1457 = vst [vmem:[%s5405_s22 + $0x270] sm:$0xff] %v1456_v14  ;;  %1459 = vst [vmem:[%s5405_s22 + $0x278] sm:$0xff] %v1458_v15  ;;  %v1462_v17 = vld [vmem:[%s5400_s30 + $0x288] sm:$0xff]  ;;  %v1464_v18 = vld [vmem:[%s5400_s30 + $0x290] sm:$0xff] }
  0xc9   : > { %1461 = vst [vmem:[%s5405_s22 + $0x280] sm:$0xff] %v1460_v16  ;;  %v1466_v19 = vld [vmem:[%s5400_s30 + $0x298] sm:$0xff]  ;;  %1463 = vst [vmem:[%s5405_s22 + $0x288] sm:$0xff] %v1462_v17  ;;  %v1468_v20 = vld [vmem:[%s5400_s30 + $0x2a0] sm:$0xff] }
  0xca   : > { %1465 = vst [vmem:[%s5405_s22 + $0x290] sm:$0xff] %v1464_v18  ;;  %1467 = vst [vmem:[%s5405_s22 + $0x298] sm:$0xff] %v1466_v19  ;;  %v1470_v21 = vld [vmem:[%s5400_s30 + $0x2a8] sm:$0xff]  ;;  %v1472_v22 = vld [vmem:[%s5400_s30 + $0x2b0] sm:$0xff] }
  0xcb   : > { %1469 = vst [vmem:[%s5405_s22 + $0x2a0] sm:$0xff] %v1468_v20  ;;  %1471 = vst [vmem:[%s5405_s22 + $0x2a8] sm:$0xff] %v1470_v21  ;;  %v1474_v23 = vld [vmem:[%s5400_s30 + $0x2b8] sm:$0xff]  ;;  %v1476_v24 = vld [vmem:[%s5400_s30 + $0x2c0] sm:$0xff] }
  0xcc   : > { %1473 = vst [vmem:[%s5405_s22 + $0x2b0] sm:$0xff] %v1472_v22  ;;  %v1478_v25 = vld [vmem:[%s5400_s30 + $0x2c8] sm:$0xff]  ;;  %1475 = vst [vmem:[%s5405_s22 + $0x2b8] sm:$0xff] %v1474_v23  ;;  %v1480_v26 = vld [vmem:[%s5400_s30 + $0x2d0] sm:$0xff] }
  0xcd   : > { %1477 = vst [vmem:[%s5405_s22 + $0x2c0] sm:$0xff] %v1476_v24  ;;  %1479 = vst [vmem:[%s5405_s22 + $0x2c8] sm:$0xff] %v1478_v25  ;;  %v1482_v27 = vld [vmem:[%s5400_s30 + $0x2d8] sm:$0xff]  ;;  %v1484_v28 = vld [vmem:[%s5400_s30 + $0x2e0] sm:$0xff] }
  0xce   : > { %1481 = vst [vmem:[%s5405_s22 + $0x2d0] sm:$0xff] %v1480_v26  ;;  %1483 = vst [vmem:[%s5405_s22 + $0x2d8] sm:$0xff] %v1482_v27  ;;  %v1486_v29 = vld [vmem:[%s5400_s30 + $0x2e8] sm:$0xff]  ;;  %v1488_v30 = vld [vmem:[%s5400_s30 + $0x2f0] sm:$0xff] }
  0xcf   : > { %1485 = vst [vmem:[%s5405_s22 + $0x2e0] sm:$0xff] %v1484_v28  ;;  %v1490_v31 = vld [vmem:[%s5400_s30 + $0x2f8] sm:$0xff]  ;;  %1487 = vst [vmem:[%s5405_s22 + $0x2e8] sm:$0xff] %v1486_v29  ;;  %v1492_v32 = vld [vmem:[%s5400_s30 + $0x300] sm:$0xff] }
  0xd0   : > { %1489 = vst [vmem:[%s5405_s22 + $0x2f0] sm:$0xff] %v1488_v30  ;;  %1491 = vst [vmem:[%s5405_s22 + $0x2f8] sm:$0xff] %v1490_v31  ;;  %v1494_v33 = vld [vmem:[%s5400_s30 + $0x308] sm:$0xff]  ;;  %v1496_v34 = vld [vmem:[%s5400_s30 + $0x310] sm:$0xff] }
  0xd1   : > { %1493 = vst [vmem:[%s5405_s22 + $0x300] sm:$0xff] %v1492_v32  ;;  %1495 = vst [vmem:[%s5405_s22 + $0x308] sm:$0xff] %v1494_v33  ;;  %v1498_v35 = vld [vmem:[%s5400_s30 + $0x318] sm:$0xff]  ;;  %v1500_v36 = vld [vmem:[%s5400_s30 + $0x320] sm:$0xff] }
  0xd2   : > { %1497 = vst [vmem:[%s5405_s22 + $0x310] sm:$0xff] %v1496_v34  ;;  %v1502_v37 = vld [vmem:[%s5400_s30 + $0x328] sm:$0xff]  ;;  %1499 = vst [vmem:[%s5405_s22 + $0x318] sm:$0xff] %v1498_v35  ;;  %v1504_v38 = vld [vmem:[%s5400_s30 + $0x330] sm:$0xff] }
  0xd3   : > { %1501 = vst [vmem:[%s5405_s22 + $0x320] sm:$0xff] %v1500_v36  ;;  %1503 = vst [vmem:[%s5405_s22 + $0x328] sm:$0xff] %v1502_v37  ;;  %v1506_v39 = vld [vmem:[%s5400_s30 + $0x338] sm:$0xff]  ;;  %v1508_v40 = vld [vmem:[%s5400_s30 + $0x340] sm:$0xff] }
  0xd4   : > { %1505 = vst [vmem:[%s5405_s22 + $0x330] sm:$0xff] %v1504_v38  ;;  %1507 = vst [vmem:[%s5405_s22 + $0x338] sm:$0xff] %v1506_v39  ;;  %v1510_v41 = vld [vmem:[%s5400_s30 + $0x348] sm:$0xff]  ;;  %v1512_v42 = vld [vmem:[%s5400_s30 + $0x350] sm:$0xff] }
  0xd5   : > { %1509 = vst [vmem:[%s5405_s22 + $0x340] sm:$0xff] %v1508_v40  ;;  %v1514_v43 = vld [vmem:[%s5400_s30 + $0x358] sm:$0xff]  ;;  %1511 = vst [vmem:[%s5405_s22 + $0x348] sm:$0xff] %v1510_v41  ;;  %v1516_v44 = vld [vmem:[%s5400_s30 + $0x360] sm:$0xff] }
  0xd6   : > { %1513 = vst [vmem:[%s5405_s22 + $0x350] sm:$0xff] %v1512_v42  ;;  %1515 = vst [vmem:[%s5405_s22 + $0x358] sm:$0xff] %v1514_v43  ;;  %v1518_v45 = vld [vmem:[%s5400_s30 + $0x368] sm:$0xff]  ;;  %v1520_v46 = vld [vmem:[%s5400_s30 + $0x370] sm:$0xff] }
  0xd7   : > { %1517 = vst [vmem:[%s5405_s22 + $0x360] sm:$0xff] %v1516_v44  ;;  %1519 = vst [vmem:[%s5405_s22 + $0x368] sm:$0xff] %v1518_v45  ;;  %v1522_v47 = vld [vmem:[%s5400_s30 + $0x378] sm:$0xff]  ;;  %v1524_v48 = vld [vmem:[%s5400_s30 + $0x380] sm:$0xff] }
  0xd8   : > { %1521 = vst [vmem:[%s5405_s22 + $0x370] sm:$0xff] %v1520_v46  ;;  %v1526_v49 = vld [vmem:[%s5400_s30 + $0x388] sm:$0xff]  ;;  %1523 = vst [vmem:[%s5405_s22 + $0x378] sm:$0xff] %v1522_v47  ;;  %v1528_v50 = vld [vmem:[%s5400_s30 + $0x390] sm:$0xff] }
  0xd9   : > { %1525 = vst [vmem:[%s5405_s22 + $0x380] sm:$0xff] %v1524_v48  ;;  %1527 = vst [vmem:[%s5405_s22 + $0x388] sm:$0xff] %v1526_v49  ;;  %v1530_v51 = vld [vmem:[%s5400_s30 + $0x398] sm:$0xff]  ;;  %v1532_v52 = vld [vmem:[%s5400_s30 + $0x3a0] sm:$0xff] }
  0xda   : > { %1529 = vst [vmem:[%s5405_s22 + $0x390] sm:$0xff] %v1528_v50  ;;  %1531 = vst [vmem:[%s5405_s22 + $0x398] sm:$0xff] %v1530_v51  ;;  %v1534_v53 = vld [vmem:[%s5400_s30 + $0x3a8] sm:$0xff]  ;;  %v1536_v54 = vld [vmem:[%s5400_s30 + $0x3b0] sm:$0xff] }
  0xdb   : > { %1533 = vst [vmem:[%s5405_s22 + $0x3a0] sm:$0xff] %v1532_v52  ;;  %v1538_v55 = vld [vmem:[%s5400_s30 + $0x3b8] sm:$0xff]  ;;  %1535 = vst [vmem:[%s5405_s22 + $0x3a8] sm:$0xff] %v1534_v53  ;;  %v1540_v56 = vld [vmem:[%s5400_s30 + $0x3c0] sm:$0xff] }
  0xdc   : > { %1537 = vst [vmem:[%s5405_s22 + $0x3b0] sm:$0xff] %v1536_v54  ;;  %1539 = vst [vmem:[%s5405_s22 + $0x3b8] sm:$0xff] %v1538_v55  ;;  %v1542_v57 = vld [vmem:[%s5400_s30 + $0x3c8] sm:$0xff]  ;;  %v1544_v58 = vld [vmem:[%s5400_s30 + $0x3d0] sm:$0xff] }
  0xdd   : > { %1541 = vst [vmem:[%s5405_s22 + $0x3c0] sm:$0xff] %v1540_v56  ;;  %1543 = vst [vmem:[%s5405_s22 + $0x3c8] sm:$0xff] %v1542_v57  ;;  %v1546_v59 = vld [vmem:[%s5400_s30 + $0x3d8] sm:$0xff]  ;;  %v1548_v60 = vld [vmem:[%s5400_s30 + $0x3e0] sm:$0xff] }
  0xde   : > { %1545 = vst [vmem:[%s5405_s22 + $0x3d0] sm:$0xff] %v1544_v58  ;;  %v1550_v61 = vld [vmem:[%s5400_s30 + $0x3e8] sm:$0xff]  ;;  %1547 = vst [vmem:[%s5405_s22 + $0x3d8] sm:$0xff] %v1546_v59  ;;  %v1552_v62 = vld [vmem:[%s5400_s30 + $0x3f0] sm:$0xff] }
  0xdf   : > { %1549 = vst [vmem:[%s5405_s22 + $0x3e0] sm:$0xff] %v1548_v60  ;;  %1551 = vst [vmem:[%s5405_s22 + $0x3e8] sm:$0xff] %v1550_v61  ;;  %v1554_v63 = vld [vmem:[%s5400_s30 + $0x3f8] sm:$0xff]  ;;  %v1556_v0 = vld [vmem:[%s5400_s30 + $0x1000] sm:$0xff] }
  0xe0   : > { %1553 = vst [vmem:[%s5405_s22 + $0x3f0] sm:$0xff] %v1552_v62  ;;  %1555 = vst [vmem:[%s5405_s22 + $0x3f8] sm:$0xff] %v1554_v63  ;;  %v1558_v1 = vld [vmem:[%s5400_s30 + $0x1008] sm:$0xff]  ;;  %v1560_v2 = vld [vmem:[%s5400_s30 + $0x1010] sm:$0xff] }
  0xe1   : > { %1557 = vst [vmem:[%s5405_s22 + $0x400] sm:$0xff] %v1556_v0  ;;  %v1562_v3 = vld [vmem:[%s5400_s30 + $0x1018] sm:$0xff]  ;;  %1559 = vst [vmem:[%s5405_s22 + $0x408] sm:$0xff] %v1558_v1  ;;  %v1564_v4 = vld [vmem:[%s5400_s30 + $0x1020] sm:$0xff] }
  0xe2   : > { %1561 = vst [vmem:[%s5405_s22 + $0x410] sm:$0xff] %v1560_v2  ;;  %1563 = vst [vmem:[%s5405_s22 + $0x418] sm:$0xff] %v1562_v3  ;;  %v1566_v5 = vld [vmem:[%s5400_s30 + $0x1028] sm:$0xff]  ;;  %v1568_v6 = vld [vmem:[%s5400_s30 + $0x1030] sm:$0xff] }
  0xe3   : > { %1565 = vst [vmem:[%s5405_s22 + $0x420] sm:$0xff] %v1564_v4  ;;  %1567 = vst [vmem:[%s5405_s22 + $0x428] sm:$0xff] %v1566_v5  ;;  %v1570_v7 = vld [vmem:[%s5400_s30 + $0x1038] sm:$0xff]  ;;  %v1572_v8 = vld [vmem:[%s5400_s30 + $0x1040] sm:$0xff] }
  0xe4   : > { %1569 = vst [vmem:[%s5405_s22 + $0x430] sm:$0xff] %v1568_v6  ;;  %v1574_v9 = vld [vmem:[%s5400_s30 + $0x1048] sm:$0xff]  ;;  %1571 = vst [vmem:[%s5405_s22 + $0x438] sm:$0xff] %v1570_v7  ;;  %v1576_v10 = vld [vmem:[%s5400_s30 + $0x1050] sm:$0xff] }
  0xe5   : > { %1573 = vst [vmem:[%s5405_s22 + $0x440] sm:$0xff] %v1572_v8  ;;  %1575 = vst [vmem:[%s5405_s22 + $0x448] sm:$0xff] %v1574_v9  ;;  %v1578_v11 = vld [vmem:[%s5400_s30 + $0x1058] sm:$0xff]  ;;  %v1580_v12 = vld [vmem:[%s5400_s30 + $0x1060] sm:$0xff] }
  0xe6   : > { %1577 = vst [vmem:[%s5405_s22 + $0x450] sm:$0xff] %v1576_v10  ;;  %1579 = vst [vmem:[%s5405_s22 + $0x458] sm:$0xff] %v1578_v11  ;;  %v1582_v13 = vld [vmem:[%s5400_s30 + $0x1068] sm:$0xff]  ;;  %v1584_v14 = vld [vmem:[%s5400_s30 + $0x1070] sm:$0xff] }
  0xe7   : > { %1581 = vst [vmem:[%s5405_s22 + $0x460] sm:$0xff] %v1580_v12  ;;  %v1586_v15 = vld [vmem:[%s5400_s30 + $0x1078] sm:$0xff]  ;;  %1583 = vst [vmem:[%s5405_s22 + $0x468] sm:$0xff] %v1582_v13  ;;  %v1588_v16 = vld [vmem:[%s5400_s30 + $0x1080] sm:$0xff] }
  0xe8   : > { %1585 = vst [vmem:[%s5405_s22 + $0x470] sm:$0xff] %v1584_v14  ;;  %1587 = vst [vmem:[%s5405_s22 + $0x478] sm:$0xff] %v1586_v15  ;;  %v1590_v17 = vld [vmem:[%s5400_s30 + $0x1088] sm:$0xff]  ;;  %v1592_v18 = vld [vmem:[%s5400_s30 + $0x1090] sm:$0xff] }
  0xe9   : > { %1589 = vst [vmem:[%s5405_s22 + $0x480] sm:$0xff] %v1588_v16  ;;  %1591 = vst [vmem:[%s5405_s22 + $0x488] sm:$0xff] %v1590_v17  ;;  %v1594_v19 = vld [vmem:[%s5400_s30 + $0x1098] sm:$0xff]  ;;  %v1596_v20 = vld [vmem:[%s5400_s30 + $0x10a0] sm:$0xff] }
  0xea   : > { %1593 = vst [vmem:[%s5405_s22 + $0x490] sm:$0xff] %v1592_v18  ;;  %v1598_v21 = vld [vmem:[%s5400_s30 + $0x10a8] sm:$0xff]  ;;  %1595 = vst [vmem:[%s5405_s22 + $0x498] sm:$0xff] %v1594_v19  ;;  %v1600_v22 = vld [vmem:[%s5400_s30 + $0x10b0] sm:$0xff] }
  0xeb   : > { %1597 = vst [vmem:[%s5405_s22 + $0x4a0] sm:$0xff] %v1596_v20  ;;  %1599 = vst [vmem:[%s5405_s22 + $0x4a8] sm:$0xff] %v1598_v21  ;;  %v1602_v23 = vld [vmem:[%s5400_s30 + $0x10b8] sm:$0xff]  ;;  %v1604_v24 = vld [vmem:[%s5400_s30 + $0x10c0] sm:$0xff] }
  0xec   : > { %1601 = vst [vmem:[%s5405_s22 + $0x4b0] sm:$0xff] %v1600_v22  ;;  %1603 = vst [vmem:[%s5405_s22 + $0x4b8] sm:$0xff] %v1602_v23  ;;  %v1606_v25 = vld [vmem:[%s5400_s30 + $0x10c8] sm:$0xff]  ;;  %v1608_v26 = vld [vmem:[%s5400_s30 + $0x10d0] sm:$0xff] }
  0xed   : > { %1605 = vst [vmem:[%s5405_s22 + $0x4c0] sm:$0xff] %v1604_v24  ;;  %v1610_v27 = vld [vmem:[%s5400_s30 + $0x10d8] sm:$0xff]  ;;  %1607 = vst [vmem:[%s5405_s22 + $0x4c8] sm:$0xff] %v1606_v25  ;;  %v1612_v28 = vld [vmem:[%s5400_s30 + $0x10e0] sm:$0xff] }
  0xee   : > { %1609 = vst [vmem:[%s5405_s22 + $0x4d0] sm:$0xff] %v1608_v26  ;;  %1611 = vst [vmem:[%s5405_s22 + $0x4d8] sm:$0xff] %v1610_v27  ;;  %v1614_v29 = vld [vmem:[%s5400_s30 + $0x10e8] sm:$0xff]  ;;  %v1616_v30 = vld [vmem:[%s5400_s30 + $0x10f0] sm:$0xff] }
  0xef   : > { %1613 = vst [vmem:[%s5405_s22 + $0x4e0] sm:$0xff] %v1612_v28  ;;  %1615 = vst [vmem:[%s5405_s22 + $0x4e8] sm:$0xff] %v1614_v29  ;;  %v1618_v31 = vld [vmem:[%s5400_s30 + $0x10f8] sm:$0xff]  ;;  %v1620_v32 = vld [vmem:[%s5400_s30 + $0x1100] sm:$0xff] }
  0xf0   : > { %1617 = vst [vmem:[%s5405_s22 + $0x4f0] sm:$0xff] %v1616_v30  ;;  %v1622_v33 = vld [vmem:[%s5400_s30 + $0x1108] sm:$0xff]  ;;  %1619 = vst [vmem:[%s5405_s22 + $0x4f8] sm:$0xff] %v1618_v31  ;;  %v1624_v34 = vld [vmem:[%s5400_s30 + $0x1110] sm:$0xff] }
  0xf1   : > { %1621 = vst [vmem:[%s5405_s22 + $0x500] sm:$0xff] %v1620_v32  ;;  %1623 = vst [vmem:[%s5405_s22 + $0x508] sm:$0xff] %v1622_v33  ;;  %v1626_v35 = vld [vmem:[%s5400_s30 + $0x1118] sm:$0xff]  ;;  %v1628_v36 = vld [vmem:[%s5400_s30 + $0x1120] sm:$0xff] }
  0xf2   : > { %1625 = vst [vmem:[%s5405_s22 + $0x510] sm:$0xff] %v1624_v34  ;;  %1627 = vst [vmem:[%s5405_s22 + $0x518] sm:$0xff] %v1626_v35  ;;  %v1630_v37 = vld [vmem:[%s5400_s30 + $0x1128] sm:$0xff]  ;;  %v1632_v38 = vld [vmem:[%s5400_s30 + $0x1130] sm:$0xff] }
  0xf3   : > { %1629 = vst [vmem:[%s5405_s22 + $0x520] sm:$0xff] %v1628_v36  ;;  %v1634_v39 = vld [vmem:[%s5400_s30 + $0x1138] sm:$0xff]  ;;  %1631 = vst [vmem:[%s5405_s22 + $0x528] sm:$0xff] %v1630_v37  ;;  %v1636_v40 = vld [vmem:[%s5400_s30 + $0x1140] sm:$0xff] }
  0xf4   : > { %1633 = vst [vmem:[%s5405_s22 + $0x530] sm:$0xff] %v1632_v38  ;;  %1635 = vst [vmem:[%s5405_s22 + $0x538] sm:$0xff] %v1634_v39  ;;  %v1638_v41 = vld [vmem:[%s5400_s30 + $0x1148] sm:$0xff]  ;;  %v1640_v42 = vld [vmem:[%s5400_s30 + $0x1150] sm:$0xff] }
  0xf5   : > { %1637 = vst [vmem:[%s5405_s22 + $0x540] sm:$0xff] %v1636_v40  ;;  %1639 = vst [vmem:[%s5405_s22 + $0x548] sm:$0xff] %v1638_v41  ;;  %v1642_v43 = vld [vmem:[%s5400_s30 + $0x1158] sm:$0xff]  ;;  %v1644_v44 = vld [vmem:[%s5400_s30 + $0x1160] sm:$0xff] }
  0xf6   : > { %1641 = vst [vmem:[%s5405_s22 + $0x550] sm:$0xff] %v1640_v42  ;;  %v1646_v45 = vld [vmem:[%s5400_s30 + $0x1168] sm:$0xff]  ;;  %1643 = vst [vmem:[%s5405_s22 + $0x558] sm:$0xff] %v1642_v43  ;;  %v1648_v46 = vld [vmem:[%s5400_s30 + $0x1170] sm:$0xff] }
  0xf7   : > { %1645 = vst [vmem:[%s5405_s22 + $0x560] sm:$0xff] %v1644_v44  ;;  %1647 = vst [vmem:[%s5405_s22 + $0x568] sm:$0xff] %v1646_v45  ;;  %v1650_v47 = vld [vmem:[%s5400_s30 + $0x1178] sm:$0xff]  ;;  %v1652_v48 = vld [vmem:[%s5400_s30 + $0x1180] sm:$0xff] }
  0xf8   : > { %1649 = vst [vmem:[%s5405_s22 + $0x570] sm:$0xff] %v1648_v46  ;;  %1651 = vst [vmem:[%s5405_s22 + $0x578] sm:$0xff] %v1650_v47  ;;  %v1654_v49 = vld [vmem:[%s5400_s30 + $0x1188] sm:$0xff]  ;;  %v1656_v50 = vld [vmem:[%s5400_s30 + $0x1190] sm:$0xff] }
  0xf9   : > { %1653 = vst [vmem:[%s5405_s22 + $0x580] sm:$0xff] %v1652_v48  ;;  %v1658_v51 = vld [vmem:[%s5400_s30 + $0x1198] sm:$0xff]  ;;  %1655 = vst [vmem:[%s5405_s22 + $0x588] sm:$0xff] %v1654_v49  ;;  %v1660_v52 = vld [vmem:[%s5400_s30 + $0x11a0] sm:$0xff] }
  0xfa   : > { %1657 = vst [vmem:[%s5405_s22 + $0x590] sm:$0xff] %v1656_v50  ;;  %1659 = vst [vmem:[%s5405_s22 + $0x598] sm:$0xff] %v1658_v51  ;;  %v1662_v53 = vld [vmem:[%s5400_s30 + $0x11a8] sm:$0xff]  ;;  %v1664_v54 = vld [vmem:[%s5400_s30 + $0x11b0] sm:$0xff] }
  0xfb   : > { %1661 = vst [vmem:[%s5405_s22 + $0x5a0] sm:$0xff] %v1660_v52  ;;  %1663 = vst [vmem:[%s5405_s22 + $0x5a8] sm:$0xff] %v1662_v53  ;;  %v1666_v55 = vld [vmem:[%s5400_s30 + $0x11b8] sm:$0xff]  ;;  %v1668_v56 = vld [vmem:[%s5400_s30 + $0x11c0] sm:$0xff] }
  0xfc   : > { %1665 = vst [vmem:[%s5405_s22 + $0x5b0] sm:$0xff] %v1664_v54  ;;  %v1670_v57 = vld [vmem:[%s5400_s30 + $0x11c8] sm:$0xff]  ;;  %1667 = vst [vmem:[%s5405_s22 + $0x5b8] sm:$0xff] %v1666_v55  ;;  %v1672_v58 = vld [vmem:[%s5400_s30 + $0x11d0] sm:$0xff] }
  0xfd   : > { %1669 = vst [vmem:[%s5405_s22 + $0x5c0] sm:$0xff] %v1668_v56  ;;  %1671 = vst [vmem:[%s5405_s22 + $0x5c8] sm:$0xff] %v1670_v57  ;;  %v1674_v59 = vld [vmem:[%s5400_s30 + $0x11d8] sm:$0xff]  ;;  %v1676_v60 = vld [vmem:[%s5400_s30 + $0x11e0] sm:$0xff] }
  0xfe   : > { %1673 = vst [vmem:[%s5405_s22 + $0x5d0] sm:$0xff] %v1672_v58  ;;  %1675 = vst [vmem:[%s5405_s22 + $0x5d8] sm:$0xff] %v1674_v59  ;;  %v1678_v61 = vld [vmem:[%s5400_s30 + $0x11e8] sm:$0xff]  ;;  %v1680_v62 = vld [vmem:[%s5400_s30 + $0x11f0] sm:$0xff] }
  0xff   : > { %1677 = vst [vmem:[%s5405_s22 + $0x5e0] sm:$0xff] %v1676_v60  ;;  %v1682_v63 = vld [vmem:[%s5400_s30 + $0x11f8] sm:$0xff]  ;;  %1679 = vst [vmem:[%s5405_s22 + $0x5e8] sm:$0xff] %v1678_v61  ;;  %v1684_v0 = vld [vmem:[%s5400_s30 + $0x1200] sm:$0xff] }
 0x100   : > { %1681 = vst [vmem:[%s5405_s22 + $0x5f0] sm:$0xff] %v1680_v62  ;;  %1683 = vst [vmem:[%s5405_s22 + $0x5f8] sm:$0xff] %v1682_v63  ;;  %v1686_v1 = vld [vmem:[%s5400_s30 + $0x1208] sm:$0xff]  ;;  %v1688_v2 = vld [vmem:[%s5400_s30 + $0x1210] sm:$0xff] }
 0x101   : > { %1685 = vst [vmem:[%s5405_s22 + $0x600] sm:$0xff] %v1684_v0  ;;  %1687 = vst [vmem:[%s5405_s22 + $0x608] sm:$0xff] %v1686_v1  ;;  %v1690_v3 = vld [vmem:[%s5400_s30 + $0x1218] sm:$0xff]  ;;  %v1692_v4 = vld [vmem:[%s5400_s30 + $0x1220] sm:$0xff] }
 0x102   : > { %1689 = vst [vmem:[%s5405_s22 + $0x610] sm:$0xff] %v1688_v2  ;;  %v1694_v5 = vld [vmem:[%s5400_s30 + $0x1228] sm:$0xff]  ;;  %1691 = vst [vmem:[%s5405_s22 + $0x618] sm:$0xff] %v1690_v3  ;;  %v1696_v6 = vld [vmem:[%s5400_s30 + $0x1230] sm:$0xff] }
 0x103   : > { %1693 = vst [vmem:[%s5405_s22 + $0x620] sm:$0xff] %v1692_v4  ;;  %1695 = vst [vmem:[%s5405_s22 + $0x628] sm:$0xff] %v1694_v5  ;;  %v1698_v7 = vld [vmem:[%s5400_s30 + $0x1238] sm:$0xff]  ;;  %v1700_v8 = vld [vmem:[%s5400_s30 + $0x1240] sm:$0xff] }
 0x104   : > { %1697 = vst [vmem:[%s5405_s22 + $0x630] sm:$0xff] %v1696_v6  ;;  %1699 = vst [vmem:[%s5405_s22 + $0x638] sm:$0xff] %v1698_v7  ;;  %v1702_v9 = vld [vmem:[%s5400_s30 + $0x1248] sm:$0xff]  ;;  %v1704_v10 = vld [vmem:[%s5400_s30 + $0x1250] sm:$0xff] }
 0x105   : > { %1701 = vst [vmem:[%s5405_s22 + $0x640] sm:$0xff] %v1700_v8  ;;  %v1706_v11 = vld [vmem:[%s5400_s30 + $0x1258] sm:$0xff]  ;;  %1703 = vst [vmem:[%s5405_s22 + $0x648] sm:$0xff] %v1702_v9  ;;  %v1708_v12 = vld [vmem:[%s5400_s30 + $0x1260] sm:$0xff] }
 0x106   : > { %1705 = vst [vmem:[%s5405_s22 + $0x650] sm:$0xff] %v1704_v10  ;;  %1707 = vst [vmem:[%s5405_s22 + $0x658] sm:$0xff] %v1706_v11  ;;  %v1710_v13 = vld [vmem:[%s5400_s30 + $0x1268] sm:$0xff]  ;;  %v1712_v14 = vld [vmem:[%s5400_s30 + $0x1270] sm:$0xff] }
 0x107   : > { %1709 = vst [vmem:[%s5405_s22 + $0x660] sm:$0xff] %v1708_v12  ;;  %1711 = vst [vmem:[%s5405_s22 + $0x668] sm:$0xff] %v1710_v13  ;;  %v1714_v15 = vld [vmem:[%s5400_s30 + $0x1278] sm:$0xff]  ;;  %v1716_v16 = vld [vmem:[%s5400_s30 + $0x1280] sm:$0xff] }
 0x108   : > { %1713 = vst [vmem:[%s5405_s22 + $0x670] sm:$0xff] %v1712_v14  ;;  %v1718_v17 = vld [vmem:[%s5400_s30 + $0x1288] sm:$0xff]  ;;  %1715 = vst [vmem:[%s5405_s22 + $0x678] sm:$0xff] %v1714_v15  ;;  %v1720_v18 = vld [vmem:[%s5400_s30 + $0x1290] sm:$0xff] }
 0x109   : > { %1717 = vst [vmem:[%s5405_s22 + $0x680] sm:$0xff] %v1716_v16  ;;  %1719 = vst [vmem:[%s5405_s22 + $0x688] sm:$0xff] %v1718_v17  ;;  %v1722_v19 = vld [vmem:[%s5400_s30 + $0x1298] sm:$0xff]  ;;  %v1724_v20 = vld [vmem:[%s5400_s30 + $0x12a0] sm:$0xff] }
 0x10a   : > { %1721 = vst [vmem:[%s5405_s22 + $0x690] sm:$0xff] %v1720_v18  ;;  %1723 = vst [vmem:[%s5405_s22 + $0x698] sm:$0xff] %v1722_v19  ;;  %v1726_v21 = vld [vmem:[%s5400_s30 + $0x12a8] sm:$0xff]  ;;  %v1728_v22 = vld [vmem:[%s5400_s30 + $0x12b0] sm:$0xff] }
 0x10b   : > { %1725 = vst [vmem:[%s5405_s22 + $0x6a0] sm:$0xff] %v1724_v20  ;;  %v1730_v23 = vld [vmem:[%s5400_s30 + $0x12b8] sm:$0xff]  ;;  %1727 = vst [vmem:[%s5405_s22 + $0x6a8] sm:$0xff] %v1726_v21  ;;  %v1732_v24 = vld [vmem:[%s5400_s30 + $0x12c0] sm:$0xff] }
 0x10c   : > { %1729 = vst [vmem:[%s5405_s22 + $0x6b0] sm:$0xff] %v1728_v22  ;;  %1731 = vst [vmem:[%s5405_s22 + $0x6b8] sm:$0xff] %v1730_v23  ;;  %v1734_v25 = vld [vmem:[%s5400_s30 + $0x12c8] sm:$0xff]  ;;  %v1736_v26 = vld [vmem:[%s5400_s30 + $0x12d0] sm:$0xff] }
 0x10d   : > { %1733 = vst [vmem:[%s5405_s22 + $0x6c0] sm:$0xff] %v1732_v24  ;;  %1735 = vst [vmem:[%s5405_s22 + $0x6c8] sm:$0xff] %v1734_v25  ;;  %v1738_v27 = vld [vmem:[%s5400_s30 + $0x12d8] sm:$0xff]  ;;  %v1740_v28 = vld [vmem:[%s5400_s30 + $0x12e0] sm:$0xff] }
 0x10e   : > { %1737 = vst [vmem:[%s5405_s22 + $0x6d0] sm:$0xff] %v1736_v26  ;;  %v1742_v29 = vld [vmem:[%s5400_s30 + $0x12e8] sm:$0xff]  ;;  %1739 = vst [vmem:[%s5405_s22 + $0x6d8] sm:$0xff] %v1738_v27  ;;  %v1744_v30 = vld [vmem:[%s5400_s30 + $0x12f0] sm:$0xff] }
 0x10f   : > { %1741 = vst [vmem:[%s5405_s22 + $0x6e0] sm:$0xff] %v1740_v28  ;;  %1743 = vst [vmem:[%s5405_s22 + $0x6e8] sm:$0xff] %v1742_v29  ;;  %v1746_v31 = vld [vmem:[%s5400_s30 + $0x12f8] sm:$0xff]  ;;  %v1748_v32 = vld [vmem:[%s5400_s30 + $0x1300] sm:$0xff] }
 0x110   : > { %1745 = vst [vmem:[%s5405_s22 + $0x6f0] sm:$0xff] %v1744_v30  ;;  %1747 = vst [vmem:[%s5405_s22 + $0x6f8] sm:$0xff] %v1746_v31  ;;  %v1750_v33 = vld [vmem:[%s5400_s30 + $0x1308] sm:$0xff]  ;;  %v1752_v34 = vld [vmem:[%s5400_s30 + $0x1310] sm:$0xff] }
 0x111   : > { %1749 = vst [vmem:[%s5405_s22 + $0x700] sm:$0xff] %v1748_v32  ;;  %v1754_v35 = vld [vmem:[%s5400_s30 + $0x1318] sm:$0xff]  ;;  %1751 = vst [vmem:[%s5405_s22 + $0x708] sm:$0xff] %v1750_v33  ;;  %v1756_v36 = vld [vmem:[%s5400_s30 + $0x1320] sm:$0xff] }
 0x112   : > { %1753 = vst [vmem:[%s5405_s22 + $0x710] sm:$0xff] %v1752_v34  ;;  %1755 = vst [vmem:[%s5405_s22 + $0x718] sm:$0xff] %v1754_v35  ;;  %v1758_v37 = vld [vmem:[%s5400_s30 + $0x1328] sm:$0xff]  ;;  %v1760_v38 = vld [vmem:[%s5400_s30 + $0x1330] sm:$0xff] }
 0x113   : > { %1757 = vst [vmem:[%s5405_s22 + $0x720] sm:$0xff] %v1756_v36  ;;  %1759 = vst [vmem:[%s5405_s22 + $0x728] sm:$0xff] %v1758_v37  ;;  %v1762_v39 = vld [vmem:[%s5400_s30 + $0x1338] sm:$0xff]  ;;  %v1764_v40 = vld [vmem:[%s5400_s30 + $0x1340] sm:$0xff] }
 0x114   : > { %1761 = vst [vmem:[%s5405_s22 + $0x730] sm:$0xff] %v1760_v38  ;;  %v1766_v41 = vld [vmem:[%s5400_s30 + $0x1348] sm:$0xff]  ;;  %1763 = vst [vmem:[%s5405_s22 + $0x738] sm:$0xff] %v1762_v39  ;;  %v1768_v42 = vld [vmem:[%s5400_s30 + $0x1350] sm:$0xff] }
 0x115   : > { %1765 = vst [vmem:[%s5405_s22 + $0x740] sm:$0xff] %v1764_v40  ;;  %1767 = vst [vmem:[%s5405_s22 + $0x748] sm:$0xff] %v1766_v41  ;;  %v1770_v43 = vld [vmem:[%s5400_s30 + $0x1358] sm:$0xff]  ;;  %v1772_v44 = vld [vmem:[%s5400_s30 + $0x1360] sm:$0xff] }
 0x116   : > { %1769 = vst [vmem:[%s5405_s22 + $0x750] sm:$0xff] %v1768_v42  ;;  %1771 = vst [vmem:[%s5405_s22 + $0x758] sm:$0xff] %v1770_v43  ;;  %v1774_v45 = vld [vmem:[%s5400_s30 + $0x1368] sm:$0xff]  ;;  %v1776_v46 = vld [vmem:[%s5400_s30 + $0x1370] sm:$0xff] }
 0x117   : > { %1773 = vst [vmem:[%s5405_s22 + $0x760] sm:$0xff] %v1772_v44  ;;  %v1778_v47 = vld [vmem:[%s5400_s30 + $0x1378] sm:$0xff]  ;;  %1775 = vst [vmem:[%s5405_s22 + $0x768] sm:$0xff] %v1774_v45  ;;  %v1780_v48 = vld [vmem:[%s5400_s30 + $0x1380] sm:$0xff] }
 0x118   : > { %1777 = vst [vmem:[%s5405_s22 + $0x770] sm:$0xff] %v1776_v46  ;;  %1779 = vst [vmem:[%s5405_s22 + $0x778] sm:$0xff] %v1778_v47  ;;  %v1782_v49 = vld [vmem:[%s5400_s30 + $0x1388] sm:$0xff]  ;;  %v1784_v50 = vld [vmem:[%s5400_s30 + $0x1390] sm:$0xff] }
 0x119   : > { %1781 = vst [vmem:[%s5405_s22 + $0x780] sm:$0xff] %v1780_v48  ;;  %1783 = vst [vmem:[%s5405_s22 + $0x788] sm:$0xff] %v1782_v49  ;;  %v1786_v51 = vld [vmem:[%s5400_s30 + $0x1398] sm:$0xff]  ;;  %v1788_v52 = vld [vmem:[%s5400_s30 + $0x13a0] sm:$0xff] }
 0x11a   : > { %1785 = vst [vmem:[%s5405_s22 + $0x790] sm:$0xff] %v1784_v50  ;;  %v1790_v53 = vld [vmem:[%s5400_s30 + $0x13a8] sm:$0xff]  ;;  %1787 = vst [vmem:[%s5405_s22 + $0x798] sm:$0xff] %v1786_v51  ;;  %v1792_v54 = vld [vmem:[%s5400_s30 + $0x13b0] sm:$0xff] }
 0x11b   : > { %1789 = vst [vmem:[%s5405_s22 + $0x7a0] sm:$0xff] %v1788_v52  ;;  %1791 = vst [vmem:[%s5405_s22 + $0x7a8] sm:$0xff] %v1790_v53  ;;  %v1794_v55 = vld [vmem:[%s5400_s30 + $0x13b8] sm:$0xff]  ;;  %v1796_v56 = vld [vmem:[%s5400_s30 + $0x13c0] sm:$0xff] }
 0x11c   : > { %1793 = vst [vmem:[%s5405_s22 + $0x7b0] sm:$0xff] %v1792_v54  ;;  %1795 = vst [vmem:[%s5405_s22 + $0x7b8] sm:$0xff] %v1794_v55  ;;  %v1798_v57 = vld [vmem:[%s5400_s30 + $0x13c8] sm:$0xff]  ;;  %v1800_v58 = vld [vmem:[%s5400_s30 + $0x13d0] sm:$0xff] }
 0x11d   : > { %1797 = vst [vmem:[%s5405_s22 + $0x7c0] sm:$0xff] %v1796_v56  ;;  %v1802_v59 = vld [vmem:[%s5400_s30 + $0x13d8] sm:$0xff]  ;;  %1799 = vst [vmem:[%s5405_s22 + $0x7c8] sm:$0xff] %v1798_v57  ;;  %v1804_v60 = vld [vmem:[%s5400_s30 + $0x13e0] sm:$0xff] }
 0x11e   : > { %1801 = vst [vmem:[%s5405_s22 + $0x7d0] sm:$0xff] %v1800_v58  ;;  %1803 = vst [vmem:[%s5405_s22 + $0x7d8] sm:$0xff] %v1802_v59  ;;  %v1806_v61 = vld [vmem:[%s5400_s30 + $0x13e8] sm:$0xff]  ;;  %v1808_v62 = vld [vmem:[%s5400_s30 + $0x13f0] sm:$0xff] }
 0x11f   : > { %1805 = vst [vmem:[%s5405_s22 + $0x7e0] sm:$0xff] %v1804_v60  ;;  %1807 = vst [vmem:[%s5405_s22 + $0x7e8] sm:$0xff] %v1806_v61  ;;  %v1810_v63 = vld [vmem:[%s5400_s30 + $0x13f8] sm:$0xff] }
 0x120   : > { %1809 = vst [vmem:[%s5405_s22 + $0x7f0] sm:$0xff] %v1808_v62  ;;  %1811 = vst [vmem:[%s5405_s22 + $0x7f8] sm:$0xff] %v1810_v63 }
 0x121 PF: > { %p4632_p11 = scmp.ge.s32.totalorder %s4770_s17, 1  ;;  %p1816_p12 = scmp.lt.s32.totalorder %s4770_s17, 5 }
 0x123   : > { %p1817_p13 = pnand %p4632_p11, %p1816_p12 }
 0x125   : > { %1820 = sbr.rel (%p1817_p13) target bundleno = 953 (0x3b9), region = 119 }
 0x12c   : > { %s5919_s4 = sand.u32 1, %s4754_s13   ;;  %v4772_v0 = vmov 0  }
 0x12d   : > { %4719 = vset.pattern.permute.xlu1 %v4772_v0  ;;  %4718 = vset.pattern.permute.xlu0 %v4772_v0  ;;  %s4633_s5 = sshll.u32 %s5919_s4, 10  ;;  %s4635_s8 = sshll.u32 %s5919_s4, 11 }
 0x12e   : > { %s5924_s6 = scalar_lea.vmem [#allocation2], %s4633_s5  ;;  %s6184_s7 = scalar_lea.vmem [#allocation3], %s4633_s5 }
 0x12f   : > { %v2136_v1 = vld [vmem:[%s5924_s6 + $0x10] sm:$0xff]  ;;  %v2134_v2 = vld [vmem:[%s5924_s6] sm:$0xff]  ;;  %v2137_v3 = vld [vmem:[%s5924_s6 + $0x18] sm:$0xff]  ;;  %s6377_s9 = scalar_lea.vmem [#allocation4], %s4635_s8  ;;  %s6402_s10 = scalar_lea.vmem [#allocation5], %s4635_s8 }
 0x130   : > { %2274 = vperm.xlu1 %4719, %v2136_v1   ;;  %2264 = vperm.xlu0 %4718, %v2134_v2   ;;  %v2135_v4 = vld [vmem:[%s5924_s6 + $0x8] sm:$0xff]  ;;  %v2138_v6 = vld [vmem:[%s5924_s6 + $0x20] sm:$0xff]  ;;  %v2141_v7 = vld [vmem:[%s5924_s6 + $0x38] sm:$0xff]  ;;  %s4439_s11 = scalar_lea.sflag [#allocation6], %s5919_s4 }
 0x131   : > { %v2139_v5 = vld [vmem:[%s5924_s6 + $0x28] sm:$0xff]  ;;  %v2140_v8 = vld [vmem:[%s5924_s6 + $0x30] sm:$0xff]  ;;  %v2142_v10 = vld [vmem:[%s5924_s6 + $0x40] sm:$0xff] }
 0x132   : > { %v2143_v9 = vld [vmem:[%s5924_s6 + $0x48] sm:$0xff]  ;;  %v2145_v11 = vld [vmem:[%s5924_s6 + $0x58] sm:$0xff]  ;;  %v2144_v12 = vld [vmem:[%s5924_s6 + $0x50] sm:$0xff] }
 0x133   : > { %v2147_v13 = vld [vmem:[%s5924_s6 + $0x68] sm:$0xff]  ;;  %v2146_v14 = vld [vmem:[%s5924_s6 + $0x60] sm:$0xff]  ;;  %v2149_v15 = vld [vmem:[%s5924_s6 + $0x78] sm:$0xff] }
 0x134   : > { %2279 = vperm.xlu1 %4719, %v2137_v3   ;;  %2269 = vperm.xlu0 %4718, %v2135_v4   ;;  %v2148_v16 = vld [vmem:[%s5924_s6 + $0x70] sm:$0xff]  ;;  %v2151_v17 = vld [vmem:[%s5924_s6 + $0x88] sm:$0xff]  ;;  %v2150_v18 = vld [vmem:[%s5924_s6 + $0x80] sm:$0xff] }
 0x135   : > { %v2153_v19 = vld [vmem:[%s5924_s6 + $0x98] sm:$0xff]  ;;  %v2152_v20 = vld [vmem:[%s5924_s6 + $0x90] sm:$0xff]  ;;  %v2155_v21 = vld [vmem:[%s5924_s6 + $0xa8] sm:$0xff] }
 0x136   : > { %v2154_v22 = vld [vmem:[%s5924_s6 + $0xa0] sm:$0xff]  ;;  %v2157_v23 = vld [vmem:[%s5924_s6 + $0xb8] sm:$0xff]  ;;  %v2156_v24 = vld [vmem:[%s5924_s6 + $0xb0] sm:$0xff] }
 0x137   : > { %v2159_v25 = vld [vmem:[%s5924_s6 + $0xc8] sm:$0xff]  ;;  %v2158_v26 = vld [vmem:[%s5924_s6 + $0xc0] sm:$0xff]  ;;  %v2161_v27 = vld [vmem:[%s5924_s6 + $0xd8] sm:$0xff] }
 0x138   : > { %2289 = vperm.xlu1 %4719, %v2139_v5   ;;  %2284 = vperm.xlu0 %4718, %v2138_v6   ;;  %v2160_v28 = vld [vmem:[%s5924_s6 + $0xd0] sm:$0xff]  ;;  %v2163_v29 = vld [vmem:[%s5924_s6 + $0xe8] sm:$0xff]  ;;  %v2162_v30 = vld [vmem:[%s5924_s6 + $0xe0] sm:$0xff] }
 0x139   : > { %v2165_v31 = vld [vmem:[%s5924_s6 + $0xf8] sm:$0xff]  ;;  %v2164_v32 = vld [vmem:[%s5924_s6 + $0xf0] sm:$0xff]  ;;  %v2167_v33 = vld [vmem:[%s5924_s6 + $0x108] sm:$0xff] }
 0x13a   : > { %v2166_v34 = vld [vmem:[%s5924_s6 + $0x100] sm:$0xff]  ;;  %v2169_v35 = vld [vmem:[%s5924_s6 + $0x118] sm:$0xff]  ;;  %v2168_v36 = vld [vmem:[%s5924_s6 + $0x110] sm:$0xff] }
 0x13b   : > { %v2171_v37 = vld [vmem:[%s5924_s6 + $0x128] sm:$0xff]  ;;  %v2170_v38 = vld [vmem:[%s5924_s6 + $0x120] sm:$0xff]  ;;  %v2173_v39 = vld [vmem:[%s5924_s6 + $0x138] sm:$0xff] }
 0x13c   : > { %2299 = vperm.xlu1 %4719, %v2141_v7   ;;  %2294 = vperm.xlu0 %4718, %v2140_v8   ;;  %v2172_v40 = vld [vmem:[%s5924_s6 + $0x130] sm:$0xff]  ;;  %v2175_v41 = vld [vmem:[%s5924_s6 + $0x148] sm:$0xff]  ;;  %v2174_v42 = vld [vmem:[%s5924_s6 + $0x140] sm:$0xff] }
 0x13d   : > { %v2177_v43 = vld [vmem:[%s5924_s6 + $0x158] sm:$0xff]  ;;  %v2176_v44 = vld [vmem:[%s5924_s6 + $0x150] sm:$0xff]  ;;  %v2179_v45 = vld [vmem:[%s5924_s6 + $0x168] sm:$0xff] }
 0x13e   : > { %v2178_v46 = vld [vmem:[%s5924_s6 + $0x160] sm:$0xff]  ;;  %v2181_v47 = vld [vmem:[%s5924_s6 + $0x178] sm:$0xff]  ;;  %v2180_v48 = vld [vmem:[%s5924_s6 + $0x170] sm:$0xff] }
 0x13f   : > { %v2183_v49 = vld [vmem:[%s5924_s6 + $0x188] sm:$0xff]  ;;  %v2182_v50 = vld [vmem:[%s5924_s6 + $0x180] sm:$0xff]  ;;  %v2185_v51 = vld [vmem:[%s5924_s6 + $0x198] sm:$0xff] }
 0x140   : > { %2309 = vperm.xlu1 %4719, %v2143_v9   ;;  %2304 = vperm.xlu0 %4718, %v2142_v10   ;;  %v2184_v52 = vld [vmem:[%s5924_s6 + $0x190] sm:$0xff]  ;;  %v2187_v53 = vld [vmem:[%s5924_s6 + $0x1a8] sm:$0xff]  ;;  %v2186_v54 = vld [vmem:[%s5924_s6 + $0x1a0] sm:$0xff] }
 0x141   : > { %v2189_v55 = vld [vmem:[%s5924_s6 + $0x1b8] sm:$0xff]  ;;  %v2188_v56 = vld [vmem:[%s5924_s6 + $0x1b0] sm:$0xff]  ;;  %v2191_v57 = vld [vmem:[%s5924_s6 + $0x1c8] sm:$0xff] }
 0x142   : > { %v2190_v58 = vld [vmem:[%s5924_s6 + $0x1c0] sm:$0xff]  ;;  %v2193_v59 = vld [vmem:[%s5924_s6 + $0x1d8] sm:$0xff]  ;;  %v2192_v60 = vld [vmem:[%s5924_s6 + $0x1d0] sm:$0xff] }
 0x143   : > { %v2195_v61 = vld [vmem:[%s5924_s6 + $0x1e8] sm:$0xff]  ;;  %v2194_v62 = vld [vmem:[%s5924_s6 + $0x1e0] sm:$0xff]  ;;  %v2197_v63 = vld [vmem:[%s5924_s6 + $0x1f8] sm:$0xff] }
 0x144   : > { %2319 = vperm.xlu1 %4719, %v2145_v11   ;;  %2314 = vperm.xlu0 %4718, %v2144_v12   ;;  %v2196_v0 = vld [vmem:[%s5924_s6 + $0x1f0] sm:$0xff]  ;;  %v2199_v1 = vld [vmem:[%s5924_s6 + $0x208] sm:$0xff]  ;;  %v2198_v2 = vld [vmem:[%s5924_s6 + $0x200] sm:$0xff] }
 0x145   : > { %v2201_v5 = vld [vmem:[%s5924_s6 + $0x218] sm:$0xff]  ;;  %v2200_v6 = vld [vmem:[%s5924_s6 + $0x210] sm:$0xff]  ;;  %v2203_v9 = vld [vmem:[%s5924_s6 + $0x228] sm:$0xff] }
 0x146   : > { %v2202_v10 = vld [vmem:[%s5924_s6 + $0x220] sm:$0xff] }
 0x148   : > { %2329 = vperm.xlu1 %4719, %v2147_v13   ;;  %2324 = vperm.xlu0 %4718, %v2146_v14   ;;  %v2205_v13 = vld [vmem:[%s5924_s6 + $0x238] sm:$0xff]  ;;  %v2204_v14 = vld [vmem:[%s5924_s6 + $0x230] sm:$0xff] }
 0x14c   : > { %2339 = vperm.xlu1 %4719, %v2149_v15   ;;  %2334 = vperm.xlu0 %4718, %v2148_v16  }
 0x150   : > { %2349 = vperm.xlu1 %4719, %v2151_v17   ;;  %2344 = vperm.xlu0 %4718, %v2150_v18   ;;  %v2207_v17 = vld [vmem:[%s5924_s6 + $0x248] sm:$0xff]  ;;  %v2206_v18 = vld [vmem:[%s5924_s6 + $0x240] sm:$0xff] }
 0x154   : > { %2359 = vperm.xlu1 %4719, %v2153_v19   ;;  %2354 = vperm.xlu0 %4718, %v2152_v20  }
 0x158   : > { %2369 = vperm.xlu1 %4719, %v2155_v21   ;;  %2364 = vperm.xlu0 %4718, %v2154_v22   ;;  %v2209_v21 = vld [vmem:[%s5924_s6 + $0x258] sm:$0xff]  ;;  %v2208_v22 = vld [vmem:[%s5924_s6 + $0x250] sm:$0xff] }
 0x15c   : > { %2379 = vperm.xlu1 %4719, %v2157_v23   ;;  %2374 = vperm.xlu0 %4718, %v2156_v24  }
 0x160   : > { %2389 = vperm.xlu1 %4719, %v2159_v25   ;;  %2384 = vperm.xlu0 %4718, %v2158_v26   ;;  %v2211_v25 = vld [vmem:[%s5924_s6 + $0x268] sm:$0xff]  ;;  %v2210_v26 = vld [vmem:[%s5924_s6 + $0x260] sm:$0xff] }
 0x164   : > { %2399 = vperm.xlu1 %4719, %v2161_v27   ;;  %2394 = vperm.xlu0 %4718, %v2160_v28  }
 0x168   : > { %2409 = vperm.xlu1 %4719, %v2163_v29   ;;  %2404 = vperm.xlu0 %4718, %v2162_v30   ;;  %v2213_v29 = vld [vmem:[%s5924_s6 + $0x278] sm:$0xff]  ;;  %v2212_v30 = vld [vmem:[%s5924_s6 + $0x270] sm:$0xff] }
 0x16c   : > { %2419 = vperm.xlu1 %4719, %v2165_v31   ;;  %2414 = vperm.xlu0 %4718, %v2164_v32  }
 0x170   : > { %2429 = vperm.xlu1 %4719, %v2167_v33   ;;  %2424 = vperm.xlu0 %4718, %v2166_v34   ;;  %v2215_v33 = vld [vmem:[%s5924_s6 + $0x288] sm:$0xff]  ;;  %v2214_v34 = vld [vmem:[%s5924_s6 + $0x280] sm:$0xff] }
 0x174   : > { %2439 = vperm.xlu1 %4719, %v2169_v35   ;;  %2434 = vperm.xlu0 %4718, %v2168_v36  }
 0x178   : > { %2449 = vperm.xlu1 %4719, %v2171_v37   ;;  %2444 = vperm.xlu0 %4718, %v2170_v38   ;;  %v2217_v37 = vld [vmem:[%s5924_s6 + $0x298] sm:$0xff]  ;;  %v2216_v38 = vld [vmem:[%s5924_s6 + $0x290] sm:$0xff] }
 0x17c   : > { %2459 = vperm.xlu1 %4719, %v2173_v39   ;;  %2454 = vperm.xlu0 %4718, %v2172_v40  }
 0x180   : > { %2469 = vperm.xlu1 %4719, %v2175_v41   ;;  %2464 = vperm.xlu0 %4718, %v2174_v42   ;;  %v2219_v41 = vld [vmem:[%s5924_s6 + $0x2a8] sm:$0xff]  ;;  %v2218_v42 = vld [vmem:[%s5924_s6 + $0x2a0] sm:$0xff] }
 0x184   : > { %2479 = vperm.xlu1 %4719, %v2177_v43   ;;  %2474 = vperm.xlu0 %4718, %v2176_v44  }
 0x188   : > { %2489 = vperm.xlu1 %4719, %v2179_v45   ;;  %2484 = vperm.xlu0 %4718, %v2178_v46   ;;  %v2221_v45 = vld [vmem:[%s5924_s6 + $0x2b8] sm:$0xff]  ;;  %v2220_v46 = vld [vmem:[%s5924_s6 + $0x2b0] sm:$0xff] }
 0x18c   : > { %2499 = vperm.xlu1 %4719, %v2181_v47   ;;  %2494 = vperm.xlu0 %4718, %v2180_v48  }
 0x190   : > { %2509 = vperm.xlu1 %4719, %v2183_v49   ;;  %2504 = vperm.xlu0 %4718, %v2182_v50   ;;  %v2223_v49 = vld [vmem:[%s5924_s6 + $0x2c8] sm:$0xff]  ;;  %v2222_v50 = vld [vmem:[%s5924_s6 + $0x2c0] sm:$0xff] }
 0x194   : > { %2519 = vperm.xlu1 %4719, %v2185_v51   ;;  %2514 = vperm.xlu0 %4718, %v2184_v52  }
 0x198   : > { %2529 = vperm.xlu1 %4719, %v2187_v53   ;;  %2524 = vperm.xlu0 %4718, %v2186_v54   ;;  %v2225_v53 = vld [vmem:[%s5924_s6 + $0x2d8] sm:$0xff]  ;;  %v2224_v54 = vld [vmem:[%s5924_s6 + $0x2d0] sm:$0xff] }
 0x19c   : > { %2539 = vperm.xlu1 %4719, %v2189_v55   ;;  %2534 = vperm.xlu0 %4718, %v2188_v56  }
 0x1a0   : > { %2549 = vperm.xlu1 %4719, %v2191_v57   ;;  %2544 = vperm.xlu0 %4718, %v2190_v58   ;;  %v2227_v57 = vld [vmem:[%s5924_s6 + $0x2e8] sm:$0xff]  ;;  %v2226_v58 = vld [vmem:[%s5924_s6 + $0x2e0] sm:$0xff] }
 0x1a4   : > { %2559 = vperm.xlu1 %4719, %v2193_v59   ;;  %2554 = vperm.xlu0 %4718, %v2192_v60  }
 0x1a8   : > { %2569 = vperm.xlu1 %4719, %v2195_v61   ;;  %2564 = vperm.xlu0 %4718, %v2194_v62   ;;  %v2229_v61 = vld [vmem:[%s5924_s6 + $0x2f8] sm:$0xff]  ;;  %v2228_v62 = vld [vmem:[%s5924_s6 + $0x2f0] sm:$0xff] }
 0x1ac   : > { %2579 = vperm.xlu1 %4719, %v2197_v63   ;;  %2574 = vperm.xlu0 %4718, %v2196_v0  }
 0x1af   : > { %v5992_v3 = vpop.permute.xlu1 %2274  ;;  %v5994_v4 = vpop.permute.xlu0 %2264 }
 0x1b0   : > { %2589 = vperm.xlu1 %4719, %v2199_v1   ;;  %2584 = vperm.xlu0 %4718, %v2198_v2   ;;  %v2231_v1 = vld [vmem:[%s5924_s6 + $0x308] sm:$0xff]  ;;  %v2230_v2 = vld [vmem:[%s5924_s6 + $0x300] sm:$0xff] }
 0x1b3   : > { %v5998_v7 = vpop.permute.xlu1 %2279  ;;  %v6000_v8 = vpop.permute.xlu0 %2269 }
 0x1b4   : > { %2599 = vperm.xlu1 %4719, %v2201_v5   ;;  %2594 = vperm.xlu0 %4718, %v2200_v6  }
 0x1b7   : > { %v6004_v11 = vpop.permute.xlu1 %2289  ;;  %v6006_v12 = vpop.permute.xlu0 %2284 }
 0x1b8   : > { %2609 = vperm.xlu1 %4719, %v2203_v9   ;;  %2604 = vperm.xlu0 %4718, %v2202_v10   ;;  %v2233_v9 = vld [vmem:[%s5924_s6 + $0x318] sm:$0xff]  ;;  %v2232_v10 = vld [vmem:[%s5924_s6 + $0x310] sm:$0xff] }
 0x1bb   : > { %v6010_v15 = vpop.permute.xlu1 %2299  ;;  %v6012_v16 = vpop.permute.xlu0 %2294 }
 0x1bc   : > { %2619 = vperm.xlu1 %4719, %v2205_v13   ;;  %2614 = vperm.xlu0 %4718, %v2204_v14  }
 0x1bf   : > { %v6016_v19 = vpop.permute.xlu1 %2309  ;;  %v6018_v20 = vpop.permute.xlu0 %2304 }
 0x1c0   : > { %2629 = vperm.xlu1 %4719, %v2207_v17   ;;  %2624 = vperm.xlu0 %4718, %v2206_v18   ;;  %v2235_v17 = vld [vmem:[%s5924_s6 + $0x328] sm:$0xff]  ;;  %v2234_v18 = vld [vmem:[%s5924_s6 + $0x320] sm:$0xff] }
 0x1c3   : > { %v6022_v23 = vpop.permute.xlu1 %2319  ;;  %v6024_v24 = vpop.permute.xlu0 %2314 }
 0x1c4   : > { %2639 = vperm.xlu1 %4719, %v2209_v21   ;;  %2634 = vperm.xlu0 %4718, %v2208_v22  }
 0x1c7   : > { %v6028_v27 = vpop.permute.xlu1 %2329  ;;  %v6030_v28 = vpop.permute.xlu0 %2324 }
 0x1c8   : > { %2649 = vperm.xlu1 %4719, %v2211_v25   ;;  %2644 = vperm.xlu0 %4718, %v2210_v26   ;;  %v2237_v25 = vld [vmem:[%s5924_s6 + $0x338] sm:$0xff]  ;;  %v2236_v26 = vld [vmem:[%s5924_s6 + $0x330] sm:$0xff] }
 0x1cb   : > { %v6034_v31 = vpop.permute.xlu1 %2339  ;;  %v6036_v32 = vpop.permute.xlu0 %2334 }
 0x1cc   : > { %2659 = vperm.xlu1 %4719, %v2213_v29   ;;  %2654 = vperm.xlu0 %4718, %v2212_v30  }
 0x1cf   : > { %v6040_v35 = vpop.permute.xlu1 %2349  ;;  %v6042_v36 = vpop.permute.xlu0 %2344 }
 0x1d0   : > { %2669 = vperm.xlu1 %4719, %v2215_v33   ;;  %2664 = vperm.xlu0 %4718, %v2214_v34   ;;  %v2239_v33 = vld [vmem:[%s5924_s6 + $0x348] sm:$0xff]  ;;  %v2238_v34 = vld [vmem:[%s5924_s6 + $0x340] sm:$0xff] }
 0x1d3   : > { %v6046_v39 = vpop.permute.xlu1 %2359  ;;  %v6048_v40 = vpop.permute.xlu0 %2354 }
 0x1d4   : > { %2679 = vperm.xlu1 %4719, %v2217_v37   ;;  %2674 = vperm.xlu0 %4718, %v2216_v38  }
 0x1d7   : > { %v6052_v43 = vpop.permute.xlu1 %2369  ;;  %v6054_v44 = vpop.permute.xlu0 %2364 }
 0x1d8   : > { %2689 = vperm.xlu1 %4719, %v2219_v41   ;;  %2684 = vperm.xlu0 %4718, %v2218_v42   ;;  %v2241_v41 = vld [vmem:[%s5924_s6 + $0x358] sm:$0xff]  ;;  %v2240_v42 = vld [vmem:[%s5924_s6 + $0x350] sm:$0xff] }
 0x1db   : > { %v6058_v47 = vpop.permute.xlu1 %2379  ;;  %v6060_v48 = vpop.permute.xlu0 %2374 }
 0x1dc   : > { %2699 = vperm.xlu1 %4719, %v2221_v45   ;;  %2694 = vperm.xlu0 %4718, %v2220_v46  }
 0x1df   : > { %v6064_v51 = vpop.permute.xlu1 %2389  ;;  %v6066_v52 = vpop.permute.xlu0 %2384 }
 0x1e0   : > { %2709 = vperm.xlu1 %4719, %v2223_v49   ;;  %2704 = vperm.xlu0 %4718, %v2222_v50   ;;  %v2243_v49 = vld [vmem:[%s5924_s6 + $0x368] sm:$0xff]  ;;  %v2242_v50 = vld [vmem:[%s5924_s6 + $0x360] sm:$0xff] }
 0x1e3   : > { %v6070_v55 = vpop.permute.xlu1 %2399  ;;  %v6072_v56 = vpop.permute.xlu0 %2394 }
 0x1e4   : > { %2719 = vperm.xlu1 %4719, %v2225_v53   ;;  %2714 = vperm.xlu0 %4718, %v2224_v54  }
 0x1e7   : > { %v6076_v59 = vpop.permute.xlu1 %2409  ;;  %v6078_v60 = vpop.permute.xlu0 %2404 }
 0x1e8   : > { %2729 = vperm.xlu1 %4719, %v2227_v57   ;;  %2724 = vperm.xlu0 %4718, %v2226_v58   ;;  %v2245_v57 = vld [vmem:[%s5924_s6 + $0x378] sm:$0xff]  ;;  %v2244_v58 = vld [vmem:[%s5924_s6 + $0x370] sm:$0xff] }
 0x1eb   : > { %v6082_v63 = vpop.permute.xlu1 %2419  ;;  %v6084_v0 = vpop.permute.xlu0 %2414 }
 0x1ec   : > { %2739 = vperm.xlu1 %4719, %v2229_v61   ;;  %2734 = vperm.xlu0 %4718, %v2228_v62  }
 0x1ef   : > { %v6088_v5 = vpop.permute.xlu1 %2429  ;;  %v6090_v6 = vpop.permute.xlu0 %2424 }
 0x1f0   : > { %2749 = vperm.xlu1 %4719, %v2231_v1   ;;  %2744 = vperm.xlu0 %4718, %v2230_v2   ;;  %v2247_v1 = vld [vmem:[%s5924_s6 + $0x388] sm:$0xff]  ;;  %v2246_v2 = vld [vmem:[%s5924_s6 + $0x380] sm:$0xff] }
 0x1f3   : > { %v6094_v13 = vpop.permute.xlu1 %2439  ;;  %v6096_v14 = vpop.permute.xlu0 %2434 }
 0x1f4   : > { %2759 = vperm.xlu1 %4719, %v2233_v9   ;;  %2754 = vperm.xlu0 %4718, %v2232_v10  }
 0x1f7   : > { %v6100_v21 = vpop.permute.xlu1 %2449  ;;  %v6102_v22 = vpop.permute.xlu0 %2444 }
 0x1f8   : > { %2769 = vperm.xlu1 %4719, %v2235_v17   ;;  %2764 = vperm.xlu0 %4718, %v2234_v18   ;;  %v2249_v17 = vld [vmem:[%s5924_s6 + $0x398] sm:$0xff]  ;;  %v2248_v18 = vld [vmem:[%s5924_s6 + $0x390] sm:$0xff] }
 0x1fb   : > { %v6106_v29 = vpop.permute.xlu1 %2459  ;;  %v6108_v30 = vpop.permute.xlu0 %2454 }
 0x1fc   : > { %2779 = vperm.xlu1 %4719, %v2237_v25   ;;  %2774 = vperm.xlu0 %4718, %v2236_v26  }
 0x1ff   : > { %v6112_v37 = vpop.permute.xlu1 %2469  ;;  %v6114_v38 = vpop.permute.xlu0 %2464 }
 0x200   : > { %2789 = vperm.xlu1 %4719, %v2239_v33   ;;  %2784 = vperm.xlu0 %4718, %v2238_v34   ;;  %v2251_v33 = vld [vmem:[%s5924_s6 + $0x3a8] sm:$0xff]  ;;  %v2250_v34 = vld [vmem:[%s5924_s6 + $0x3a0] sm:$0xff] }
 0x203   : > { %v6118_v45 = vpop.permute.xlu1 %2479  ;;  %v6120_v46 = vpop.permute.xlu0 %2474 }
 0x204   : > { %2799 = vperm.xlu1 %4719, %v2241_v41   ;;  %2794 = vperm.xlu0 %4718, %v2240_v42  }
 0x207   : > { %v6124_v53 = vpop.permute.xlu1 %2489  ;;  %v6126_v54 = vpop.permute.xlu0 %2484 }
 0x208   : > { %2809 = vperm.xlu1 %4719, %v2243_v49   ;;  %2804 = vperm.xlu0 %4718, %v2242_v50   ;;  %v2253_v49 = vld [vmem:[%s5924_s6 + $0x3b8] sm:$0xff]  ;;  %v2252_v50 = vld [vmem:[%s5924_s6 + $0x3b0] sm:$0xff] }
 0x20b   : > { %v6130_v61 = vpop.permute.xlu1 %2499  ;;  %v6132_v62 = vpop.permute.xlu0 %2494 }
 0x20c   : > { %7349 = vst [vmem:[#allocation10_spill] sm:$0xff] %v6132_v62  ;;  %2819 = vperm.xlu1 %4719, %v2245_v57   ;;  %2814 = vperm.xlu0 %4718, %v2244_v58   ;;  %v1882_v62 = vld [vmem:[%s6377_s9 + $0x20] sm:$0xff] }
 0x20f   : > { %v6136_v9 = vpop.permute.xlu1 %2509  ;;  %v6138_v10 = vpop.permute.xlu0 %2504 }
 0x210   : > { %7350 = vst [vmem:[#allocation11_spill] sm:$0xff] %v6136_v9  ;;  %7351 = vst [vmem:[#allocation12_spill] sm:$0xff] %v6138_v10  ;;  %2829 = vperm.xlu1 %4719, %v2247_v1   ;;  %2824 = vperm.xlu0 %4718, %v2246_v2   ;;  %v2255_v1 = vld [vmem:[%s5924_s6 + $0x3c8] sm:$0xff]  ;;  %v2254_v2 = vld [vmem:[%s5924_s6 + $0x3c0] sm:$0xff] }
 0x211   : > { %v1885_v10 = vld [vmem:[%s6377_s9 + $0x38] sm:$0xff] }
 0x213   : > { %v6142_v25 = vpop.permute.xlu1 %2519  ;;  %v6144_v26 = vpop.permute.xlu0 %2514 }
 0x214   : > { %7352 = vst [vmem:[#allocation13_spill] sm:$0xff] %v6142_v25  ;;  %7353 = vst [vmem:[#allocation14_spill] sm:$0xff] %v6144_v26  ;;  %2839 = vperm.xlu1 %4719, %v2249_v17   ;;  %2834 = vperm.xlu0 %4718, %v2248_v18  }
 0x217   : > { %v6148_v41 = vpop.permute.xlu1 %2529  ;;  %v6150_v42 = vpop.permute.xlu0 %2524 }
 0x218   : > { %7354 = vst [vmem:[#allocation15_spill] sm:$0xff] %v6148_v41  ;;  %7355 = vst [vmem:[#allocation16_spill] sm:$0xff] %v6150_v42  ;;  %2849 = vperm.xlu1 %4719, %v2251_v33   ;;  %2844 = vperm.xlu0 %4718, %v2250_v34   ;;  %v2257_v33 = vld [vmem:[%s5924_s6 + $0x3d8] sm:$0xff]  ;;  %v2256_v34 = vld [vmem:[%s5924_s6 + $0x3d0] sm:$0xff] }
 0x21b   : > { %v6154_v57 = vpop.permute.xlu1 %2539  ;;  %v6156_v58 = vpop.permute.xlu0 %2534 }
 0x21c   : > { %7356 = vst [vmem:[#allocation17_spill] sm:$0xff] %v6154_v57  ;;  %7357 = vst [vmem:[#allocation18_spill] sm:$0xff] %v6156_v58  ;;  %2859 = vperm.xlu1 %4719, %v2253_v49   ;;  %2854 = vperm.xlu0 %4718, %v2252_v50   ;;  %v2259_v49 = vld [vmem:[%s5924_s6 + $0x3e8] sm:$0xff]  ;;  %v2258_v50 = vld [vmem:[%s5924_s6 + $0x3e0] sm:$0xff] }
 0x21f   : > { %v6160_v17 = vpop.permute.xlu1 %2549  ;;  %v6162_v18 = vpop.permute.xlu0 %2544 }
 0x220   : > { %7358 = vst [vmem:[#allocation19_spill] sm:$0xff] %v6160_v17  ;;  %7359 = vst [vmem:[#allocation20_spill] sm:$0xff] %v6162_v18  ;;  %2869 = vperm.xlu1 %4719, %v2255_v1   ;;  %2864 = vperm.xlu0 %4718, %v2254_v2   ;;  %v2261_v18 = vld [vmem:[%s5924_s6 + $0x3f8] sm:$0xff]  ;;  %v2260_v1 = vld [vmem:[%s5924_s6 + $0x3f0] sm:$0xff] }
 0x223   : > { %v6166_v42 = vpop.permute.xlu1 %2559  ;;  %v6168_v57 = vpop.permute.xlu0 %2554 }
 0x224   : > { %7360 = vst [vmem:[#allocation21_spill] sm:$0xff] %v6166_v42  ;;  %7361 = vst [vmem:[#allocation22_spill] sm:$0xff] %v6168_v57  ;;  %2879 = vperm.xlu1 %4719, %v2257_v33   ;;  %2874 = vperm.xlu0 %4718, %v2256_v34   ;;  %v3159_v33 = vld [vmem:[%s6184_s7 + $0x8] sm:$0xff]  ;;  %v3158_v34 = vld [vmem:[%s6184_s7] sm:$0xff] }
 0x225   : > { %v3222_v42 = vld [vmem:[%s6184_s7 + $0x200] sm:$0xff] }
 0x227   : > { %v6172_v58 = vpop.permute.xlu1 %2569  ;;  %v6174_v17 = vpop.permute.xlu0 %2564 }
 0x228   : > { %7362 = vst [vmem:[#allocation23_spill] sm:$0xff] %v6172_v58  ;;  %7363 = vst [vmem:[#allocation24_spill] sm:$0xff] %v6174_v17  ;;  %2889 = vperm.xlu1 %4719, %v2259_v49   ;;  %2884 = vperm.xlu0 %4718, %v2258_v50   ;;  %v3163_v17 = vld [vmem:[%s6184_s7 + $0x28] sm:$0xff]  ;;  %v3162_v58 = vld [vmem:[%s6184_s7 + $0x20] sm:$0xff] }
 0x22b   : > { %v6178_v2 = vpop.permute.xlu1 %2579  ;;  %v6180_v41 = vpop.permute.xlu0 %2574 }
 0x22c   : > { %7364 = vst [vmem:[#allocation25_spill] sm:$0xff] %v6178_v2  ;;  %7365 = vst [vmem:[#allocation26_spill] sm:$0xff] %v6180_v41  ;;  %2899 = vperm.xlu1 %4719, %v2261_v18   ;;  %2894 = vperm.xlu0 %4718, %v2260_v1   ;;  %v3161_v18 = vld [vmem:[%s6184_s7 + $0x18] sm:$0xff]  ;;  %v3160_v1 = vld [vmem:[%s6184_s7 + $0x10] sm:$0xff] }
 0x22f   : > { %v6188_v49 = vpop.permute.xlu1 %2589  ;;  %v6190_v50 = vpop.permute.xlu0 %2584 }
 0x230   : > { %7366 = vst [vmem:[#allocation27_spill] sm:$0xff] %v6188_v49  ;;  %7367 = vst [vmem:[#allocation28_spill] sm:$0xff] %v6190_v50  ;;  %3293 = vperm.xlu1 %4719, %v3159_v33   ;;  %3288 = vperm.xlu0 %4718, %v3158_v34   ;;  %v3165_v33 = vld [vmem:[%s6184_s7 + $0x38] sm:$0xff]  ;;  %v3164_v34 = vld [vmem:[%s6184_s7 + $0x30] sm:$0xff] }
 0x233   : > { %v6194_v41 = vpop.permute.xlu1 %2599  ;;  %v6196_v2 = vpop.permute.xlu0 %2594 }
 0x234   : > { %7368 = vst [vmem:[#allocation29_spill] sm:$0xff] %v6194_v41  ;;  %7369 = vst [vmem:[#allocation30_spill] sm:$0xff] %v6196_v2  ;;  %3303 = vperm.xlu1 %4719, %v3161_v18   ;;  %3298 = vperm.xlu0 %4718, %v3160_v1   ;;  %v3167_v18 = vld [vmem:[%s6184_s7 + $0x48] sm:$0xff]  ;;  %v3166_v1 = vld [vmem:[%s6184_s7 + $0x40] sm:$0xff] }
 0x237   : > { %v6200_v57 = vpop.permute.xlu1 %2609  ;;  %v6202_v49 = vpop.permute.xlu0 %2604 }
 0x238   : > { %7370 = vst [vmem:[#allocation31_spill] sm:$0xff] %v6200_v57  ;;  %7371 = vst [vmem:[#allocation32_spill] sm:$0xff] %v6202_v49  ;;  %3313 = vperm.xlu1 %4719, %v3163_v17   ;;  %3308 = vperm.xlu0 %4718, %v3162_v58   ;;  %v3169_v58 = vld [vmem:[%s6184_s7 + $0x58] sm:$0xff]  ;;  %v3168_v17 = vld [vmem:[%s6184_s7 + $0x50] sm:$0xff] }
 0x23b   : > { %v6206_v50 = vpop.permute.xlu1 %2619  ;;  %v6208_v41 = vpop.permute.xlu0 %2614 }
 0x23c   : > { %7372 = vst [vmem:[#allocation33_spill] sm:$0xff] %v6206_v50  ;;  %7373 = vst [vmem:[#allocation34_spill] sm:$0xff] %v6208_v41  ;;  %3323 = vperm.xlu1 %4719, %v3165_v33   ;;  %3318 = vperm.xlu0 %4718, %v3164_v34   ;;  %v3171_v33 = vld [vmem:[%s6184_s7 + $0x68] sm:$0xff]  ;;  %v3170_v34 = vld [vmem:[%s6184_s7 + $0x60] sm:$0xff] }
 0x23f   : > { %v6212_v2 = vpop.permute.xlu1 %2629  ;;  %v6214_v57 = vpop.permute.xlu0 %2624 }
 0x240   : > { %7374 = vst [vmem:[#allocation35_spill] sm:$0xff] %v6212_v2  ;;  %7375 = vst [vmem:[#allocation36_spill] sm:$0xff] %v6214_v57  ;;  %3333 = vperm.xlu1 %4719, %v3167_v18   ;;  %3328 = vperm.xlu0 %4718, %v3166_v1   ;;  %v3173_v18 = vld [vmem:[%s6184_s7 + $0x78] sm:$0xff]  ;;  %v3172_v1 = vld [vmem:[%s6184_s7 + $0x70] sm:$0xff] }
 0x243   : > { %v6218_v49 = vpop.permute.xlu1 %2639  ;;  %v6220_v50 = vpop.permute.xlu0 %2634 }
 0x244   : > { %7376 = vst [vmem:[#allocation37_spill] sm:$0xff] %v6218_v49  ;;  %7377 = vst [vmem:[#allocation38_spill] sm:$0xff] %v6220_v50  ;;  %3343 = vperm.xlu1 %4719, %v3169_v58   ;;  %3338 = vperm.xlu0 %4718, %v3168_v17   ;;  %v3175_v58 = vld [vmem:[%s6184_s7 + $0x88] sm:$0xff]  ;;  %v3174_v17 = vld [vmem:[%s6184_s7 + $0x80] sm:$0xff] }
 0x247   : > { %v6224_v41 = vpop.permute.xlu1 %2649  ;;  %v6226_v2 = vpop.permute.xlu0 %2644 }
 0x248   : > { %7378 = vst [vmem:[#allocation39_spill] sm:$0xff] %v6224_v41  ;;  %7379 = vst [vmem:[#allocation40_spill] sm:$0xff] %v6226_v2  ;;  %3353 = vperm.xlu1 %4719, %v3171_v33   ;;  %3348 = vperm.xlu0 %4718, %v3170_v34   ;;  %v3177_v33 = vld [vmem:[%s6184_s7 + $0x98] sm:$0xff]  ;;  %v3176_v34 = vld [vmem:[%s6184_s7 + $0x90] sm:$0xff] }
 0x24b   : > { %v6230_v57 = vpop.permute.xlu1 %2659  ;;  %v6232_v49 = vpop.permute.xlu0 %2654 }
 0x24c   : > { %7380 = vst [vmem:[#allocation41_spill] sm:$0xff] %v6230_v57  ;;  %7381 = vst [vmem:[#allocation42_spill] sm:$0xff] %v6232_v49  ;;  %3363 = vperm.xlu1 %4719, %v3173_v18   ;;  %3358 = vperm.xlu0 %4718, %v3172_v1   ;;  %v3179_v18 = vld [vmem:[%s6184_s7 + $0xa8] sm:$0xff]  ;;  %v3178_v1 = vld [vmem:[%s6184_s7 + $0xa0] sm:$0xff] }
 0x24f   : > { %v6236_v50 = vpop.permute.xlu1 %2669  ;;  %v6238_v41 = vpop.permute.xlu0 %2664 }
 0x250   : > { %7382 = vst [vmem:[#allocation43_spill] sm:$0xff] %v6236_v50  ;;  %7383 = vst [vmem:[#allocation44_spill] sm:$0xff] %v6238_v41  ;;  %3373 = vperm.xlu1 %4719, %v3175_v58   ;;  %3368 = vperm.xlu0 %4718, %v3174_v17   ;;  %v3181_v58 = vld [vmem:[%s6184_s7 + $0xb8] sm:$0xff]  ;;  %v3180_v17 = vld [vmem:[%s6184_s7 + $0xb0] sm:$0xff] }
 0x253   : > { %v6242_v2 = vpop.permute.xlu1 %2679  ;;  %v6244_v57 = vpop.permute.xlu0 %2674 }
 0x254   : > { %7384 = vst [vmem:[#allocation45_spill] sm:$0xff] %v6242_v2  ;;  %7385 = vst [vmem:[#allocation46_spill] sm:$0xff] %v6244_v57  ;;  %3383 = vperm.xlu1 %4719, %v3177_v33   ;;  %3378 = vperm.xlu0 %4718, %v3176_v34   ;;  %v3183_v33 = vld [vmem:[%s6184_s7 + $0xc8] sm:$0xff]  ;;  %v3182_v34 = vld [vmem:[%s6184_s7 + $0xc0] sm:$0xff] }
 0x257   : > { %v6248_v49 = vpop.permute.xlu1 %2689  ;;  %v6250_v50 = vpop.permute.xlu0 %2684 }
 0x258   : > { %7386 = vst [vmem:[#allocation47_spill] sm:$0xff] %v6248_v49  ;;  %7387 = vst [vmem:[#allocation48_spill] sm:$0xff] %v6250_v50  ;;  %3393 = vperm.xlu1 %4719, %v3179_v18   ;;  %3388 = vperm.xlu0 %4718, %v3178_v1   ;;  %v3185_v18 = vld [vmem:[%s6184_s7 + $0xd8] sm:$0xff]  ;;  %v3184_v1 = vld [vmem:[%s6184_s7 + $0xd0] sm:$0xff] }
 0x25b   : > { %v6254_v41 = vpop.permute.xlu1 %2699  ;;  %v6256_v2 = vpop.permute.xlu0 %2694 }
 0x25c   : > { %7388 = vst [vmem:[#allocation49_spill] sm:$0xff] %v6254_v41  ;;  %7389 = vst [vmem:[#allocation50_spill] sm:$0xff] %v6256_v2  ;;  %3403 = vperm.xlu1 %4719, %v3181_v58   ;;  %3398 = vperm.xlu0 %4718, %v3180_v17   ;;  %v3187_v58 = vld [vmem:[%s6184_s7 + $0xe8] sm:$0xff]  ;;  %v3186_v17 = vld [vmem:[%s6184_s7 + $0xe0] sm:$0xff] }
 0x25f   : > { %v6260_v57 = vpop.permute.xlu1 %2709  ;;  %v6262_v49 = vpop.permute.xlu0 %2704 }
 0x260   : > { %7390 = vst [vmem:[#allocation51_spill] sm:$0xff] %v6260_v57  ;;  %7391 = vst [vmem:[#allocation52_spill] sm:$0xff] %v6262_v49  ;;  %3413 = vperm.xlu1 %4719, %v3183_v33   ;;  %3408 = vperm.xlu0 %4718, %v3182_v34   ;;  %v3189_v33 = vld [vmem:[%s6184_s7 + $0xf8] sm:$0xff]  ;;  %v3188_v34 = vld [vmem:[%s6184_s7 + $0xf0] sm:$0xff] }
 0x263   : > { %v6266_v50 = vpop.permute.xlu1 %2719  ;;  %v6268_v41 = vpop.permute.xlu0 %2714 }
 0x264   : > { %7392 = vst [vmem:[#allocation53_spill] sm:$0xff] %v6266_v50  ;;  %7393 = vst [vmem:[#allocation54_spill] sm:$0xff] %v6268_v41  ;;  %3423 = vperm.xlu1 %4719, %v3185_v18   ;;  %3418 = vperm.xlu0 %4718, %v3184_v1   ;;  %v3191_v18 = vld [vmem:[%s6184_s7 + $0x108] sm:$0xff]  ;;  %v3190_v1 = vld [vmem:[%s6184_s7 + $0x100] sm:$0xff] }
 0x267   : > { %v6272_v2 = vpop.permute.xlu1 %2729  ;;  %v6274_v57 = vpop.permute.xlu0 %2724 }
 0x268   : > { %7394 = vst [vmem:[#allocation55_spill] sm:$0xff] %v6272_v2  ;;  %7395 = vst [vmem:[#allocation56_spill] sm:$0xff] %v6274_v57  ;;  %3433 = vperm.xlu1 %4719, %v3187_v58   ;;  %3428 = vperm.xlu0 %4718, %v3186_v17   ;;  %v3193_v58 = vld [vmem:[%s6184_s7 + $0x118] sm:$0xff]  ;;  %v3192_v17 = vld [vmem:[%s6184_s7 + $0x110] sm:$0xff] }
 0x26b   : > { %v6278_v49 = vpop.permute.xlu1 %2739  ;;  %v6280_v50 = vpop.permute.xlu0 %2734 }
 0x26c   : > { %7396 = vst [vmem:[#allocation57_spill] sm:$0xff] %v6278_v49  ;;  %7397 = vst [vmem:[#allocation58_spill] sm:$0xff] %v6280_v50  ;;  %3443 = vperm.xlu1 %4719, %v3189_v33   ;;  %3438 = vperm.xlu0 %4718, %v3188_v34   ;;  %v3195_v33 = vld [vmem:[%s6184_s7 + $0x128] sm:$0xff]  ;;  %v3194_v34 = vld [vmem:[%s6184_s7 + $0x120] sm:$0xff] }
 0x26f   : > { %v6284_v41 = vpop.permute.xlu1 %2749  ;;  %v6286_v2 = vpop.permute.xlu0 %2744 }
 0x270   : > { %7398 = vst [vmem:[#allocation59_spill] sm:$0xff] %v6284_v41  ;;  %7399 = vst [vmem:[#allocation60_spill] sm:$0xff] %v6286_v2  ;;  %3453 = vperm.xlu1 %4719, %v3191_v18   ;;  %3448 = vperm.xlu0 %4718, %v3190_v1   ;;  %v3197_v18 = vld [vmem:[%s6184_s7 + $0x138] sm:$0xff]  ;;  %v3196_v1 = vld [vmem:[%s6184_s7 + $0x130] sm:$0xff] }
 0x273   : > { %v6290_v57 = vpop.permute.xlu1 %2759  ;;  %v6292_v49 = vpop.permute.xlu0 %2754 }
 0x274   : > { %7400 = vst [vmem:[#allocation61_spill] sm:$0xff] %v6290_v57  ;;  %7401 = vst [vmem:[#allocation62_spill] sm:$0xff] %v6292_v49  ;;  %3463 = vperm.xlu1 %4719, %v3193_v58   ;;  %3458 = vperm.xlu0 %4718, %v3192_v17   ;;  %v3199_v58 = vld [vmem:[%s6184_s7 + $0x148] sm:$0xff]  ;;  %v3198_v17 = vld [vmem:[%s6184_s7 + $0x140] sm:$0xff] }
 0x277   : > { %v6296_v50 = vpop.permute.xlu1 %2769  ;;  %v6298_v41 = vpop.permute.xlu0 %2764 }
 0x278   : > { %7402 = vst [vmem:[#allocation63_spill] sm:$0xff] %v6296_v50  ;;  %7403 = vst [vmem:[#allocation64_spill] sm:$0xff] %v6298_v41  ;;  %3473 = vperm.xlu1 %4719, %v3195_v33   ;;  %3468 = vperm.xlu0 %4718, %v3194_v34   ;;  %v3201_v33 = vld [vmem:[%s6184_s7 + $0x158] sm:$0xff]  ;;  %v3200_v34 = vld [vmem:[%s6184_s7 + $0x150] sm:$0xff] }
 0x27b   : > { %v6302_v2 = vpop.permute.xlu1 %2779  ;;  %v6304_v57 = vpop.permute.xlu0 %2774 }
 0x27c   : > { %7404 = vst [vmem:[#allocation65_spill] sm:$0xff] %v6302_v2  ;;  %7405 = vst [vmem:[#allocation66_spill] sm:$0xff] %v6304_v57  ;;  %3483 = vperm.xlu1 %4719, %v3197_v18   ;;  %3478 = vperm.xlu0 %4718, %v3196_v1   ;;  %v3203_v18 = vld [vmem:[%s6184_s7 + $0x168] sm:$0xff]  ;;  %v3202_v1 = vld [vmem:[%s6184_s7 + $0x160] sm:$0xff] }
 0x27f   : > { %v6308_v49 = vpop.permute.xlu1 %2789  ;;  %v6310_v50 = vpop.permute.xlu0 %2784 }
 0x280   : > { %7406 = vst [vmem:[#allocation67_spill] sm:$0xff] %v6308_v49  ;;  %7407 = vst [vmem:[#allocation68_spill] sm:$0xff] %v6310_v50  ;;  %3493 = vperm.xlu1 %4719, %v3199_v58   ;;  %3488 = vperm.xlu0 %4718, %v3198_v17   ;;  %v3205_v58 = vld [vmem:[%s6184_s7 + $0x178] sm:$0xff]  ;;  %v3204_v17 = vld [vmem:[%s6184_s7 + $0x170] sm:$0xff] }
 0x283   : > { %v6314_v41 = vpop.permute.xlu1 %2799  ;;  %v6316_v2 = vpop.permute.xlu0 %2794 }
 0x284   : > { %7408 = vst [vmem:[#allocation69_spill] sm:$0xff] %v6314_v41  ;;  %7409 = vst [vmem:[#allocation70_spill] sm:$0xff] %v6316_v2  ;;  %3503 = vperm.xlu1 %4719, %v3201_v33   ;;  %3498 = vperm.xlu0 %4718, %v3200_v34   ;;  %v3207_v33 = vld [vmem:[%s6184_s7 + $0x188] sm:$0xff]  ;;  %v3206_v34 = vld [vmem:[%s6184_s7 + $0x180] sm:$0xff] }
 0x287   : > { %v6320_v57 = vpop.permute.xlu1 %2809  ;;  %v6322_v49 = vpop.permute.xlu0 %2804 }
 0x288   : > { %7410 = vst [vmem:[#allocation71_spill] sm:$0xff] %v6320_v57  ;;  %7411 = vst [vmem:[#allocation72_spill] sm:$0xff] %v6322_v49  ;;  %3513 = vperm.xlu1 %4719, %v3203_v18   ;;  %3508 = vperm.xlu0 %4718, %v3202_v1   ;;  %v3209_v18 = vld [vmem:[%s6184_s7 + $0x198] sm:$0xff]  ;;  %v3208_v1 = vld [vmem:[%s6184_s7 + $0x190] sm:$0xff] }
 0x28b   : > { %v6326_v50 = vpop.permute.xlu1 %2819  ;;  %v6328_v41 = vpop.permute.xlu0 %2814 }
 0x28c   : > { %7412 = vst [vmem:[#allocation73_spill] sm:$0xff] %v6326_v50  ;;  %7413 = vst [vmem:[#allocation74_spill] sm:$0xff] %v6328_v41  ;;  %3523 = vperm.xlu1 %4719, %v3205_v58   ;;  %3518 = vperm.xlu0 %4718, %v3204_v17   ;;  %v3211_v58 = vld [vmem:[%s6184_s7 + $0x1a8] sm:$0xff]  ;;  %v3210_v17 = vld [vmem:[%s6184_s7 + $0x1a0] sm:$0xff] }
 0x28f   : > { %v6332_v2 = vpop.permute.xlu1 %2829  ;;  %v6334_v57 = vpop.permute.xlu0 %2824 }
 0x290   : > { %7414 = vst [vmem:[#allocation75_spill] sm:$0xff] %v6332_v2  ;;  %7415 = vst [vmem:[#allocation76_spill] sm:$0xff] %v6334_v57  ;;  %3533 = vperm.xlu1 %4719, %v3207_v33   ;;  %3528 = vperm.xlu0 %4718, %v3206_v34   ;;  %v3213_v33 = vld [vmem:[%s6184_s7 + $0x1b8] sm:$0xff]  ;;  %v3212_v34 = vld [vmem:[%s6184_s7 + $0x1b0] sm:$0xff] }
 0x293   : > { %v6338_v49 = vpop.permute.xlu1 %2839  ;;  %v6340_v50 = vpop.permute.xlu0 %2834 }
 0x294   : > { %7416 = vst [vmem:[#allocation77_spill] sm:$0xff] %v6338_v49  ;;  %7417 = vst [vmem:[#allocation78_spill] sm:$0xff] %v6340_v50  ;;  %3543 = vperm.xlu1 %4719, %v3209_v18   ;;  %3538 = vperm.xlu0 %4718, %v3208_v1   ;;  %v3215_v18 = vld [vmem:[%s6184_s7 + $0x1c8] sm:$0xff]  ;;  %v3214_v1 = vld [vmem:[%s6184_s7 + $0x1c0] sm:$0xff] }
 0x297   : > { %v6344_v41 = vpop.permute.xlu1 %2849  ;;  %v6346_v2 = vpop.permute.xlu0 %2844 }
 0x298   : > { %7418 = vst [vmem:[#allocation79_spill] sm:$0xff] %v6344_v41  ;;  %7419 = vst [vmem:[#allocation80_spill] sm:$0xff] %v6346_v2  ;;  %3553 = vperm.xlu1 %4719, %v3211_v58   ;;  %3548 = vperm.xlu0 %4718, %v3210_v17   ;;  %v3217_v58 = vld [vmem:[%s6184_s7 + $0x1d8] sm:$0xff]  ;;  %v3216_v17 = vld [vmem:[%s6184_s7 + $0x1d0] sm:$0xff] }
 0x29b   : > { %v6350_v57 = vpop.permute.xlu1 %2859  ;;  %v6352_v49 = vpop.permute.xlu0 %2854 }
 0x29c   : > { %7420 = vst [vmem:[#allocation81_spill] sm:$0xff] %v6350_v57  ;;  %7421 = vst [vmem:[#allocation82_spill] sm:$0xff] %v6352_v49  ;;  %3563 = vperm.xlu1 %4719, %v3213_v33   ;;  %3558 = vperm.xlu0 %4718, %v3212_v34   ;;  %v3219_v33 = vld [vmem:[%s6184_s7 + $0x1e8] sm:$0xff]  ;;  %v3218_v34 = vld [vmem:[%s6184_s7 + $0x1e0] sm:$0xff] }
 0x29f   : > { %v6356_v41 = vpop.permute.xlu1 %2869  ;;  %v6358_v50 = vpop.permute.xlu0 %2864 }
 0x2a0   : > { %7422 = vst [vmem:[#allocation83_spill] sm:$0xff] %v6356_v41  ;;  %7423 = vst [vmem:[#allocation84_spill] sm:$0xff] %v6358_v50  ;;  %3573 = vperm.xlu1 %4719, %v3215_v18   ;;  %3568 = vperm.xlu0 %4718, %v3214_v1   ;;  %v3221_v18 = vld [vmem:[%s6184_s7 + $0x1f8] sm:$0xff]  ;;  %v3220_v1 = vld [vmem:[%s6184_s7 + $0x1f0] sm:$0xff] }
 0x2a3   : > { %v6362_v57 = vpop.permute.xlu1 %2879  ;;  %v6364_v49 = vpop.permute.xlu0 %2874 }
 0x2a4   : > { %7424 = vst [vmem:[#allocation85_spill] sm:$0xff] %v6362_v57  ;;  %7425 = vst [vmem:[#allocation86_spill] sm:$0xff] %v6364_v49  ;;  %3583 = vperm.xlu1 %4719, %v3217_v58   ;;  %3578 = vperm.xlu0 %4718, %v3216_v17   ;;  %v1880_v58 = vld [vmem:[%s6377_s9 + $0x10] sm:$0xff]  ;;  %v1881_v17 = vld [vmem:[%s6377_s9 + $0x18] sm:$0xff] }
 0x2a5   : > { %v3223_v49 = vld [vmem:[%s6184_s7 + $0x208] sm:$0xff]  ;;  %v2904_v57 = vmul.f32 %v6000_v8, %v1880_v58  ;;  %v2905_v2 = vmul.f32 %v6000_v8, %v1881_v17 }
 0x2a7   : > { %v6369_v41 = vpop.permute.xlu1 %2889  ;;  %v6371_v50 = vpop.permute.xlu0 %2884 }
 0x2a8   : > { %7426 = vst [vmem:[#allocation87_spill] sm:$0xff] %v6369_v41  ;;  %7427 = vst [vmem:[#allocation88_spill] sm:$0xff] %v6371_v50  ;;  %3593 = vperm.xlu1 %4719, %v3219_v33   ;;  %3588 = vperm.xlu0 %4718, %v3218_v34   ;;  %v1878_v33 = vld [vmem:[%s6377_s9] sm:$0xff]  ;;  %v1879_v50 = vld [vmem:[%s6377_s9 + $0x8] sm:$0xff] }
 0x2a9   : > { %v2902_v26 = vmul.f32 %v5994_v4, %v1878_v33  ;;  %v2903_v25 = vmul.f32 %v5994_v4, %v1879_v50  ;;  %v3225_v33 = vld [vmem:[%s6184_s7 + $0x218] sm:$0xff]  ;;  %v2909_v50 = vmul.f32 %v5998_v7, %v1885_v10  ;;  %v1886_v10 = vld [vmem:[%s6377_s9 + $0x40] sm:$0xff] }
 0x2ab   : > { %v6381_v41 = vpop.permute.xlu1 %2899  ;;  %v6385_v34 = vpop.permute.xlu0 %2894 }
 0x2ac   : > { %7428 = vst [vmem:[#allocation89_spill] sm:$0xff] %v6381_v41  ;;  %7429 = vst [vmem:[#allocation90_spill] sm:$0xff] %v6385_v34  ;;  %3603 = vperm.xlu1 %4719, %v3221_v18   ;;  %3598 = vperm.xlu0 %4718, %v3220_v1   ;;  %v1884_v41 = vld [vmem:[%s6377_s9 + $0x30] sm:$0xff]  ;;  %v1883_v34 = vld [vmem:[%s6377_s9 + $0x28] sm:$0xff] }
 0x2ad   : > { %v2908_v4 = vmul.f32 %v5998_v7, %v1884_v41  ;;  %v1887_v41 = vld [vmem:[%s6377_s9 + $0x48] sm:$0xff] }
 0x2af   : > { %v3294_v9 = vpop.permute.xlu1 %3293  ;;  %v3289_v58 = vpop.permute.xlu0 %3288 }
 0x2b0   : > { %v3928_v18 = vadd.f32 %v3294_v9, %v2904_v57  ;;  %v3929_v1 = vadd.f32 %v3294_v9, %v2905_v2  ;;  %3613 = vperm.xlu1 %4719, %v3223_v49   ;;  %v3926_v8 = vadd.f32 %v3289_v58, %v2902_v26  ;;  %v3927_v17 = vadd.f32 %v3289_v58, %v2903_v25  ;;  %v3224_v9 = vld [vmem:[%s6184_s7 + $0x210] sm:$0xff]  ;;  %v1889_v57 = vld [vmem:[%s6377_s9 + $0x58] sm:$0xff] }
 0x2b1   : > { %3608 = vperm.xlu0 %4718, %v3222_v42   ;;  %v2906_v25 = vmul.f32 %v5992_v3, %v1882_v62  ;;  %v2907_v26 = vmul.f32 %v5992_v3, %v1883_v34  ;;  %v1888_v42 = vld [vmem:[%s6377_s9 + $0x50] sm:$0xff]  ;;  %v3227_v34 = vld [vmem:[%s6184_s7 + $0x228] sm:$0xff]  ;;  %v2913_v58 = vmul.f32 %v6004_v11, %v1889_v57 }
 0x2b2   : > { %4184 = vst [vmem:[%s6402_s10 + $0x10] sm:$0xff] %v3928_v18  ;;  %4185 = vst [vmem:[%s6402_s10 + $0x18] sm:$0xff] %v3929_v1  ;;  %v2912_v1 = vmul.f32 %v6004_v11, %v1888_v42 }
 0x2b3   : > { %4182 = vst [vmem:[%s6402_s10] sm:$0xff] %v3926_v8  ;;  %4183 = vst [vmem:[%s6402_s10 + $0x8] sm:$0xff] %v3927_v17  ;;  %v3304_v7 = vpop.permute.xlu1 %3303  ;;  %v3299_v18 = vpop.permute.xlu0 %3298  ;;  %v3226_v8 = vld [vmem:[%s6184_s7 + $0x220] sm:$0xff]  ;;  %v2910_v17 = vmul.f32 %v6006_v12, %v1886_v10  ;;  %v3229_v10 = vld [vmem:[%s6184_s7 + $0x238] sm:$0xff] }
 0x2b4   : > { %v3932_v2 = vadd.f32 %v3304_v7, %v2908_v4  ;;  %v3933_v49 = vadd.f32 %v3304_v7, %v2909_v50  ;;  %3623 = vperm.xlu1 %4719, %v3225_v33   ;;  %v3930_v62 = vadd.f32 %v3299_v18, %v2906_v25  ;;  %v3931_v3 = vadd.f32 %v3299_v18, %v2907_v26  ;;  %v1892_v50 = vld [vmem:[%s6377_s9 + $0x70] sm:$0xff]  ;;  %v1893_v33 = vld [vmem:[%s6377_s9 + $0x78] sm:$0xff]  ;;  %v1890_v25 = vld [vmem:[%s6377_s9 + $0x60] sm:$0xff] }
 0x2b5   : > { %3618 = vperm.xlu0 %4718, %v3224_v9   ;;  %v2911_v4 = vmul.f32 %v6006_v12, %v1887_v41  ;;  %v1891_v26 = vld [vmem:[%s6377_s9 + $0x68] sm:$0xff]  ;;  %v2916_v41 = vmul.f32 %v6010_v15, %v1892_v50  ;;  %v2914_v18 = vmul.f32 %v6012_v16, %v1890_v25 }
 0x2b6   : > { %4188 = vst [vmem:[%s6402_s10 + $0x30] sm:$0xff] %v3932_v2  ;;  %4189 = vst [vmem:[%s6402_s10 + $0x38] sm:$0xff] %v3933_v49  ;;  %v2917_v2 = vmul.f32 %v6010_v15, %v1893_v33  ;;  %v3228_v49 = vld [vmem:[%s6184_s7 + $0x230] sm:$0xff]  ;;  %v3231_v33 = vld [vmem:[%s6184_s7 + $0x248] sm:$0xff] }
 0x2b7   : > { %4186 = vst [vmem:[%s6402_s10 + $0x20] sm:$0xff] %v3930_v62  ;;  %4187 = vst [vmem:[%s6402_s10 + $0x28] sm:$0xff] %v3931_v3  ;;  %v3314_v9 = vpop.permute.xlu1 %3313  ;;  %v3309_v57 = vpop.permute.xlu0 %3308  ;;  %v2915_v62 = vmul.f32 %v6012_v16, %v1891_v26  ;;  %v1896_v3 = vld [vmem:[%s6377_s9 + $0x90] sm:$0xff]  ;;  %v3230_v26 = vld [vmem:[%s6184_s7 + $0x240] sm:$0xff] }
 0x2b8   : > { %v3936_v11 = vadd.f32 %v3314_v9, %v2912_v1  ;;  %v3937_v42 = vadd.f32 %v3314_v9, %v2913_v58  ;;  %3633 = vperm.xlu1 %4719, %v3227_v34   ;;  %v3934_v7 = vadd.f32 %v3309_v57, %v2910_v17  ;;  %v3935_v12 = vadd.f32 %v3309_v57, %v2911_v4  ;;  %v1897_v34 = vld [vmem:[%s6377_s9 + $0x98] sm:$0xff]  ;;  %v1894_v58 = vld [vmem:[%s6377_s9 + $0x80] sm:$0xff]  ;;  %v1900_v57 = vld [vmem:[%s6377_s9 + $0xb0] sm:$0xff] }
 0x2b9   : > { %3628 = vperm.xlu0 %4718, %v3226_v8   ;;  %v1895_v8 = vld [vmem:[%s6377_s9 + $0x88] sm:$0xff]  ;;  %v2920_v9 = vmul.f32 %v6016_v19, %v1896_v3  ;;  %v2921_v25 = vmul.f32 %v6016_v19, %v1897_v34  ;;  %v2924_v3 = vmul.f32 %v6022_v23, %v1900_v57  ;;  %v3234_v57 = vld [vmem:[%s6184_s7 + $0x260] sm:$0xff] }
 0x2ba   : > { %4192 = vst [vmem:[%s6402_s10 + $0x50] sm:$0xff] %v3936_v11  ;;  %4193 = vst [vmem:[%s6402_s10 + $0x58] sm:$0xff] %v3937_v42  ;;  %v2918_v11 = vmul.f32 %v6018_v20, %v1894_v58  ;;  %v2919_v42 = vmul.f32 %v6018_v20, %v1895_v8 }
 0x2bb   : > { %4190 = vst [vmem:[%s6402_s10 + $0x40] sm:$0xff] %v3934_v7  ;;  %4191 = vst [vmem:[%s6402_s10 + $0x48] sm:$0xff] %v3935_v12  ;;  %v3324_v1 = vpop.permute.xlu1 %3323  ;;  %v3319_v4 = vpop.permute.xlu0 %3318  ;;  %v1901_v7 = vld [vmem:[%s6377_s9 + $0xb8] sm:$0xff] }
 0x2bc   : > { %v3940_v15 = vadd.f32 %v3324_v1, %v2916_v41  ;;  %v3941_v17 = vadd.f32 %v3324_v1, %v2917_v2  ;;  %3643 = vperm.xlu1 %4719, %v3229_v10   ;;  %v3938_v50 = vadd.f32 %v3319_v4, %v2914_v18  ;;  %v3939_v16 = vadd.f32 %v3319_v4, %v2915_v62  ;;  %v1898_v10 = vld [vmem:[%s6377_s9 + $0xa0] sm:$0xff]  ;;  %v1899_v41 = vld [vmem:[%s6377_s9 + $0xa8] sm:$0xff]  ;;  %v3233_v62 = vld [vmem:[%s6184_s7 + $0x258] sm:$0xff] }
 0x2bd   : > { %3638 = vperm.xlu0 %4718, %v3228_v49   ;;  %v2925_v34 = vmul.f32 %v6022_v23, %v1901_v7  ;;  %v3232_v1 = vld [vmem:[%s6184_s7 + $0x250] sm:$0xff]  ;;  %v2922_v58 = vmul.f32 %v6024_v24, %v1898_v10  ;;  %v2923_v8 = vmul.f32 %v6024_v24, %v1899_v41  ;;  %v1909_v41 = vld [vmem:[%s6377_s9 + $0xf8] sm:$0xff] }
 0x2be   : > { %4196 = vst [vmem:[%s6402_s10 + $0x70] sm:$0xff] %v3940_v15  ;;  %4197 = vst [vmem:[%s6402_s10 + $0x78] sm:$0xff] %v3941_v17  ;;  %v1904_v15 = vld [vmem:[%s6377_s9 + $0xd0] sm:$0xff]  ;;  %v1905_v17 = vld [vmem:[%s6377_s9 + $0xd8] sm:$0xff] }
 0x2bf   : > { %4194 = vst [vmem:[%s6402_s10 + $0x60] sm:$0xff] %v3938_v50  ;;  %4195 = vst [vmem:[%s6402_s10 + $0x68] sm:$0xff] %v3939_v16  ;;  %v3334_v12 = vpop.permute.xlu1 %3333  ;;  %v3329_v49 = vpop.permute.xlu0 %3328  ;;  %v1902_v50 = vld [vmem:[%s6377_s9 + $0xc0] sm:$0xff]  ;;  %v1903_v16 = vld [vmem:[%s6377_s9 + $0xc8] sm:$0xff] }
 0x2c0   : > { %v3944_v19 = vadd.f32 %v3334_v12, %v2920_v9  ;;  %v3945_v2 = vadd.f32 %v3334_v12, %v2921_v25  ;;  %3653 = vperm.xlu1 %4719, %v3231_v33   ;;  %v3942_v18 = vadd.f32 %v3329_v49, %v2918_v11  ;;  %v3943_v20 = vadd.f32 %v3329_v49, %v2919_v42  ;;  %v1908_v10 = vld [vmem:[%s6377_s9 + $0xf0] sm:$0xff]  ;;  %v1907_v49 = vld [vmem:[%s6377_s9 + $0xe8] sm:$0xff] }
 0x2c1   : > { %3648 = vperm.xlu0 %4718, %v3230_v26   ;;  %v3235_v26 = vld [vmem:[%s6184_s7 + $0x268] sm:$0xff]  ;;  %v2928_v11 = vmul.f32 %v6028_v27, %v1904_v15  ;;  %v2929_v42 = vmul.f32 %v6028_v27, %v1905_v17  ;;  %v2926_v7 = vmul.f32 %v6030_v28, %v1902_v50  ;;  %v2927_v12 = vmul.f32 %v6030_v28, %v1903_v16  ;;  %v1912_v17 = vld [vmem:[%s6377_s9 + $0x110] sm:$0xff]  ;;  %v1910_v16 = vld [vmem:[%s6377_s9 + $0x100] sm:$0xff] }
 0x2c2   : > { %4200 = vst [vmem:[%s6402_s10 + $0x90] sm:$0xff] %v3944_v19  ;;  %4201 = vst [vmem:[%s6402_s10 + $0x98] sm:$0xff] %v3945_v2  ;;  %v1906_v2 = vld [vmem:[%s6377_s9 + $0xe0] sm:$0xff]  ;;  %v2931_v15 = vmul.f32 %v6036_v32, %v1907_v49 }
 0x2c3   : > { %4198 = vst [vmem:[%s6402_s10 + $0x80] sm:$0xff] %v3942_v18  ;;  %4199 = vst [vmem:[%s6402_s10 + $0x88] sm:$0xff] %v3943_v20  ;;  %v3344_v4 = vpop.permute.xlu1 %3343  ;;  %v3339_v9 = vpop.permute.xlu0 %3338 }
 0x2c4   : > { %v3948_v23 = vadd.f32 %v3344_v4, %v2924_v3  ;;  %v3949_v33 = vadd.f32 %v3344_v4, %v2925_v34  ;;  %3663 = vperm.xlu1 %4719, %v3233_v62   ;;  %v3946_v25 = vadd.f32 %v3339_v9, %v2922_v58  ;;  %v3947_v24 = vadd.f32 %v3339_v9, %v2923_v8  ;;  %v3237_v3 = vld [vmem:[%s6184_s7 + $0x278] sm:$0xff]  ;;  %v3236_v58 = vld [vmem:[%s6184_s7 + $0x270] sm:$0xff] }
 0x2c5   : > { %3658 = vperm.xlu0 %4718, %v3232_v1   ;;  %v2932_v34 = vmul.f32 %v6034_v31, %v1908_v10  ;;  %v2933_v1 = vmul.f32 %v6034_v31, %v1909_v41  ;;  %v2930_v8 = vmul.f32 %v6036_v32, %v1906_v2  ;;  %v1913_v4 = vld [vmem:[%s6377_s9 + $0x118] sm:$0xff]  ;;  %v1915_v2 = vld [vmem:[%s6377_s9 + $0x128] sm:$0xff] }
 0x2c6   : > { %4204 = vst [vmem:[%s6402_s10 + $0xb0] sm:$0xff] %v3948_v23  ;;  %4205 = vst [vmem:[%s6402_s10 + $0xb8] sm:$0xff] %v3949_v33  ;;  %v1911_v23 = vld [vmem:[%s6377_s9 + $0x108] sm:$0xff]  ;;  %v1917_v10 = vld [vmem:[%s6377_s9 + $0x138] sm:$0xff] }
 0x2c7   : > { %4202 = vst [vmem:[%s6402_s10 + $0xa0] sm:$0xff] %v3946_v25  ;;  %4203 = vst [vmem:[%s6402_s10 + $0xa8] sm:$0xff] %v3947_v24  ;;  %v3354_v19 = vpop.permute.xlu1 %3353  ;;  %v3349_v20 = vpop.permute.xlu0 %3348  ;;  %v3239_v24 = vld [vmem:[%s6184_s7 + $0x288] sm:$0xff] }
 0x2c8   : > { %v3952_v27 = vadd.f32 %v3354_v19, %v2928_v11  ;;  %v3953_v18 = vadd.f32 %v3354_v19, %v2929_v42  ;;  %3673 = vperm.xlu1 %4719, %v3235_v26   ;;  %v3950_v62 = vadd.f32 %v3349_v20, %v2926_v7  ;;  %v3951_v28 = vadd.f32 %v3349_v20, %v2927_v12  ;;  %v3238_v42 = vld [vmem:[%s6184_s7 + $0x280] sm:$0xff]  ;;  %v1916_v12 = vld [vmem:[%s6377_s9 + $0x130] sm:$0xff]  ;;  %v3241_v20 = vld [vmem:[%s6184_s7 + $0x298] sm:$0xff] }
 0x2c9   : > { %3668 = vperm.xlu0 %4718, %v3234_v57   ;;  %v2936_v26 = vmul.f32 %v6040_v35, %v1912_v17  ;;  %v2937_v11 = vmul.f32 %v6040_v35, %v1913_v4  ;;  %v2934_v57 = vmul.f32 %v6042_v36, %v1910_v16  ;;  %v2935_v7 = vmul.f32 %v6042_v36, %v1911_v23  ;;  %v1914_v19 = vld [vmem:[%s6377_s9 + $0x120] sm:$0xff]  ;;  %v1919_v4 = vld [vmem:[%s6377_s9 + $0x148] sm:$0xff] }
 0x2ca   : > { %4208 = vst [vmem:[%s6402_s10 + $0xd0] sm:$0xff] %v3952_v27  ;;  %4209 = vst [vmem:[%s6402_s10 + $0xd8] sm:$0xff] %v3953_v18  ;;  %v1918_v17 = vld [vmem:[%s6377_s9 + $0x140] sm:$0xff] }
 0x2cb   : > { %4206 = vst [vmem:[%s6402_s10 + $0xc0] sm:$0xff] %v3950_v62  ;;  %4207 = vst [vmem:[%s6402_s10 + $0xc8] sm:$0xff] %v3951_v28  ;;  %v3364_v50 = vpop.permute.xlu1 %3363  ;;  %v3359_v9 = vpop.permute.xlu0 %3358  ;;  %v2940_v62 = vmul.f32 %v6046_v39, %v1916_v12  ;;  %v2941_v28 = vmul.f32 %v6046_v39, %v1917_v10 }
 0x2cc   : > { %v3956_v31 = vadd.f32 %v3364_v50, %v2932_v34  ;;  %v3957_v33 = vadd.f32 %v3364_v50, %v2933_v1  ;;  %3683 = vperm.xlu1 %4719, %v3237_v3   ;;  %v3954_v25 = vadd.f32 %v3359_v9, %v2930_v8  ;;  %v3955_v32 = vadd.f32 %v3359_v9, %v2931_v15  ;;  %v3240_v3 = vld [vmem:[%s6184_s7 + $0x290] sm:$0xff]  ;;  %v1921_v8 = vld [vmem:[%s6377_s9 + $0x158] sm:$0xff] }
 0x2cd   : > { %3678 = vperm.xlu0 %4718, %v3236_v58   ;;  %v2938_v34 = vmul.f32 %v6048_v40, %v1914_v19  ;;  %v2939_v1 = vmul.f32 %v6048_v40, %v1915_v2  ;;  %v1920_v58 = vld [vmem:[%s6377_s9 + $0x150] sm:$0xff]  ;;  %v2945_v9 = vmul.f32 %v6052_v43, %v1921_v8  ;;  %v3245_v19 = vld [vmem:[%s6184_s7 + $0x2b8] sm:$0xff]  ;;  %v3247_v8 = vld [vmem:[%s6184_s7 + $0x2c8] sm:$0xff] }
 0x2ce   : > { %4212 = vst [vmem:[%s6402_s10 + $0xf0] sm:$0xff] %v3956_v31  ;;  %4213 = vst [vmem:[%s6402_s10 + $0xf8] sm:$0xff] %v3957_v33  ;;  %v3243_v31 = vld [vmem:[%s6184_s7 + $0x2a8] sm:$0xff]  ;;  %v2944_v33 = vmul.f32 %v6052_v43, %v1920_v58 }
 0x2cf   : > { %4210 = vst [vmem:[%s6402_s10 + $0xe0] sm:$0xff] %v3954_v25  ;;  %4211 = vst [vmem:[%s6402_s10 + $0xe8] sm:$0xff] %v3955_v32  ;;  %v3374_v41 = vpop.permute.xlu1 %3373  ;;  %v3369_v27 = vpop.permute.xlu0 %3368  ;;  %v3242_v25 = vld [vmem:[%s6184_s7 + $0x2a0] sm:$0xff]  ;;  %v2942_v32 = vmul.f32 %v6054_v44, %v1918_v17 }
 0x2d0   : > { %v3960_v35 = vadd.f32 %v3374_v41, %v2936_v26  ;;  %v3961_v49 = vadd.f32 %v3374_v41, %v2937_v11  ;;  %3693 = vperm.xlu1 %4719, %v3239_v24   ;;  %v3958_v18 = vadd.f32 %v3369_v27, %v2934_v57  ;;  %v3959_v36 = vadd.f32 %v3369_v27, %v2935_v7  ;;  %v1924_v26 = vld [vmem:[%s6377_s9 + $0x170] sm:$0xff]  ;;  %v1925_v11 = vld [vmem:[%s6377_s9 + $0x178] sm:$0xff]  ;;  %v1922_v57 = vld [vmem:[%s6377_s9 + $0x160] sm:$0xff] }
 0x2d1   : > { %3688 = vperm.xlu0 %4718, %v3238_v42   ;;  %v2943_v24 = vmul.f32 %v6054_v44, %v1919_v4  ;;  %v1923_v7 = vld [vmem:[%s6377_s9 + $0x168] sm:$0xff]  ;;  %v2948_v2 = vmul.f32 %v6058_v47, %v1924_v26  ;;  %v2946_v27 = vmul.f32 %v6060_v48, %v1922_v57  ;;  %v3246_v4 = vld [vmem:[%s6184_s7 + $0x2c0] sm:$0xff] }
 0x2d2   : > { %4216 = vst [vmem:[%s6402_s10 + $0x110] sm:$0xff] %v3960_v35  ;;  %4217 = vst [vmem:[%s6402_s10 + $0x118] sm:$0xff] %v3961_v49  ;;  %v2949_v35 = vmul.f32 %v6058_v47, %v1925_v11  ;;  %v3244_v49 = vld [vmem:[%s6184_s7 + $0x2b0] sm:$0xff] }
 0x2d3   : > { %4214 = vst [vmem:[%s6402_s10 + $0x100] sm:$0xff] %v3958_v18  ;;  %4215 = vst [vmem:[%s6402_s10 + $0x108] sm:$0xff] %v3959_v36  ;;  %v3384_v15 = vpop.permute.xlu1 %3383  ;;  %v3379_v16 = vpop.permute.xlu0 %3378  ;;  %v2947_v18 = vmul.f32 %v6060_v48, %v1923_v7  ;;  %v1928_v36 = vld [vmem:[%s6377_s9 + $0x190] sm:$0xff] }
 0x2d4   : > { %v3964_v39 = vadd.f32 %v3384_v15, %v2940_v62  ;;  %v3965_v50 = vadd.f32 %v3384_v15, %v2941_v28  ;;  %3703 = vperm.xlu1 %4719, %v3241_v20   ;;  %v3962_v23 = vadd.f32 %v3379_v16, %v2938_v34  ;;  %v3963_v40 = vadd.f32 %v3379_v16, %v2939_v1  ;;  %v1929_v20 = vld [vmem:[%s6377_s9 + $0x198] sm:$0xff]  ;;  %v1926_v28 = vld [vmem:[%s6377_s9 + $0x180] sm:$0xff]  ;;  %v1932_v16 = vld [vmem:[%s6377_s9 + $0x1b0] sm:$0xff] }
 0x2d5   : > { %3698 = vperm.xlu0 %4718, %v3240_v3   ;;  %v1927_v3 = vld [vmem:[%s6377_s9 + $0x188] sm:$0xff]  ;;  %v2952_v15 = vmul.f32 %v6064_v51, %v1928_v36  ;;  %v2953_v17 = vmul.f32 %v6064_v51, %v1929_v20  ;;  %v2956_v26 = vmul.f32 %v6070_v55, %v1932_v16  ;;  %v3250_v36 = vld [vmem:[%s6184_s7 + $0x2e0] sm:$0xff] }
 0x2d6   : > { %4220 = vst [vmem:[%s6402_s10 + $0x130] sm:$0xff] %v3964_v39  ;;  %4221 = vst [vmem:[%s6402_s10 + $0x138] sm:$0xff] %v3965_v50  ;;  %v2950_v39 = vmul.f32 %v6066_v52, %v1926_v28  ;;  %v2951_v50 = vmul.f32 %v6066_v52, %v1927_v3  ;;  %v1940_v28 = vld [vmem:[%s6377_s9 + $0x1f0] sm:$0xff]  ;;  %v1941_v3 = vld [vmem:[%s6377_s9 + $0x1f8] sm:$0xff] }
 0x2d7   : > { %4218 = vst [vmem:[%s6402_s10 + $0x120] sm:$0xff] %v3962_v23  ;;  %4219 = vst [vmem:[%s6402_s10 + $0x128] sm:$0xff] %v3963_v40  ;;  %v3394_v42 = vpop.permute.xlu1 %3393  ;;  %v3389_v10 = vpop.permute.xlu0 %3388  ;;  %v1933_v23 = vld [vmem:[%s6377_s9 + $0x1b8] sm:$0xff] }
 0x2d8   : > { %v3968_v43 = vadd.f32 %v3394_v42, %v2944_v33  ;;  %v3969_v12 = vadd.f32 %v3394_v42, %v2945_v9  ;;  %3713 = vperm.xlu1 %4719, %v3243_v31   ;;  %v3966_v41 = vadd.f32 %v3389_v10, %v2942_v32  ;;  %v3967_v44 = vadd.f32 %v3389_v10, %v2943_v24  ;;  %v1930_v31 = vld [vmem:[%s6377_s9 + $0x1a0] sm:$0xff]  ;;  %v1931_v33 = vld [vmem:[%s6377_s9 + $0x1a8] sm:$0xff]  ;;  %v3249_v24 = vld [vmem:[%s6184_s7 + $0x2d8] sm:$0xff] }
 0x2d9   : > { %3708 = vperm.xlu0 %4718, %v3242_v25   ;;  %v2957_v11 = vmul.f32 %v6070_v55, %v1933_v23  ;;  %v3248_v42 = vld [vmem:[%s6184_s7 + $0x2d0] sm:$0xff]  ;;  %v2954_v57 = vmul.f32 %v6072_v56, %v1930_v31  ;;  %v2955_v7 = vmul.f32 %v6072_v56, %v1931_v33  ;;  %v1942_v33 = vld [vmem:[%s6377_s9 + $0x200] sm:$0xff] }
 0x2da   : > { %4224 = vst [vmem:[%s6402_s10 + $0x150] sm:$0xff] %v3968_v43  ;;  %4225 = vst [vmem:[%s6402_s10 + $0x158] sm:$0xff] %v3969_v12  ;;  %v1936_v43 = vld [vmem:[%s6377_s9 + $0x1d0] sm:$0xff]  ;;  %v1937_v12 = vld [vmem:[%s6377_s9 + $0x1d8] sm:$0xff] }
 0x2db   : > { %4222 = vst [vmem:[%s6402_s10 + $0x140] sm:$0xff] %v3966_v41  ;;  %4223 = vst [vmem:[%s6402_s10 + $0x148] sm:$0xff] %v3967_v44  ;;  %v3404_v62 = vpop.permute.xlu1 %3403  ;;  %v3399_v1 = vpop.permute.xlu0 %3398  ;;  %v1934_v41 = vld [vmem:[%s6377_s9 + $0x1c0] sm:$0xff]  ;;  %v1935_v44 = vld [vmem:[%s6377_s9 + $0x1c8] sm:$0xff] }
 0x2dc   : > { %v3972_v47 = vadd.f32 %v3404_v62, %v2948_v2  ;;  %v3973_v34 = vadd.f32 %v3404_v62, %v2949_v35  ;;  %3723 = vperm.xlu1 %4719, %v3245_v19   ;;  %v3970_v58 = vadd.f32 %v3399_v1, %v2946_v27  ;;  %v3971_v48 = vadd.f32 %v3399_v1, %v2947_v18  ;;  %v1939_v1 = vld [vmem:[%s6377_s9 + $0x1e8] sm:$0xff]  ;;  %v1944_v23 = vld [vmem:[%s6377_s9 + $0x210] sm:$0xff] }
 0x2dd   : > { %3718 = vperm.xlu0 %4718, %v3244_v49   ;;  %v3251_v49 = vld [vmem:[%s6184_s7 + $0x2e8] sm:$0xff]  ;;  %v2960_v27 = vmul.f32 %v6076_v59, %v1936_v43  ;;  %v2961_v18 = vmul.f32 %v6076_v59, %v1937_v12  ;;  %v2958_v20 = vmul.f32 %v6078_v60, %v1934_v41  ;;  %v2959_v62 = vmul.f32 %v6078_v60, %v1935_v44  ;;  %v1949_v43 = vld [vmem:[%s6377_s9 + $0x238] sm:$0xff] }
 0x2de   : > { %4228 = vst [vmem:[%s6402_s10 + $0x170] sm:$0xff] %v3972_v47  ;;  %4229 = vst [vmem:[%s6402_s10 + $0x178] sm:$0xff] %v3973_v34  ;;  %v1938_v34 = vld [vmem:[%s6377_s9 + $0x1e0] sm:$0xff]  ;;  %v2963_v16 = vmul.f32 %v6084_v0, %v1939_v1  ;;  %v1947_v41 = vld [vmem:[%s6377_s9 + $0x228] sm:$0xff] }
 0x2df   : > { %4226 = vst [vmem:[%s6402_s10 + $0x160] sm:$0xff] %v3970_v58  ;;  %4227 = vst [vmem:[%s6402_s10 + $0x168] sm:$0xff] %v3971_v48  ;;  %v3414_v40 = vpop.permute.xlu1 %3413  ;;  %v3409_v25 = vpop.permute.xlu0 %3408 }
 0x2e0   : > { %v3976_v51 = vadd.f32 %v3414_v40, %v2952_v15  ;;  %v3977_v9 = vadd.f32 %v3414_v40, %v2953_v17  ;;  %3733 = vperm.xlu1 %4719, %v3247_v8   ;;  %v3974_v32 = vadd.f32 %v3409_v25, %v2950_v39  ;;  %v3975_v52 = vadd.f32 %v3409_v25, %v2951_v50  ;;  %v3253_v15 = vld [vmem:[%s6184_s7 + $0x2f8] sm:$0xff]  ;;  %v3252_v39 = vld [vmem:[%s6184_s7 + $0x2f0] sm:$0xff] }
 0x2e1   : > { %3728 = vperm.xlu0 %4718, %v3246_v4   ;;  %v2964_v17 = vmul.f32 %v6082_v63, %v1940_v28  ;;  %v2965_v4 = vmul.f32 %v6082_v63, %v1941_v3  ;;  %v2962_v50 = vmul.f32 %v6084_v0, %v1938_v34  ;;  %v1945_v40 = vld [vmem:[%s6377_s9 + $0x218] sm:$0xff]  ;;  %v1950_v28 = vld [vmem:[%s6377_s9 + $0x240] sm:$0xff]  ;;  %v1951_v3 = vld [vmem:[%s6377_s9 + $0x248] sm:$0xff] }
 0x2e2   : > { %4232 = vst [vmem:[%s6402_s10 + $0x190] sm:$0xff] %v3976_v51  ;;  %4233 = vst [vmem:[%s6402_s10 + $0x198] sm:$0xff] %v3977_v9  ;;  %v1943_v51 = vld [vmem:[%s6377_s9 + $0x208] sm:$0xff] }
 0x2e3   : > { %4230 = vst [vmem:[%s6402_s10 + $0x180] sm:$0xff] %v3974_v32  ;;  %4231 = vst [vmem:[%s6402_s10 + $0x188] sm:$0xff] %v3975_v52  ;;  %v3424_v10 = vpop.permute.xlu1 %3423  ;;  %v3419_v2 = vpop.permute.xlu0 %3418  ;;  %v3255_v52 = vld [vmem:[%s6184_s7 + $0x308] sm:$0xff] }
 0x2e4   : > { %v3980_v55 = vadd.f32 %v3424_v10, %v2956_v26  ;;  %v3981_v19 = vadd.f32 %v3424_v10, %v2957_v11  ;;  %3743 = vperm.xlu1 %4719, %v3249_v24   ;;  %v3978_v35 = vadd.f32 %v3419_v2, %v2954_v57  ;;  %v3979_v56 = vadd.f32 %v3419_v2, %v2955_v7  ;;  %v3254_v11 = vld [vmem:[%s6184_s7 + $0x300] sm:$0xff]  ;;  %v1948_v7 = vld [vmem:[%s6377_s9 + $0x230] sm:$0xff]  ;;  %v3257_v2 = vld [vmem:[%s6184_s7 + $0x318] sm:$0xff] }
 0x2e5   : > { %3738 = vperm.xlu0 %4718, %v3248_v42   ;;  %v2968_v24 = vmul.f32 %v6088_v5, %v1944_v23  ;;  %v2969_v26 = vmul.f32 %v6088_v5, %v1945_v40  ;;  %v2966_v42 = vmul.f32 %v6090_v6, %v1942_v33  ;;  %v2967_v57 = vmul.f32 %v6090_v6, %v1943_v51  ;;  %v1946_v10 = vld [vmem:[%s6377_s9 + $0x220] sm:$0xff]  ;;  %v3261_v33 = vld [vmem:[%s6184_s7 + $0x338] sm:$0xff] }
 0x2e6   : > { %4236 = vst [vmem:[%s6402_s10 + $0x1b0] sm:$0xff] %v3980_v55  ;;  %4237 = vst [vmem:[%s6402_s10 + $0x1b8] sm:$0xff] %v3981_v19 }
 0x2e7   : > { %4234 = vst [vmem:[%s6402_s10 + $0x1a0] sm:$0xff] %v3978_v35  ;;  %4235 = vst [vmem:[%s6402_s10 + $0x1a8] sm:$0xff] %v3979_v56  ;;  %v3434_v47 = vpop.permute.xlu1 %3433  ;;  %v3429_v48 = vpop.permute.xlu0 %3428  ;;  %v2972_v35 = vmul.f32 %v6094_v13, %v1948_v7  ;;  %v2973_v56 = vmul.f32 %v6094_v13, %v1949_v43  ;;  %v3263_v43 = vld [vmem:[%s6184_s7 + $0x348] sm:$0xff] }
 0x2e8   : > { %v3984_v59 = vadd.f32 %v3434_v47, %v2960_v27  ;;  %v3985_v58 = vadd.f32 %v3434_v47, %v2961_v18  ;;  %3753 = vperm.xlu1 %4719, %v3251_v49   ;;  %v3982_v8 = vadd.f32 %v3429_v48, %v2958_v20  ;;  %v3983_v60 = vadd.f32 %v3429_v48, %v2959_v62  ;;  %v3256_v49 = vld [vmem:[%s6184_s7 + $0x310] sm:$0xff]  ;;  %v1953_v20 = vld [vmem:[%s6377_s9 + $0x258] sm:$0xff] }
 0x2e9   : > { %3748 = vperm.xlu0 %4718, %v3250_v36   ;;  %v2970_v27 = vmul.f32 %v6096_v14, %v1946_v10  ;;  %v2971_v18 = vmul.f32 %v6096_v14, %v1947_v41  ;;  %v1952_v36 = vld [vmem:[%s6377_s9 + $0x250] sm:$0xff]  ;;  %v2977_v48 = vmul.f32 %v6100_v21, %v1953_v20  ;;  %v3262_v41 = vld [vmem:[%s6184_s7 + $0x340] sm:$0xff] }
 0x2ea   : > { %4240 = vst [vmem:[%s6402_s10 + $0x1d0] sm:$0xff] %v3984_v59  ;;  %4241 = vst [vmem:[%s6402_s10 + $0x1d8] sm:$0xff] %v3985_v58  ;;  %v3259_v59 = vld [vmem:[%s6184_s7 + $0x328] sm:$0xff]  ;;  %v2976_v58 = vmul.f32 %v6100_v21, %v1952_v36 }
 0x2eb   : > { %4238 = vst [vmem:[%s6402_s10 + $0x1c0] sm:$0xff] %v3982_v8  ;;  %4239 = vst [vmem:[%s6402_s10 + $0x1c8] sm:$0xff] %v3983_v60  ;;  %v3444_v31 = vpop.permute.xlu1 %3443  ;;  %v3439_v25 = vpop.permute.xlu0 %3438  ;;  %v3258_v8 = vld [vmem:[%s6184_s7 + $0x320] sm:$0xff]  ;;  %v2974_v60 = vmul.f32 %v6102_v22, %v1950_v28 }
 0x2ec   : > { %v3988_v63 = vadd.f32 %v3444_v31, %v2964_v17  ;;  %v3989_v9 = vadd.f32 %v3444_v31, %v2965_v4  ;;  %3763 = vperm.xlu1 %4719, %v3253_v15   ;;  %v3986_v32 = vadd.f32 %v3439_v25, %v2962_v50  ;;  %v3987_v0 = vadd.f32 %v3439_v25, %v2963_v16  ;;  %v1956_v17 = vld [vmem:[%s6377_s9 + $0x270] sm:$0xff]  ;;  %v1957_v4 = vld [vmem:[%s6377_s9 + $0x278] sm:$0xff]  ;;  %v1954_v50 = vld [vmem:[%s6377_s9 + $0x260] sm:$0xff] }
 0x2ed   : > { %3758 = vperm.xlu0 %4718, %v3252_v39   ;;  %v2975_v15 = vmul.f32 %v6102_v22, %v1951_v3  ;;  %v1955_v16 = vld [vmem:[%s6377_s9 + $0x268] sm:$0xff]  ;;  %v2980_v51 = vmul.f32 %v6106_v29, %v1956_v17  ;;  %v2978_v25 = vmul.f32 %v6108_v30, %v1954_v50  ;;  %v3266_v17 = vld [vmem:[%s6184_s7 + $0x360] sm:$0xff]  ;;  %v1972_v50 = vld [vmem:[%s6377_s9 + $0x2f0] sm:$0xff] }
 0x2ee   : > { %4244 = vst [vmem:[%s6402_s10 + $0x1f0] sm:$0xff] %v3988_v63  ;;  %4245 = vst [vmem:[%s6402_s10 + $0x1f8] sm:$0xff] %v3989_v9  ;;  %v2981_v63 = vmul.f32 %v6106_v29, %v1957_v4  ;;  %v3260_v9 = vld [vmem:[%s6184_s7 + $0x330] sm:$0xff] }
 0x2ef   : > { %4242 = vst [vmem:[%s6402_s10 + $0x1e0] sm:$0xff] %v3986_v32  ;;  %4243 = vst [vmem:[%s6402_s10 + $0x1e8] sm:$0xff] %v3987_v0  ;;  %v3454_v12 = vpop.permute.xlu1 %3453  ;;  %v3449_v55 = vpop.permute.xlu0 %3448  ;;  %v2979_v32 = vmul.f32 %v6108_v30, %v1955_v16  ;;  %v1960_v0 = vld [vmem:[%s6377_s9 + $0x290] sm:$0xff]  ;;  %v1973_v16 = vld [vmem:[%s6377_s9 + $0x2f8] sm:$0xff] }
 0x2f0   : > { %v3992_v5 = vadd.f32 %v3454_v12, %v2968_v24  ;;  %v3993_v44 = vadd.f32 %v3454_v12, %v2969_v26  ;;  %3773 = vperm.xlu1 %4719, %v3255_v52   ;;  %v3990_v19 = vadd.f32 %v3449_v55, %v2966_v42  ;;  %v3991_v6 = vadd.f32 %v3449_v55, %v2967_v57  ;;  %v1961_v52 = vld [vmem:[%s6377_s9 + $0x298] sm:$0xff]  ;;  %v1958_v26 = vld [vmem:[%s6377_s9 + $0x280] sm:$0xff]  ;;  %v1964_v55 = vld [vmem:[%s6377_s9 + $0x2b0] sm:$0xff] }
 0x2f1   : > { %3768 = vperm.xlu0 %4718, %v3254_v11   ;;  %v1959_v11 = vld [vmem:[%s6377_s9 + $0x288] sm:$0xff]  ;;  %v2984_v12 = vmul.f32 %v6112_v37, %v1960_v0  ;;  %v2985_v10 = vmul.f32 %v6112_v37, %v1961_v52  ;;  %v2988_v36 = vmul.f32 %v6118_v45, %v1964_v55  ;;  %v7432_v55 = vld [vmem:[#allocation12_spill] sm:$0xff] }
 0x2f2   : > { %4248 = vst [vmem:[%s6402_s10 + $0x210] sm:$0xff] %v3992_v5  ;;  %4249 = vst [vmem:[%s6402_s10 + $0x218] sm:$0xff] %v3993_v44  ;;  %v2982_v5 = vmul.f32 %v6114_v38, %v1958_v26  ;;  %v2983_v44 = vmul.f32 %v6114_v38, %v1959_v11  ;;  %v1977_v26 = vld [vmem:[%s6377_s9 + $0x318] sm:$0xff] }
 0x2f3   : > { %4246 = vst [vmem:[%s6402_s10 + $0x200] sm:$0xff] %v3990_v19  ;;  %4247 = vst [vmem:[%s6402_s10 + $0x208] sm:$0xff] %v3991_v6  ;;  %v3464_v62 = vpop.permute.xlu1 %3463  ;;  %v3459_v34 = vpop.permute.xlu0 %3458  ;;  %v1965_v19 = vld [vmem:[%s6377_s9 + $0x2b8] sm:$0xff] }
 0x2f4   : > { %v3996_v13 = vadd.f32 %v3464_v62, %v2972_v35  ;;  %v3997_v47 = vadd.f32 %v3464_v62, %v2973_v56  ;;  %3783 = vperm.xlu1 %4719, %v3257_v2   ;;  %v3994_v1 = vadd.f32 %v3459_v34, %v2970_v27  ;;  %v3995_v14 = vadd.f32 %v3459_v34, %v2971_v18  ;;  %v1962_v2 = vld [vmem:[%s6377_s9 + $0x2a0] sm:$0xff]  ;;  %v1963_v35 = vld [vmem:[%s6377_s9 + $0x2a8] sm:$0xff]  ;;  %v3265_v18 = vld [vmem:[%s6184_s7 + $0x358] sm:$0xff] }
 0x2f5   : > { %3778 = vperm.xlu0 %4718, %v3256_v49   ;;  %v2989_v20 = vmul.f32 %v6118_v45, %v1965_v19  ;;  %v3264_v62 = vld [vmem:[%s6184_s7 + $0x350] sm:$0xff]  ;;  %v2986_v28 = vmul.f32 %v6120_v46, %v1962_v2  ;;  %v2987_v3 = vmul.f32 %v6120_v46, %v1963_v35  ;;  %v1981_v35 = vld [vmem:[%s6377_s9 + $0x338] sm:$0xff] }
 0x2f6   : > { %4252 = vst [vmem:[%s6402_s10 + $0x230] sm:$0xff] %v3996_v13  ;;  %4253 = vst [vmem:[%s6402_s10 + $0x238] sm:$0xff] %v3997_v47  ;;  %v1968_v13 = vld [vmem:[%s6377_s9 + $0x2d0] sm:$0xff]  ;;  %v1969_v47 = vld [vmem:[%s6377_s9 + $0x2d8] sm:$0xff] }
 0x2f7   : > { %4250 = vst [vmem:[%s6402_s10 + $0x220] sm:$0xff] %v3994_v1  ;;  %4251 = vst [vmem:[%s6402_s10 + $0x228] sm:$0xff] %v3995_v14  ;;  %v3474_v39 = vpop.permute.xlu1 %3473  ;;  %v3469_v40 = vpop.permute.xlu0 %3468  ;;  %v1966_v1 = vld [vmem:[%s6377_s9 + $0x2c0] sm:$0xff]  ;;  %v1967_v14 = vld [vmem:[%s6377_s9 + $0x2c8] sm:$0xff] }
 0x2f8   : > { %v4000_v21 = vadd.f32 %v3474_v39, %v2976_v58  ;;  %v4001_v23 = vadd.f32 %v3474_v39, %v2977_v48  ;;  %3793 = vperm.xlu1 %4719, %v3259_v59   ;;  %v3998_v31 = vadd.f32 %v3469_v40, %v2974_v60  ;;  %v3999_v22 = vadd.f32 %v3469_v40, %v2975_v15  ;;  %v1971_v40 = vld [vmem:[%s6377_s9 + $0x2e8] sm:$0xff]  ;;  %v1980_v2 = vld [vmem:[%s6377_s9 + $0x330] sm:$0xff] }
 0x2f9   : > { %3788 = vperm.xlu0 %4718, %v3258_v8   ;;  %v3267_v8 = vld [vmem:[%s6184_s7 + $0x368] sm:$0xff]  ;;  %v2992_v60 = vmul.f32 %v6124_v53, %v1968_v13  ;;  %v2993_v15 = vmul.f32 %v6124_v53, %v1969_v47  ;;  %v2990_v4 = vmul.f32 %v6126_v54, %v1966_v1  ;;  %v2991_v39 = vmul.f32 %v6126_v54, %v1967_v14  ;;  %v3272_v47 = vld [vmem:[%s6184_s7 + $0x390] sm:$0xff] }
 0x2fa   : > { %4256 = vst [vmem:[%s6402_s10 + $0x250] sm:$0xff] %v4000_v21  ;;  %4257 = vst [vmem:[%s6402_s10 + $0x258] sm:$0xff] %v4001_v23  ;;  %v1970_v23 = vld [vmem:[%s6377_s9 + $0x2e0] sm:$0xff] }
 0x2fb   : > { %4254 = vst [vmem:[%s6402_s10 + $0x240] sm:$0xff] %v3998_v31  ;;  %4255 = vst [vmem:[%s6402_s10 + $0x248] sm:$0xff] %v3999_v22  ;;  %v3484_v24 = vpop.permute.xlu1 %3483  ;;  %v3479_v57 = vpop.permute.xlu0 %3478 }
 0x2fc   : > { %v4004_v29 = vadd.f32 %v3484_v24, %v2980_v51  ;;  %v4005_v42 = vadd.f32 %v3484_v24, %v2981_v63  ;;  %3803 = vperm.xlu1 %4719, %v3261_v33   ;;  %v4002_v7 = vadd.f32 %v3479_v57, %v2978_v25  ;;  %v4003_v30 = vadd.f32 %v3479_v57, %v2979_v32  ;;  %v3269_v51 = vld [vmem:[%s6184_s7 + $0x378] sm:$0xff]  ;;  %v3268_v25 = vld [vmem:[%s6184_s7 + $0x370] sm:$0xff]  ;;  %v7430_v32 = vld [vmem:[#allocation10_spill] sm:$0xff] }
 0x2fd   : > { %3798 = vperm.xlu0 %4718, %v3260_v9   ;;  %v2996_v63 = vmul.f32 %v6130_v61, %v1972_v50  ;;  %v2997_v9 = vmul.f32 %v6130_v61, %v1973_v16  ;;  %v2994_v0 = vmul.f32 %v7430_v32, %v1970_v23  ;;  %v2995_v52 = vmul.f32 %v7430_v32, %v1971_v40  ;;  %v1976_v24 = vld [vmem:[%s6377_s9 + $0x310] sm:$0xff]  ;;  %v7435_v50 = vld [vmem:[#allocation15_spill] sm:$0xff]  ;;  %v3274_v23 = vld [vmem:[%s6184_s7 + $0x3a0] sm:$0xff] }
 0x2fe   : > { %4260 = vst [vmem:[%s6402_s10 + $0x270] sm:$0xff] %v4004_v29  ;;  %4261 = vst [vmem:[%s6402_s10 + $0x278] sm:$0xff] %v4005_v42  ;;  %v1974_v29 = vld [vmem:[%s6377_s9 + $0x300] sm:$0xff]  ;;  %v1975_v42 = vld [vmem:[%s6377_s9 + $0x308] sm:$0xff] }
 0x2ff   : > { %4258 = vst [vmem:[%s6402_s10 + $0x260] sm:$0xff] %v4002_v7  ;;  %4259 = vst [vmem:[%s6402_s10 + $0x268] sm:$0xff] %v4003_v30  ;;  %v3494_v6 = vpop.permute.xlu1 %3493  ;;  %v3489_v49 = vpop.permute.xlu0 %3488  ;;  %v2998_v19 = vmul.f32 %v7432_v55, %v1974_v29  ;;  %v7436_v40 = vld [vmem:[#allocation16_spill] sm:$0xff] }
 0x300   : > { %v4008_v37 = vadd.f32 %v3494_v6, %v2984_v12  ;;  %v4009_v56 = vadd.f32 %v3494_v6, %v2985_v10  ;;  %3813 = vperm.xlu1 %4719, %v3263_v43   ;;  %v4006_v27 = vadd.f32 %v3489_v49, %v2982_v5  ;;  %v4007_v38 = vadd.f32 %v3489_v49, %v2983_v44  ;;  %v3271_v12 = vld [vmem:[%s6184_s7 + $0x388] sm:$0xff]  ;;  %v3270_v44 = vld [vmem:[%s6184_s7 + $0x380] sm:$0xff] }
 0x301   : > { %3808 = vperm.xlu0 %4718, %v3262_v41   ;;  %v7431_v10 = vld [vmem:[#allocation11_spill] sm:$0xff]  ;;  %v2999_v6 = vmul.f32 %v7432_v55, %v1975_v42  ;;  %v3276_v42 = vld [vmem:[%s6184_s7 + $0x3b0] sm:$0xff] }
 0x302   : > { %4264 = vst [vmem:[%s6402_s10 + $0x290] sm:$0xff] %v4008_v37  ;;  %4265 = vst [vmem:[%s6402_s10 + $0x298] sm:$0xff] %v4009_v56  ;;  %v3000_v41 = vmul.f32 %v7431_v10, %v1976_v24  ;;  %v3001_v5 = vmul.f32 %v7431_v10, %v1977_v26  ;;  %v1978_v56 = vld [vmem:[%s6377_s9 + $0x320] sm:$0xff]  ;;  %v1979_v49 = vld [vmem:[%s6377_s9 + $0x328] sm:$0xff] }
 0x303   : > { %4262 = vst [vmem:[%s6402_s10 + $0x280] sm:$0xff] %v4006_v27  ;;  %4263 = vst [vmem:[%s6402_s10 + $0x288] sm:$0xff] %v4007_v38  ;;  %v3504_v34 = vpop.permute.xlu1 %3503  ;;  %v3499_v58 = vpop.permute.xlu0 %3498  ;;  %v3277_v24 = vld [vmem:[%s6184_s7 + $0x3b8] sm:$0xff]  ;;  %v1990_v10 = vld [vmem:[%s6377_s9 + $0x380] sm:$0xff] }
 0x304   : > { %v4012_v45 = vadd.f32 %v3504_v34, %v2988_v36  ;;  %v4013_v59 = vadd.f32 %v3504_v34, %v2989_v20  ;;  %3823 = vperm.xlu1 %4719, %v3265_v18   ;;  %v4010_v48 = vadd.f32 %v3499_v58, %v2986_v28  ;;  %v4011_v46 = vadd.f32 %v3499_v58, %v2987_v3  ;;  %v7433_v28 = vld [vmem:[#allocation13_spill] sm:$0xff]  ;;  %v7434_v34 = vld [vmem:[#allocation14_spill] sm:$0xff] }
 0x305   : > { %3818 = vperm.xlu0 %4718, %v3264_v62   ;;  %v3273_v62 = vld [vmem:[%s6184_s7 + $0x398] sm:$0xff]  ;;  %v3004_v3 = vmul.f32 %v7433_v28, %v1980_v2  ;;  %v3005_v13 = vmul.f32 %v7433_v28, %v1981_v35  ;;  %v3002_v1 = vmul.f32 %v7434_v34, %v1978_v56  ;;  %v3003_v14 = vmul.f32 %v7434_v34, %v1979_v49  ;;  %v3279_v2 = vld [vmem:[%s6184_s7 + $0x3c8] sm:$0xff]  ;;  %v3278_v49 = vld [vmem:[%s6184_s7 + $0x3c0] sm:$0xff] }
 0x306   : > { %4268 = vst [vmem:[%s6402_s10 + $0x2b0] sm:$0xff] %v4012_v45  ;;  %4269 = vst [vmem:[%s6402_s10 + $0x2b8] sm:$0xff] %v4013_v59  ;;  %v1984_v45 = vld [vmem:[%s6377_s9 + $0x350] sm:$0xff]  ;;  %v1985_v59 = vld [vmem:[%s6377_s9 + $0x358] sm:$0xff] }
 0x307   : > { %4266 = vst [vmem:[%s6402_s10 + $0x2a0] sm:$0xff] %v4010_v48  ;;  %4267 = vst [vmem:[%s6402_s10 + $0x2a8] sm:$0xff] %v4011_v46  ;;  %v3514_v21 = vpop.permute.xlu1 %3513  ;;  %v3509_v22 = vpop.permute.xlu0 %3508  ;;  %v1982_v48 = vld [vmem:[%s6377_s9 + $0x340] sm:$0xff]  ;;  %v1983_v46 = vld [vmem:[%s6377_s9 + $0x348] sm:$0xff]  ;;  %v3008_v16 = vmul.f32 %v7435_v50, %v1984_v45 }
 0x308   : > { %v4016_v53 = vadd.f32 %v3514_v21, %v2992_v60  ;;  %v4017_v31 = vadd.f32 %v3514_v21, %v2993_v15  ;;  %3833 = vperm.xlu1 %4719, %v3267_v8   ;;  %v4014_v33 = vadd.f32 %v3509_v22, %v2990_v4  ;;  %v4015_v54 = vadd.f32 %v3509_v22, %v2991_v39  ;;  %v3275_v39 = vld [vmem:[%s6184_s7 + $0x3a8] sm:$0xff]  ;;  %v1988_v22 = vld [vmem:[%s6377_s9 + $0x370] sm:$0xff]  ;;  %v7437_v26 = vld [vmem:[#allocation17_spill] sm:$0xff] }
 0x309   : > { %3828 = vperm.xlu0 %4718, %v3266_v17   ;;  %v3009_v21 = vmul.f32 %v7435_v50, %v1985_v59  ;;  %v7439_v35 = vld [vmem:[#allocation19_spill] sm:$0xff]  ;;  %v1994_v28 = vld [vmem:[%s6377_s9 + $0x3a0] sm:$0xff]  ;;  %v3281_v45 = vld [vmem:[%s6184_s7 + $0x3d8] sm:$0xff] }
 0x30a   : > { %4272 = vst [vmem:[%s6402_s10 + $0x2d0] sm:$0xff] %v4016_v53  ;;  %4273 = vst [vmem:[%s6402_s10 + $0x2d8] sm:$0xff] %v4017_v31  ;;  %v3006_v53 = vmul.f32 %v7436_v40, %v1982_v48  ;;  %v3007_v31 = vmul.f32 %v7436_v40, %v1983_v46  ;;  %v7441_v59 = vld [vmem:[#allocation21_spill] sm:$0xff]  ;;  %v3280_v46 = vld [vmem:[%s6184_s7 + $0x3d0] sm:$0xff] }
 0x30b   : > { %4270 = vst [vmem:[%s6402_s10 + $0x2c0] sm:$0xff] %v4014_v33  ;;  %4271 = vst [vmem:[%s6402_s10 + $0x2c8] sm:$0xff] %v4015_v54  ;;  %v3524_v11 = vpop.permute.xlu1 %3523  ;;  %v3519_v7 = vpop.permute.xlu0 %3518  ;;  %v1989_v33 = vld [vmem:[%s6377_s9 + $0x378] sm:$0xff]  ;;  %v1998_v50 = vld [vmem:[%s6377_s9 + $0x3c0] sm:$0xff] }
 0x30c   : > { %v4020_v61 = vadd.f32 %v3524_v11, %v2996_v63  ;;  %v4021_v57 = vadd.f32 %v3524_v11, %v2997_v9  ;;  %3843 = vperm.xlu1 %4719, %v3269_v51   ;;  %v4018_v30 = vadd.f32 %v3519_v7, %v2994_v0  ;;  %v4019_v43 = vadd.f32 %v3519_v7, %v2995_v52  ;;  %v1986_v51 = vld [vmem:[%s6377_s9 + $0x360] sm:$0xff]  ;;  %v1987_v63 = vld [vmem:[%s6377_s9 + $0x368] sm:$0xff] }
 0x30d   : > { %3838 = vperm.xlu0 %4718, %v3268_v25   ;;  %v3012_v11 = vmul.f32 %v7437_v26, %v1988_v22  ;;  %v3013_v29 = vmul.f32 %v7437_v26, %v1989_v33  ;;  %v3283_v22 = vld [vmem:[%s6184_s7 + $0x3e8] sm:$0xff]  ;;  %v2002_v26 = vld [vmem:[%s6377_s9 + $0x3e0] sm:$0xff] }
 0x30e   : > { %4276 = vst [vmem:[%s6402_s10 + $0x2f0] sm:$0xff] %v4020_v61  ;;  %4277 = vst [vmem:[%s6402_s10 + $0x2f8] sm:$0xff] %v4021_v57  ;;  %v7438_v61 = vld [vmem:[#allocation18_spill] sm:$0xff]  ;;  %v7443_v33 = vld [vmem:[#allocation23_spill] sm:$0xff] }
 0x30f   : > { %4274 = vst [vmem:[%s6402_s10 + $0x2e0] sm:$0xff] %v4018_v30  ;;  %4275 = vst [vmem:[%s6402_s10 + $0x2e8] sm:$0xff] %v4019_v43  ;;  %v3534_v37 = vpop.permute.xlu1 %3533  ;;  %v3529_v18 = vpop.permute.xlu0 %3528  ;;  %v3010_v57 = vmul.f32 %v7438_v61, %v1986_v51  ;;  %v3011_v7 = vmul.f32 %v7438_v61, %v1987_v63  ;;  %v1992_v30 = vld [vmem:[%s6377_s9 + $0x390] sm:$0xff]  ;;  %v1993_v43 = vld [vmem:[%s6377_s9 + $0x398] sm:$0xff] }
 0x310   : > { %v4024_v27 = vadd.f32 %v3534_v37, %v3000_v41  ;;  %v4025_v38 = vadd.f32 %v3534_v37, %v3001_v5  ;;  %3853 = vperm.xlu1 %4719, %v3271_v12   ;;  %v4022_v36 = vadd.f32 %v3529_v18, %v2998_v19  ;;  %v4023_v20 = vadd.f32 %v3529_v18, %v2999_v6  ;;  %v1991_v41 = vld [vmem:[%s6377_s9 + $0x388] sm:$0xff]  ;;  %v3282_v63 = vld [vmem:[%s6184_s7 + $0x3e0] sm:$0xff] }
 0x311   : > { %3848 = vperm.xlu0 %4718, %v3270_v44   ;;  %v3016_v37 = vmul.f32 %v7439_v35, %v1992_v30  ;;  %v3017_v56 = vmul.f32 %v7439_v35, %v1993_v43  ;;  %v3285_v30 = vld [vmem:[%s6184_s7 + $0x3f8] sm:$0xff]  ;;  %v2006_v35 = vld [vmem:[%s6377_s9 + $0x400] sm:$0xff] }
 0x312   : > { %4280 = vst [vmem:[%s6402_s10 + $0x310] sm:$0xff] %v4024_v27  ;;  %4281 = vst [vmem:[%s6402_s10 + $0x318] sm:$0xff] %v4025_v38  ;;  %v7440_v27 = vld [vmem:[#allocation20_spill] sm:$0xff]  ;;  %v7445_v43 = vld [vmem:[#allocation25_spill] sm:$0xff] }
 0x313   : > { %4278 = vst [vmem:[%s6402_s10 + $0x300] sm:$0xff] %v4022_v36  ;;  %4279 = vst [vmem:[%s6402_s10 + $0x308] sm:$0xff] %v4023_v20  ;;  %v3544_v58 = vpop.permute.xlu1 %3543  ;;  %v3539_v15 = vpop.permute.xlu0 %3538  ;;  %v3014_v38 = vmul.f32 %v7440_v27, %v1990_v10  ;;  %v3015_v18 = vmul.f32 %v7440_v27, %v1991_v41  ;;  %v1996_v36 = vld [vmem:[%s6377_s9 + $0x3b0] sm:$0xff]  ;;  %v1997_v20 = vld [vmem:[%s6377_s9 + $0x3b8] sm:$0xff] }
 0x314   : > { %v4028_v8 = vadd.f32 %v3544_v58, %v3004_v3  ;;  %v4029_v60 = vadd.f32 %v3544_v58, %v3005_v13  ;;  %3863 = vperm.xlu1 %4719, %v3273_v62   ;;  %v4026_v17 = vadd.f32 %v3539_v15, %v3002_v1  ;;  %v4027_v4 = vadd.f32 %v3539_v15, %v3003_v14  ;;  %v1995_v3 = vld [vmem:[%s6377_s9 + $0x3a8] sm:$0xff]  ;;  %v3284_v41 = vld [vmem:[%s6184_s7 + $0x3f0] sm:$0xff] }
 0x315   : > { %3858 = vperm.xlu0 %4718, %v3272_v47   ;;  %v3020_v58 = vmul.f32 %v7441_v59, %v1996_v36  ;;  %v3021_v48 = vmul.f32 %v7441_v59, %v1997_v20  ;;  %v7447_v36 = vld [vmem:[#allocation27_spill] sm:$0xff] }
 0x316   : > { %4284 = vst [vmem:[%s6402_s10 + $0x330] sm:$0xff] %v4028_v8  ;;  %4285 = vst [vmem:[%s6402_s10 + $0x338] sm:$0xff] %v4029_v60  ;;  %v7442_v8 = vld [vmem:[#allocation22_spill] sm:$0xff] }
 0x317   : > { %4282 = vst [vmem:[%s6402_s10 + $0x320] sm:$0xff] %v4026_v17  ;;  %4283 = vst [vmem:[%s6402_s10 + $0x328] sm:$0xff] %v4027_v4  ;;  %v3554_v54 = vpop.permute.xlu1 %3553  ;;  %v3549_v32 = vpop.permute.xlu0 %3548  ;;  %v3018_v60 = vmul.f32 %v7442_v8, %v1994_v28  ;;  %v3019_v15 = vmul.f32 %v7442_v8, %v1995_v3  ;;  %v2000_v17 = vld [vmem:[%s6377_s9 + $0x3d0] sm:$0xff]  ;;  %v2001_v4 = vld [vmem:[%s6377_s9 + $0x3d8] sm:$0xff] }
 0x318   : > { %v4032_v9 = vadd.f32 %v3554_v54, %v3008_v16  ;;  %v4033_v25 = vadd.f32 %v3554_v54, %v3009_v21  ;;  %3873 = vperm.xlu1 %4719, %v3275_v39   ;;  %v4030_v0 = vadd.f32 %v3549_v32, %v3006_v53  ;;  %v4031_v52 = vadd.f32 %v3549_v32, %v3007_v31  ;;  %v1999_v16 = vld [vmem:[%s6377_s9 + $0x3c8] sm:$0xff]  ;;  %v7448_v28 = vld [vmem:[#allocation28_spill] sm:$0xff] }
 0x319   : > { %3868 = vperm.xlu0 %4718, %v3274_v23   ;;  %v3024_v54 = vmul.f32 %v7443_v33, %v2000_v17  ;;  %v3025_v51 = vmul.f32 %v7443_v33, %v2001_v4  ;;  %v3030_v3 = vmul.f32 %v7448_v28, %v2006_v35  ;;  %v7450_v4 = vld [vmem:[#allocation30_spill] sm:$0xff] }
 0x31a   : > { %4288 = vst [vmem:[%s6402_s10 + $0x350] sm:$0xff] %v4032_v9  ;;  %4289 = vst [vmem:[%s6402_s10 + $0x358] sm:$0xff] %v4033_v25  ;;  %v7444_v9 = vld [vmem:[#allocation24_spill] sm:$0xff]  ;;  %v2022_v35 = vld [vmem:[%s6377_s9 + $0x480] sm:$0xff] }
 0x31b   : > { %4286 = vst [vmem:[%s6402_s10 + $0x340] sm:$0xff] %v4030_v0  ;;  %4287 = vst [vmem:[%s6402_s10 + $0x348] sm:$0xff] %v4031_v52  ;;  %v3564_v12 = vpop.permute.xlu1 %3563  ;;  %v3559_v55 = vpop.permute.xlu0 %3558  ;;  %v3022_v25 = vmul.f32 %v7444_v9, %v1998_v50  ;;  %v3023_v32 = vmul.f32 %v7444_v9, %v1999_v16  ;;  %v2004_v0 = vld [vmem:[%s6377_s9 + $0x3f0] sm:$0xff]  ;;  %v2005_v52 = vld [vmem:[%s6377_s9 + $0x3f8] sm:$0xff] }
 0x31c   : > { %v4036_v5 = vadd.f32 %v3564_v12, %v3012_v11  ;;  %v4037_v44 = vadd.f32 %v3564_v12, %v3013_v29  ;;  %3883 = vperm.xlu1 %4719, %v3277_v24   ;;  %v4034_v19 = vadd.f32 %v3559_v55, %v3010_v57  ;;  %v4035_v6 = vadd.f32 %v3559_v55, %v3011_v7  ;;  %v2003_v11 = vld [vmem:[%s6377_s9 + $0x3e8] sm:$0xff]  ;;  %v2016_v16 = vld [vmem:[%s6377_s9 + $0x450] sm:$0xff] }
 0x31d   : > { %3878 = vperm.xlu0 %4718, %v3276_v42   ;;  %v3028_v12 = vmul.f32 %v7445_v43, %v2004_v0  ;;  %v3029_v10 = vmul.f32 %v7445_v43, %v2005_v52 }
 0x31e   : > { %4292 = vst [vmem:[%s6402_s10 + $0x370] sm:$0xff] %v4036_v5  ;;  %4293 = vst [vmem:[%s6402_s10 + $0x378] sm:$0xff] %v4037_v44  ;;  %v7446_v5 = vld [vmem:[#allocation26_spill] sm:$0xff] }
 0x31f   : > { %4290 = vst [vmem:[%s6402_s10 + $0x360] sm:$0xff] %v4034_v19  ;;  %4291 = vst [vmem:[%s6402_s10 + $0x368] sm:$0xff] %v4035_v6  ;;  %v3574_v62 = vpop.permute.xlu1 %3573  ;;  %v3569_v34 = vpop.permute.xlu0 %3568  ;;  %v3026_v44 = vmul.f32 %v7446_v5, %v2002_v26  ;;  %v3027_v55 = vmul.f32 %v7446_v5, %v2003_v11  ;;  %v2008_v19 = vld [vmem:[%s6377_s9 + $0x410] sm:$0xff]  ;;  %v2009_v6 = vld [vmem:[%s6377_s9 + $0x418] sm:$0xff] }
 0x320   : > { %v4040_v13 = vadd.f32 %v3574_v62, %v3016_v37  ;;  %v4041_v47 = vadd.f32 %v3574_v62, %v3017_v56  ;;  %3893 = vperm.xlu1 %4719, %v3279_v2   ;;  %v4038_v1 = vadd.f32 %v3569_v34, %v3014_v38  ;;  %v4039_v14 = vadd.f32 %v3569_v34, %v3015_v18  ;;  %v2007_v37 = vld [vmem:[%s6377_s9 + $0x408] sm:$0xff]  ;;  %v2013_v34 = vld [vmem:[%s6377_s9 + $0x438] sm:$0xff]  ;;  %v7454_v5 = vld [vmem:[#allocation34_spill] sm:$0xff] }
 0x321   : > { %3888 = vperm.xlu0 %4718, %v3278_v49   ;;  %v3032_v20 = vmul.f32 %v7447_v36, %v2008_v19  ;;  %v3033_v62 = vmul.f32 %v7447_v36, %v2009_v6  ;;  %v2021_v26 = vld [vmem:[%s6377_s9 + $0x478] sm:$0xff]  ;;  %v2024_v19 = vld [vmem:[%s6377_s9 + $0x490] sm:$0xff]  ;;  %v7455_v36 = vld [vmem:[#allocation35_spill] sm:$0xff] }
 0x322   : > { %4296 = vst [vmem:[%s6402_s10 + $0x390] sm:$0xff] %v4040_v13  ;;  %4297 = vst [vmem:[%s6402_s10 + $0x398] sm:$0xff] %v4041_v47  ;;  %v3031_v13 = vmul.f32 %v7448_v28, %v2007_v37  ;;  %v2012_v47 = vld [vmem:[%s6377_s9 + $0x430] sm:$0xff]  ;;  %v2025_v6 = vld [vmem:[%s6377_s9 + $0x498] sm:$0xff] }
 0x323   : > { %4294 = vst [vmem:[%s6402_s10 + $0x380] sm:$0xff] %v4038_v1  ;;  %4295 = vst [vmem:[%s6402_s10 + $0x388] sm:$0xff] %v4039_v14  ;;  %v3584_v39 = vpop.permute.xlu1 %3583  ;;  %v3579_v40 = vpop.permute.xlu0 %3578  ;;  %v2010_v14 = vld [vmem:[%s6377_s9 + $0x420] sm:$0xff]  ;;  %v2023_v37 = vld [vmem:[%s6377_s9 + $0x488] sm:$0xff] }
 0x324   : > { %v4044_v21 = vadd.f32 %v3584_v39, %v3020_v58  ;;  %v4045_v23 = vadd.f32 %v3584_v39, %v3021_v48  ;;  %3903 = vperm.xlu1 %4719, %v3281_v45   ;;  %v4042_v53 = vadd.f32 %v3579_v40, %v3018_v60  ;;  %v4043_v31 = vadd.f32 %v3579_v40, %v3019_v15  ;;  %v2011_v45 = vld [vmem:[%s6377_s9 + $0x428] sm:$0xff]  ;;  %v7449_v60 = vld [vmem:[#allocation29_spill] sm:$0xff]  ;;  %v2014_v40 = vld [vmem:[%s6377_s9 + $0x440] sm:$0xff] }
 0x325   : > { %3898 = vperm.xlu0 %4718, %v3280_v46   ;;  %v3036_v15 = vmul.f32 %v7449_v60, %v2012_v47  ;;  %v3037_v17 = vmul.f32 %v7449_v60, %v2013_v34  ;;  %v3034_v39 = vmul.f32 %v7450_v4, %v2010_v14  ;;  %v3035_v50 = vmul.f32 %v7450_v4, %v2011_v45  ;;  %v7456_v28 = vld [vmem:[#allocation36_spill] sm:$0xff]  ;;  %v2029_v34 = vld [vmem:[%s6377_s9 + $0x4b8] sm:$0xff]  ;;  %v2026_v14 = vld [vmem:[%s6377_s9 + $0x4a0] sm:$0xff] }
 0x326   : > { %4300 = vst [vmem:[%s6402_s10 + $0x3b0] sm:$0xff] %v4044_v21  ;;  %4301 = vst [vmem:[%s6402_s10 + $0x3b8] sm:$0xff] %v4045_v23  ;;  %v2017_v21 = vld [vmem:[%s6377_s9 + $0x458] sm:$0xff]  ;;  %v2028_v47 = vld [vmem:[%s6377_s9 + $0x4b0] sm:$0xff] }
 0x327   : > { %4298 = vst [vmem:[%s6402_s10 + $0x3a0] sm:$0xff] %v4042_v53  ;;  %4299 = vst [vmem:[%s6402_s10 + $0x3a8] sm:$0xff] %v4043_v31  ;;  %v3594_v24 = vpop.permute.xlu1 %3593  ;;  %v3589_v61 = vpop.permute.xlu0 %3588  ;;  %v2015_v53 = vld [vmem:[%s6377_s9 + $0x448] sm:$0xff]  ;;  %v7457_v60 = vld [vmem:[#allocation37_spill] sm:$0xff] }
 0x328   : > { %v4048_v29 = vadd.f32 %v3594_v24, %v3024_v54  ;;  %v4049_v42 = vadd.f32 %v3594_v24, %v3025_v51  ;;  %3913 = vperm.xlu1 %4719, %v3283_v22   ;;  %v4046_v57 = vadd.f32 %v3589_v61, %v3022_v25  ;;  %v4047_v7 = vadd.f32 %v3589_v61, %v3023_v32  ;;  %v7452_v32 = vld [vmem:[#allocation32_spill] sm:$0xff]  ;;  %v2027_v45 = vld [vmem:[%s6377_s9 + $0x4a8] sm:$0xff]  ;;  %v7458_v4 = vld [vmem:[#allocation38_spill] sm:$0xff] }
 0x329   : > { %3908 = vperm.xlu0 %4718, %v3282_v63   ;;  %v7451_v63 = vld [vmem:[#allocation31_spill] sm:$0xff]  ;;  %v3038_v0 = vmul.f32 %v7452_v32, %v2014_v40  ;;  %v3039_v52 = vmul.f32 %v7452_v32, %v2015_v53  ;;  %v2020_v24 = vld [vmem:[%s6377_s9 + $0x470] sm:$0xff]  ;;  %v2030_v40 = vld [vmem:[%s6377_s9 + $0x4c0] sm:$0xff] }
 0x32a   : > { %4304 = vst [vmem:[%s6402_s10 + $0x3d0] sm:$0xff] %v4048_v29  ;;  %4305 = vst [vmem:[%s6402_s10 + $0x3d8] sm:$0xff] %v4049_v42  ;;  %v3040_v9 = vmul.f32 %v7451_v63, %v2016_v16  ;;  %v3041_v25 = vmul.f32 %v7451_v63, %v2017_v21  ;;  %v2018_v29 = vld [vmem:[%s6377_s9 + $0x460] sm:$0xff]  ;;  %v2019_v42 = vld [vmem:[%s6377_s9 + $0x468] sm:$0xff] }
 0x32b   : > { %4302 = vst [vmem:[%s6402_s10 + $0x3c0] sm:$0xff] %v4046_v57  ;;  %4303 = vst [vmem:[%s6402_s10 + $0x3c8] sm:$0xff] %v4047_v7  ;;  %v3604_v2 = vpop.permute.xlu1 %3603  ;;  %v3599_v27 = vpop.permute.xlu0 %3598  ;;  %v2032_v16 = vld [vmem:[%s6377_s9 + $0x4d0] sm:$0xff]  ;;  %v2033_v21 = vld [vmem:[%s6377_s9 + $0x4d8] sm:$0xff] }
 0x32c   : > { %v4052_v56 = vadd.f32 %v3604_v2, %v3028_v12  ;;  %v4053_v49 = vadd.f32 %v3604_v2, %v3029_v10  ;;  %3923 = vperm.xlu1 %4719, %v3285_v30   ;;  %v4050_v38 = vadd.f32 %v3599_v27, %v3026_v44  ;;  %v4051_v18 = vadd.f32 %v3599_v27, %v3027_v55  ;;  %v7453_v12 = vld [vmem:[#allocation33_spill] sm:$0xff]  ;;  %v2031_v53 = vld [vmem:[%s6377_s9 + $0x4c8] sm:$0xff]  ;;  %v7460_v32 = vld [vmem:[#allocation40_spill] sm:$0xff] }
 0x32d   : > { %3918 = vperm.xlu0 %4718, %v3284_v41   ;;  %v3044_v10 = vmul.f32 %v7453_v12, %v2020_v24  ;;  %v3045_v41 = vmul.f32 %v7453_v12, %v2021_v26  ;;  %v3042_v44 = vmul.f32 %v7454_v5, %v2018_v29  ;;  %v3043_v55 = vmul.f32 %v7454_v5, %v2019_v42  ;;  %v7459_v63 = vld [vmem:[#allocation39_spill] sm:$0xff]  ;;  %v2036_v24 = vld [vmem:[%s6377_s9 + $0x4f0] sm:$0xff]  ;;  %v2037_v26 = vld [vmem:[%s6377_s9 + $0x4f8] sm:$0xff] }
 0x32e   : > { %4308 = vst [vmem:[%s6402_s10 + $0x3f0] sm:$0xff] %v4052_v56  ;;  %4309 = vst [vmem:[%s6402_s10 + $0x3f8] sm:$0xff] %v4053_v49  ;;  %v2034_v29 = vld [vmem:[%s6377_s9 + $0x4e0] sm:$0xff]  ;;  %v2035_v42 = vld [vmem:[%s6377_s9 + $0x4e8] sm:$0xff] }
 0x32f   : > { %4306 = vst [vmem:[%s6402_s10 + $0x3e0] sm:$0xff] %v4050_v38  ;;  %4307 = vst [vmem:[%s6402_s10 + $0x3e8] sm:$0xff] %v4051_v18  ;;  %v3614_v1 = vpop.permute.xlu1 %3613  ;;  %v7461_v12 = vld [vmem:[#allocation41_spill] sm:$0xff]  ;;  %v7462_v5 = vld [vmem:[#allocation42_spill] sm:$0xff] }
 0x330   : > { %v4056_v59 = vadd.f32 %v3614_v1, %v3032_v20  ;;  %v4057_v58 = vadd.f32 %v3614_v1, %v3033_v62  ;;  %v3609_v48 = vpop.permute.xlu0 %3608  ;;  %v3048_v20 = vmul.f32 %v7455_v36, %v2024_v19  ;;  %v3049_v62 = vmul.f32 %v7455_v36, %v2025_v6  ;;  %v2040_v19 = vld [vmem:[%s6377_s9 + $0x510] sm:$0xff]  ;;  %v2041_v6 = vld [vmem:[%s6377_s9 + $0x518] sm:$0xff]  ;;  %v7463_v36 = vld [vmem:[#allocation43_spill] sm:$0xff] }
 0x331   : > { %v4054_v46 = vadd.f32 %v3609_v48, %v3030_v3  ;;  %v4055_v8 = vadd.f32 %v3609_v48, %v3031_v13  ;;  %v3046_v3 = vmul.f32 %v7456_v28, %v2022_v35  ;;  %v3047_v13 = vmul.f32 %v7456_v28, %v2023_v37  ;;  %v2038_v35 = vld [vmem:[%s6377_s9 + $0x500] sm:$0xff]  ;;  %v2039_v37 = vld [vmem:[%s6377_s9 + $0x508] sm:$0xff]  ;;  %v7464_v28 = vld [vmem:[#allocation44_spill] sm:$0xff] }
 0x332   : > { %4312 = vst [vmem:[%s6402_s10 + $0x410] sm:$0xff] %v4056_v59  ;;  %4313 = vst [vmem:[%s6402_s10 + $0x418] sm:$0xff] %v4057_v58 }
 0x333   : > { %4310 = vst [vmem:[%s6402_s10 + $0x400] sm:$0xff] %v4054_v46  ;;  %4311 = vst [vmem:[%s6402_s10 + $0x408] sm:$0xff] %v4055_v8  ;;  %v3624_v23 = vpop.permute.xlu1 %3623 }
 0x334   : > { %v4060_v31 = vadd.f32 %v3624_v23, %v3036_v15  ;;  %v4061_v22 = vadd.f32 %v3624_v23, %v3037_v17  ;;  %v3619_v33 = vpop.permute.xlu0 %3618  ;;  %v3052_v15 = vmul.f32 %v7457_v60, %v2028_v47  ;;  %v3053_v17 = vmul.f32 %v7457_v60, %v2029_v34  ;;  %v2044_v47 = vld [vmem:[%s6377_s9 + $0x530] sm:$0xff]  ;;  %v2045_v34 = vld [vmem:[%s6377_s9 + $0x538] sm:$0xff] }
 0x335   : > { %v4058_v54 = vadd.f32 %v3619_v33, %v3034_v39  ;;  %v4059_v51 = vadd.f32 %v3619_v33, %v3035_v50  ;;  %v3050_v39 = vmul.f32 %v7458_v4, %v2026_v14  ;;  %v3051_v50 = vmul.f32 %v7458_v4, %v2027_v45  ;;  %v2042_v14 = vld [vmem:[%s6377_s9 + $0x520] sm:$0xff]  ;;  %v2043_v45 = vld [vmem:[%s6377_s9 + $0x528] sm:$0xff]  ;;  %v7465_v60 = vld [vmem:[#allocation45_spill] sm:$0xff] }
 0x336   : > { %4316 = vst [vmem:[%s6402_s10 + $0x430] sm:$0xff] %v4060_v31  ;;  %4317 = vst [vmem:[%s6402_s10 + $0x438] sm:$0xff] %v4061_v22  ;;  %v7466_v4 = vld [vmem:[#allocation46_spill] sm:$0xff] }
 0x337   : > { %4314 = vst [vmem:[%s6402_s10 + $0x420] sm:$0xff] %v4058_v54  ;;  %4315 = vst [vmem:[%s6402_s10 + $0x428] sm:$0xff] %v4059_v51  ;;  %v3634_v11 = vpop.permute.xlu1 %3633 }
 0x338   : > { %v4064_v61 = vadd.f32 %v3634_v11, %v3040_v9  ;;  %v4065_v57 = vadd.f32 %v3634_v11, %v3041_v25  ;;  %v3629_v7 = vpop.permute.xlu0 %3628  ;;  %v3056_v9 = vmul.f32 %v7459_v63, %v2032_v16  ;;  %v3057_v25 = vmul.f32 %v7459_v63, %v2033_v21  ;;  %v2048_v16 = vld [vmem:[%s6377_s9 + $0x550] sm:$0xff]  ;;  %v2049_v21 = vld [vmem:[%s6377_s9 + $0x558] sm:$0xff]  ;;  %v7467_v63 = vld [vmem:[#allocation47_spill] sm:$0xff] }
 0x339   : > { %v4062_v30 = vadd.f32 %v3629_v7, %v3038_v0  ;;  %v4063_v43 = vadd.f32 %v3629_v7, %v3039_v52  ;;  %v3054_v0 = vmul.f32 %v7460_v32, %v2030_v40  ;;  %v3055_v52 = vmul.f32 %v7460_v32, %v2031_v53  ;;  %v2046_v40 = vld [vmem:[%s6377_s9 + $0x540] sm:$0xff]  ;;  %v2047_v53 = vld [vmem:[%s6377_s9 + $0x548] sm:$0xff]  ;;  %v7468_v32 = vld [vmem:[#allocation48_spill] sm:$0xff] }
 0x33a   : > { %4320 = vst [vmem:[%s6402_s10 + $0x450] sm:$0xff] %v4064_v61  ;;  %4321 = vst [vmem:[%s6402_s10 + $0x458] sm:$0xff] %v4065_v57 }
 0x33b   : > { %4318 = vst [vmem:[%s6402_s10 + $0x440] sm:$0xff] %v4062_v30  ;;  %4319 = vst [vmem:[%s6402_s10 + $0x448] sm:$0xff] %v4063_v43  ;;  %v3644_v2 = vpop.permute.xlu1 %3643 }
 0x33c   : > { %v4068_v56 = vadd.f32 %v3644_v2, %v3044_v10  ;;  %v4069_v49 = vadd.f32 %v3644_v2, %v3045_v41  ;;  %v3639_v27 = vpop.permute.xlu0 %3638  ;;  %v3060_v10 = vmul.f32 %v7461_v12, %v2036_v24  ;;  %v3061_v41 = vmul.f32 %v7461_v12, %v2037_v26  ;;  %v2052_v24 = vld [vmem:[%s6377_s9 + $0x570] sm:$0xff]  ;;  %v2053_v26 = vld [vmem:[%s6377_s9 + $0x578] sm:$0xff] }
 0x33d   : > { %v4066_v38 = vadd.f32 %v3639_v27, %v3042_v44  ;;  %v4067_v18 = vadd.f32 %v3639_v27, %v3043_v55  ;;  %v3058_v44 = vmul.f32 %v7462_v5, %v2034_v29  ;;  %v3059_v55 = vmul.f32 %v7462_v5, %v2035_v42  ;;  %v2050_v29 = vld [vmem:[%s6377_s9 + $0x560] sm:$0xff]  ;;  %v2051_v42 = vld [vmem:[%s6377_s9 + $0x568] sm:$0xff]  ;;  %v7469_v12 = vld [vmem:[#allocation49_spill] sm:$0xff] }
 0x33e   : > { %4324 = vst [vmem:[%s6402_s10 + $0x470] sm:$0xff] %v4068_v56  ;;  %4325 = vst [vmem:[%s6402_s10 + $0x478] sm:$0xff] %v4069_v49  ;;  %v7470_v5 = vld [vmem:[#allocation50_spill] sm:$0xff] }
 0x33f   : > { %4322 = vst [vmem:[%s6402_s10 + $0x460] sm:$0xff] %v4066_v38  ;;  %4323 = vst [vmem:[%s6402_s10 + $0x468] sm:$0xff] %v4067_v18  ;;  %v3654_v1 = vpop.permute.xlu1 %3653 }
 0x340   : > { %v4072_v59 = vadd.f32 %v3654_v1, %v3048_v20  ;;  %v4073_v58 = vadd.f32 %v3654_v1, %v3049_v62  ;;  %v3649_v48 = vpop.permute.xlu0 %3648  ;;  %v3064_v20 = vmul.f32 %v7463_v36, %v2040_v19  ;;  %v3065_v62 = vmul.f32 %v7463_v36, %v2041_v6  ;;  %v2056_v19 = vld [vmem:[%s6377_s9 + $0x590] sm:$0xff]  ;;  %v2057_v6 = vld [vmem:[%s6377_s9 + $0x598] sm:$0xff]  ;;  %v7471_v36 = vld [vmem:[#allocation51_spill] sm:$0xff] }
 0x341   : > { %v4070_v46 = vadd.f32 %v3649_v48, %v3046_v3  ;;  %v4071_v8 = vadd.f32 %v3649_v48, %v3047_v13  ;;  %v3062_v3 = vmul.f32 %v7464_v28, %v2038_v35  ;;  %v3063_v13 = vmul.f32 %v7464_v28, %v2039_v37  ;;  %v2054_v35 = vld [vmem:[%s6377_s9 + $0x580] sm:$0xff]  ;;  %v2055_v37 = vld [vmem:[%s6377_s9 + $0x588] sm:$0xff]  ;;  %v7472_v28 = vld [vmem:[#allocation52_spill] sm:$0xff] }
 0x342   : > { %4328 = vst [vmem:[%s6402_s10 + $0x490] sm:$0xff] %v4072_v59  ;;  %4329 = vst [vmem:[%s6402_s10 + $0x498] sm:$0xff] %v4073_v58 }
 0x343   : > { %4326 = vst [vmem:[%s6402_s10 + $0x480] sm:$0xff] %v4070_v46  ;;  %4327 = vst [vmem:[%s6402_s10 + $0x488] sm:$0xff] %v4071_v8  ;;  %v3664_v23 = vpop.permute.xlu1 %3663 }
 0x344   : > { %v4076_v31 = vadd.f32 %v3664_v23, %v3052_v15  ;;  %v4077_v22 = vadd.f32 %v3664_v23, %v3053_v17  ;;  %v3659_v33 = vpop.permute.xlu0 %3658  ;;  %v3068_v15 = vmul.f32 %v7465_v60, %v2044_v47  ;;  %v3069_v17 = vmul.f32 %v7465_v60, %v2045_v34  ;;  %v2060_v47 = vld [vmem:[%s6377_s9 + $0x5b0] sm:$0xff]  ;;  %v2061_v34 = vld [vmem:[%s6377_s9 + $0x5b8] sm:$0xff] }
 0x345   : > { %v4074_v54 = vadd.f32 %v3659_v33, %v3050_v39  ;;  %v4075_v51 = vadd.f32 %v3659_v33, %v3051_v50  ;;  %v3066_v39 = vmul.f32 %v7466_v4, %v2042_v14  ;;  %v3067_v50 = vmul.f32 %v7466_v4, %v2043_v45  ;;  %v2058_v14 = vld [vmem:[%s6377_s9 + $0x5a0] sm:$0xff]  ;;  %v2059_v45 = vld [vmem:[%s6377_s9 + $0x5a8] sm:$0xff]  ;;  %v7473_v60 = vld [vmem:[#allocation53_spill] sm:$0xff] }
 0x346   : > { %4332 = vst [vmem:[%s6402_s10 + $0x4b0] sm:$0xff] %v4076_v31  ;;  %4333 = vst [vmem:[%s6402_s10 + $0x4b8] sm:$0xff] %v4077_v22  ;;  %v7474_v4 = vld [vmem:[#allocation54_spill] sm:$0xff] }
 0x347   : > { %4330 = vst [vmem:[%s6402_s10 + $0x4a0] sm:$0xff] %v4074_v54  ;;  %4331 = vst [vmem:[%s6402_s10 + $0x4a8] sm:$0xff] %v4075_v51  ;;  %v3674_v11 = vpop.permute.xlu1 %3673 }
 0x348   : > { %v4080_v61 = vadd.f32 %v3674_v11, %v3056_v9  ;;  %v4081_v57 = vadd.f32 %v3674_v11, %v3057_v25  ;;  %v3669_v7 = vpop.permute.xlu0 %3668  ;;  %v3072_v9 = vmul.f32 %v7467_v63, %v2048_v16  ;;  %v3073_v25 = vmul.f32 %v7467_v63, %v2049_v21  ;;  %v2064_v16 = vld [vmem:[%s6377_s9 + $0x5d0] sm:$0xff]  ;;  %v2065_v21 = vld [vmem:[%s6377_s9 + $0x5d8] sm:$0xff]  ;;  %v7475_v63 = vld [vmem:[#allocation55_spill] sm:$0xff] }
 0x349   : > { %v4078_v30 = vadd.f32 %v3669_v7, %v3054_v0  ;;  %v4079_v43 = vadd.f32 %v3669_v7, %v3055_v52  ;;  %v3070_v0 = vmul.f32 %v7468_v32, %v2046_v40  ;;  %v3071_v52 = vmul.f32 %v7468_v32, %v2047_v53  ;;  %v2062_v40 = vld [vmem:[%s6377_s9 + $0x5c0] sm:$0xff]  ;;  %v2063_v53 = vld [vmem:[%s6377_s9 + $0x5c8] sm:$0xff]  ;;  %v7476_v32 = vld [vmem:[#allocation56_spill] sm:$0xff] }
 0x34a   : > { %4336 = vst [vmem:[%s6402_s10 + $0x4d0] sm:$0xff] %v4080_v61  ;;  %4337 = vst [vmem:[%s6402_s10 + $0x4d8] sm:$0xff] %v4081_v57 }
 0x34b   : > { %4334 = vst [vmem:[%s6402_s10 + $0x4c0] sm:$0xff] %v4078_v30  ;;  %4335 = vst [vmem:[%s6402_s10 + $0x4c8] sm:$0xff] %v4079_v43  ;;  %v3684_v2 = vpop.permute.xlu1 %3683 }
 0x34c   : > { %v4084_v56 = vadd.f32 %v3684_v2, %v3060_v10  ;;  %v4085_v49 = vadd.f32 %v3684_v2, %v3061_v41  ;;  %v3679_v27 = vpop.permute.xlu0 %3678  ;;  %v3076_v10 = vmul.f32 %v7469_v12, %v2052_v24  ;;  %v3077_v41 = vmul.f32 %v7469_v12, %v2053_v26  ;;  %v2068_v24 = vld [vmem:[%s6377_s9 + $0x5f0] sm:$0xff]  ;;  %v2069_v26 = vld [vmem:[%s6377_s9 + $0x5f8] sm:$0xff] }
 0x34d   : > { %v4082_v38 = vadd.f32 %v3679_v27, %v3058_v44  ;;  %v4083_v18 = vadd.f32 %v3679_v27, %v3059_v55  ;;  %v3074_v44 = vmul.f32 %v7470_v5, %v2050_v29  ;;  %v3075_v55 = vmul.f32 %v7470_v5, %v2051_v42  ;;  %v2066_v29 = vld [vmem:[%s6377_s9 + $0x5e0] sm:$0xff]  ;;  %v2067_v42 = vld [vmem:[%s6377_s9 + $0x5e8] sm:$0xff]  ;;  %v7477_v12 = vld [vmem:[#allocation57_spill] sm:$0xff] }
 0x34e   : > { %4340 = vst [vmem:[%s6402_s10 + $0x4f0] sm:$0xff] %v4084_v56  ;;  %4341 = vst [vmem:[%s6402_s10 + $0x4f8] sm:$0xff] %v4085_v49  ;;  %v7478_v5 = vld [vmem:[#allocation58_spill] sm:$0xff] }
 0x34f   : > { %4338 = vst [vmem:[%s6402_s10 + $0x4e0] sm:$0xff] %v4082_v38  ;;  %4339 = vst [vmem:[%s6402_s10 + $0x4e8] sm:$0xff] %v4083_v18  ;;  %v3694_v1 = vpop.permute.xlu1 %3693 }
 0x350   : > { %v4088_v59 = vadd.f32 %v3694_v1, %v3064_v20  ;;  %v4089_v58 = vadd.f32 %v3694_v1, %v3065_v62  ;;  %v3689_v48 = vpop.permute.xlu0 %3688  ;;  %v3080_v20 = vmul.f32 %v7471_v36, %v2056_v19  ;;  %v3081_v62 = vmul.f32 %v7471_v36, %v2057_v6  ;;  %v2072_v19 = vld [vmem:[%s6377_s9 + $0x610] sm:$0xff]  ;;  %v2073_v6 = vld [vmem:[%s6377_s9 + $0x618] sm:$0xff]  ;;  %v7479_v36 = vld [vmem:[#allocation59_spill] sm:$0xff] }
 0x351   : > { %v4086_v46 = vadd.f32 %v3689_v48, %v3062_v3  ;;  %v4087_v8 = vadd.f32 %v3689_v48, %v3063_v13  ;;  %v3078_v3 = vmul.f32 %v7472_v28, %v2054_v35  ;;  %v3079_v13 = vmul.f32 %v7472_v28, %v2055_v37  ;;  %v2070_v35 = vld [vmem:[%s6377_s9 + $0x600] sm:$0xff]  ;;  %v2071_v37 = vld [vmem:[%s6377_s9 + $0x608] sm:$0xff]  ;;  %v7480_v28 = vld [vmem:[#allocation60_spill] sm:$0xff] }
 0x352   : > { %4344 = vst [vmem:[%s6402_s10 + $0x510] sm:$0xff] %v4088_v59  ;;  %4345 = vst [vmem:[%s6402_s10 + $0x518] sm:$0xff] %v4089_v58 }
 0x353   : > { %4342 = vst [vmem:[%s6402_s10 + $0x500] sm:$0xff] %v4086_v46  ;;  %4343 = vst [vmem:[%s6402_s10 + $0x508] sm:$0xff] %v4087_v8  ;;  %v3704_v23 = vpop.permute.xlu1 %3703 }
 0x354   : > { %v4092_v31 = vadd.f32 %v3704_v23, %v3068_v15  ;;  %v4093_v22 = vadd.f32 %v3704_v23, %v3069_v17  ;;  %v3699_v33 = vpop.permute.xlu0 %3698  ;;  %v3084_v15 = vmul.f32 %v7473_v60, %v2060_v47  ;;  %v3085_v17 = vmul.f32 %v7473_v60, %v2061_v34  ;;  %v2076_v47 = vld [vmem:[%s6377_s9 + $0x630] sm:$0xff]  ;;  %v2077_v34 = vld [vmem:[%s6377_s9 + $0x638] sm:$0xff] }
 0x355   : > { %v4090_v54 = vadd.f32 %v3699_v33, %v3066_v39  ;;  %v4091_v51 = vadd.f32 %v3699_v33, %v3067_v50  ;;  %v3082_v39 = vmul.f32 %v7474_v4, %v2058_v14  ;;  %v3083_v50 = vmul.f32 %v7474_v4, %v2059_v45  ;;  %v2074_v14 = vld [vmem:[%s6377_s9 + $0x620] sm:$0xff]  ;;  %v2075_v45 = vld [vmem:[%s6377_s9 + $0x628] sm:$0xff]  ;;  %v7481_v60 = vld [vmem:[#allocation61_spill] sm:$0xff] }
 0x356   : > { %4348 = vst [vmem:[%s6402_s10 + $0x530] sm:$0xff] %v4092_v31  ;;  %4349 = vst [vmem:[%s6402_s10 + $0x538] sm:$0xff] %v4093_v22  ;;  %v7482_v4 = vld [vmem:[#allocation62_spill] sm:$0xff] }
 0x357   : > { %4346 = vst [vmem:[%s6402_s10 + $0x520] sm:$0xff] %v4090_v54  ;;  %4347 = vst [vmem:[%s6402_s10 + $0x528] sm:$0xff] %v4091_v51  ;;  %v3714_v11 = vpop.permute.xlu1 %3713 }
 0x358   : > { %v4096_v61 = vadd.f32 %v3714_v11, %v3072_v9  ;;  %v4097_v57 = vadd.f32 %v3714_v11, %v3073_v25  ;;  %v3709_v7 = vpop.permute.xlu0 %3708  ;;  %v3088_v9 = vmul.f32 %v7475_v63, %v2064_v16  ;;  %v3089_v25 = vmul.f32 %v7475_v63, %v2065_v21  ;;  %v2080_v16 = vld [vmem:[%s6377_s9 + $0x650] sm:$0xff]  ;;  %v2081_v21 = vld [vmem:[%s6377_s9 + $0x658] sm:$0xff]  ;;  %v7483_v63 = vld [vmem:[#allocation63_spill] sm:$0xff] }
 0x359   : > { %v4094_v30 = vadd.f32 %v3709_v7, %v3070_v0  ;;  %v4095_v43 = vadd.f32 %v3709_v7, %v3071_v52  ;;  %v3086_v0 = vmul.f32 %v7476_v32, %v2062_v40  ;;  %v3087_v52 = vmul.f32 %v7476_v32, %v2063_v53  ;;  %v2078_v40 = vld [vmem:[%s6377_s9 + $0x640] sm:$0xff]  ;;  %v2079_v53 = vld [vmem:[%s6377_s9 + $0x648] sm:$0xff]  ;;  %v7484_v32 = vld [vmem:[#allocation64_spill] sm:$0xff] }
 0x35a   : > { %4352 = vst [vmem:[%s6402_s10 + $0x550] sm:$0xff] %v4096_v61  ;;  %4353 = vst [vmem:[%s6402_s10 + $0x558] sm:$0xff] %v4097_v57 }
 0x35b   : > { %4350 = vst [vmem:[%s6402_s10 + $0x540] sm:$0xff] %v4094_v30  ;;  %4351 = vst [vmem:[%s6402_s10 + $0x548] sm:$0xff] %v4095_v43  ;;  %v3724_v2 = vpop.permute.xlu1 %3723 }
 0x35c   : > { %v4100_v56 = vadd.f32 %v3724_v2, %v3076_v10  ;;  %v4101_v49 = vadd.f32 %v3724_v2, %v3077_v41  ;;  %v3719_v27 = vpop.permute.xlu0 %3718  ;;  %v3092_v10 = vmul.f32 %v7477_v12, %v2068_v24  ;;  %v3093_v41 = vmul.f32 %v7477_v12, %v2069_v26  ;;  %v2084_v24 = vld [vmem:[%s6377_s9 + $0x670] sm:$0xff]  ;;  %v2085_v26 = vld [vmem:[%s6377_s9 + $0x678] sm:$0xff] }
 0x35d   : > { %v4098_v38 = vadd.f32 %v3719_v27, %v3074_v44  ;;  %v4099_v18 = vadd.f32 %v3719_v27, %v3075_v55  ;;  %v3090_v44 = vmul.f32 %v7478_v5, %v2066_v29  ;;  %v3091_v55 = vmul.f32 %v7478_v5, %v2067_v42  ;;  %v2082_v29 = vld [vmem:[%s6377_s9 + $0x660] sm:$0xff]  ;;  %v2083_v42 = vld [vmem:[%s6377_s9 + $0x668] sm:$0xff]  ;;  %v7485_v12 = vld [vmem:[#allocation65_spill] sm:$0xff] }
 0x35e   : > { %4356 = vst [vmem:[%s6402_s10 + $0x570] sm:$0xff] %v4100_v56  ;;  %4357 = vst [vmem:[%s6402_s10 + $0x578] sm:$0xff] %v4101_v49  ;;  %v7486_v5 = vld [vmem:[#allocation66_spill] sm:$0xff] }
 0x35f   : > { %4354 = vst [vmem:[%s6402_s10 + $0x560] sm:$0xff] %v4098_v38  ;;  %4355 = vst [vmem:[%s6402_s10 + $0x568] sm:$0xff] %v4099_v18  ;;  %v3734_v1 = vpop.permute.xlu1 %3733 }
 0x360   : > { %v4104_v59 = vadd.f32 %v3734_v1, %v3080_v20  ;;  %v4105_v58 = vadd.f32 %v3734_v1, %v3081_v62  ;;  %v3729_v48 = vpop.permute.xlu0 %3728  ;;  %v3096_v20 = vmul.f32 %v7479_v36, %v2072_v19  ;;  %v3097_v62 = vmul.f32 %v7479_v36, %v2073_v6  ;;  %v2088_v19 = vld [vmem:[%s6377_s9 + $0x690] sm:$0xff]  ;;  %v2089_v6 = vld [vmem:[%s6377_s9 + $0x698] sm:$0xff]  ;;  %v7487_v36 = vld [vmem:[#allocation67_spill] sm:$0xff] }
 0x361   : > { %v4102_v46 = vadd.f32 %v3729_v48, %v3078_v3  ;;  %v4103_v8 = vadd.f32 %v3729_v48, %v3079_v13  ;;  %v3094_v3 = vmul.f32 %v7480_v28, %v2070_v35  ;;  %v3095_v13 = vmul.f32 %v7480_v28, %v2071_v37  ;;  %v2086_v35 = vld [vmem:[%s6377_s9 + $0x680] sm:$0xff]  ;;  %v2087_v37 = vld [vmem:[%s6377_s9 + $0x688] sm:$0xff]  ;;  %v7488_v28 = vld [vmem:[#allocation68_spill] sm:$0xff] }
 0x362   : > { %4360 = vst [vmem:[%s6402_s10 + $0x590] sm:$0xff] %v4104_v59  ;;  %4361 = vst [vmem:[%s6402_s10 + $0x598] sm:$0xff] %v4105_v58 }
 0x363   : > { %4358 = vst [vmem:[%s6402_s10 + $0x580] sm:$0xff] %v4102_v46  ;;  %4359 = vst [vmem:[%s6402_s10 + $0x588] sm:$0xff] %v4103_v8  ;;  %v3744_v23 = vpop.permute.xlu1 %3743 }
 0x364   : > { %v4108_v31 = vadd.f32 %v3744_v23, %v3084_v15  ;;  %v4109_v22 = vadd.f32 %v3744_v23, %v3085_v17  ;;  %v3739_v33 = vpop.permute.xlu0 %3738  ;;  %v3100_v15 = vmul.f32 %v7481_v60, %v2076_v47  ;;  %v3101_v17 = vmul.f32 %v7481_v60, %v2077_v34  ;;  %v2092_v47 = vld [vmem:[%s6377_s9 + $0x6b0] sm:$0xff]  ;;  %v2093_v34 = vld [vmem:[%s6377_s9 + $0x6b8] sm:$0xff] }
 0x365   : > { %v4106_v54 = vadd.f32 %v3739_v33, %v3082_v39  ;;  %v4107_v51 = vadd.f32 %v3739_v33, %v3083_v50  ;;  %v3098_v39 = vmul.f32 %v7482_v4, %v2074_v14  ;;  %v3099_v50 = vmul.f32 %v7482_v4, %v2075_v45  ;;  %v2090_v14 = vld [vmem:[%s6377_s9 + $0x6a0] sm:$0xff]  ;;  %v2091_v45 = vld [vmem:[%s6377_s9 + $0x6a8] sm:$0xff]  ;;  %v7489_v60 = vld [vmem:[#allocation69_spill] sm:$0xff] }
 0x366   : > { %4364 = vst [vmem:[%s6402_s10 + $0x5b0] sm:$0xff] %v4108_v31  ;;  %4365 = vst [vmem:[%s6402_s10 + $0x5b8] sm:$0xff] %v4109_v22  ;;  %v7490_v4 = vld [vmem:[#allocation70_spill] sm:$0xff] }
 0x367   : > { %4362 = vst [vmem:[%s6402_s10 + $0x5a0] sm:$0xff] %v4106_v54  ;;  %4363 = vst [vmem:[%s6402_s10 + $0x5a8] sm:$0xff] %v4107_v51  ;;  %v3754_v11 = vpop.permute.xlu1 %3753 }
 0x368   : > { %v4112_v61 = vadd.f32 %v3754_v11, %v3088_v9  ;;  %v4113_v57 = vadd.f32 %v3754_v11, %v3089_v25  ;;  %v3749_v7 = vpop.permute.xlu0 %3748  ;;  %v3104_v9 = vmul.f32 %v7483_v63, %v2080_v16  ;;  %v3105_v25 = vmul.f32 %v7483_v63, %v2081_v21  ;;  %v2096_v16 = vld [vmem:[%s6377_s9 + $0x6d0] sm:$0xff]  ;;  %v2097_v21 = vld [vmem:[%s6377_s9 + $0x6d8] sm:$0xff]  ;;  %v7491_v63 = vld [vmem:[#allocation71_spill] sm:$0xff] }
 0x369   : > { %v4110_v30 = vadd.f32 %v3749_v7, %v3086_v0  ;;  %v4111_v43 = vadd.f32 %v3749_v7, %v3087_v52  ;;  %v3102_v0 = vmul.f32 %v7484_v32, %v2078_v40  ;;  %v3103_v52 = vmul.f32 %v7484_v32, %v2079_v53  ;;  %v2094_v40 = vld [vmem:[%s6377_s9 + $0x6c0] sm:$0xff]  ;;  %v2095_v53 = vld [vmem:[%s6377_s9 + $0x6c8] sm:$0xff]  ;;  %v7492_v32 = vld [vmem:[#allocation72_spill] sm:$0xff] }
 0x36a   : > { %4368 = vst [vmem:[%s6402_s10 + $0x5d0] sm:$0xff] %v4112_v61  ;;  %4369 = vst [vmem:[%s6402_s10 + $0x5d8] sm:$0xff] %v4113_v57 }
 0x36b   : > { %4366 = vst [vmem:[%s6402_s10 + $0x5c0] sm:$0xff] %v4110_v30  ;;  %4367 = vst [vmem:[%s6402_s10 + $0x5c8] sm:$0xff] %v4111_v43  ;;  %v3764_v2 = vpop.permute.xlu1 %3763 }
 0x36c   : > { %v4116_v56 = vadd.f32 %v3764_v2, %v3092_v10  ;;  %v4117_v49 = vadd.f32 %v3764_v2, %v3093_v41  ;;  %v3759_v27 = vpop.permute.xlu0 %3758  ;;  %v3108_v10 = vmul.f32 %v7485_v12, %v2084_v24  ;;  %v3109_v41 = vmul.f32 %v7485_v12, %v2085_v26  ;;  %v2100_v24 = vld [vmem:[%s6377_s9 + $0x6f0] sm:$0xff]  ;;  %v2101_v26 = vld [vmem:[%s6377_s9 + $0x6f8] sm:$0xff] }
 0x36d   : > { %v4114_v38 = vadd.f32 %v3759_v27, %v3090_v44  ;;  %v4115_v18 = vadd.f32 %v3759_v27, %v3091_v55  ;;  %v3106_v44 = vmul.f32 %v7486_v5, %v2082_v29  ;;  %v3107_v55 = vmul.f32 %v7486_v5, %v2083_v42  ;;  %v2098_v29 = vld [vmem:[%s6377_s9 + $0x6e0] sm:$0xff]  ;;  %v2099_v42 = vld [vmem:[%s6377_s9 + $0x6e8] sm:$0xff]  ;;  %v7493_v12 = vld [vmem:[#allocation73_spill] sm:$0xff] }
 0x36e   : > { %4372 = vst [vmem:[%s6402_s10 + $0x5f0] sm:$0xff] %v4116_v56  ;;  %4373 = vst [vmem:[%s6402_s10 + $0x5f8] sm:$0xff] %v4117_v49  ;;  %v7494_v5 = vld [vmem:[#allocation74_spill] sm:$0xff] }
 0x36f   : > { %4370 = vst [vmem:[%s6402_s10 + $0x5e0] sm:$0xff] %v4114_v38  ;;  %4371 = vst [vmem:[%s6402_s10 + $0x5e8] sm:$0xff] %v4115_v18  ;;  %v3774_v1 = vpop.permute.xlu1 %3773 }
 0x370   : > { %v4120_v59 = vadd.f32 %v3774_v1, %v3096_v20  ;;  %v4121_v58 = vadd.f32 %v3774_v1, %v3097_v62  ;;  %v3769_v48 = vpop.permute.xlu0 %3768  ;;  %v3112_v20 = vmul.f32 %v7487_v36, %v2088_v19  ;;  %v3113_v62 = vmul.f32 %v7487_v36, %v2089_v6  ;;  %v2104_v19 = vld [vmem:[%s6377_s9 + $0x710] sm:$0xff]  ;;  %v2105_v6 = vld [vmem:[%s6377_s9 + $0x718] sm:$0xff]  ;;  %v7495_v36 = vld [vmem:[#allocation75_spill] sm:$0xff] }
 0x371   : > { %v4118_v46 = vadd.f32 %v3769_v48, %v3094_v3  ;;  %v4119_v8 = vadd.f32 %v3769_v48, %v3095_v13  ;;  %v3110_v3 = vmul.f32 %v7488_v28, %v2086_v35  ;;  %v3111_v13 = vmul.f32 %v7488_v28, %v2087_v37  ;;  %v2102_v35 = vld [vmem:[%s6377_s9 + $0x700] sm:$0xff]  ;;  %v2103_v37 = vld [vmem:[%s6377_s9 + $0x708] sm:$0xff]  ;;  %v7496_v28 = vld [vmem:[#allocation76_spill] sm:$0xff] }
 0x372   : > { %4376 = vst [vmem:[%s6402_s10 + $0x610] sm:$0xff] %v4120_v59  ;;  %4377 = vst [vmem:[%s6402_s10 + $0x618] sm:$0xff] %v4121_v58 }
 0x373   : > { %4374 = vst [vmem:[%s6402_s10 + $0x600] sm:$0xff] %v4118_v46  ;;  %4375 = vst [vmem:[%s6402_s10 + $0x608] sm:$0xff] %v4119_v8  ;;  %v3784_v23 = vpop.permute.xlu1 %3783 }
 0x374   : > { %v4124_v31 = vadd.f32 %v3784_v23, %v3100_v15  ;;  %v4125_v22 = vadd.f32 %v3784_v23, %v3101_v17  ;;  %v3779_v33 = vpop.permute.xlu0 %3778  ;;  %v3116_v15 = vmul.f32 %v7489_v60, %v2092_v47  ;;  %v3117_v17 = vmul.f32 %v7489_v60, %v2093_v34  ;;  %v2108_v47 = vld [vmem:[%s6377_s9 + $0x730] sm:$0xff]  ;;  %v2109_v34 = vld [vmem:[%s6377_s9 + $0x738] sm:$0xff] }
 0x375   : > { %v4122_v54 = vadd.f32 %v3779_v33, %v3098_v39  ;;  %v4123_v51 = vadd.f32 %v3779_v33, %v3099_v50  ;;  %v3114_v39 = vmul.f32 %v7490_v4, %v2090_v14  ;;  %v3115_v50 = vmul.f32 %v7490_v4, %v2091_v45  ;;  %v2106_v14 = vld [vmem:[%s6377_s9 + $0x720] sm:$0xff]  ;;  %v2107_v45 = vld [vmem:[%s6377_s9 + $0x728] sm:$0xff]  ;;  %v7497_v60 = vld [vmem:[#allocation77_spill] sm:$0xff] }
 0x376   : > { %4380 = vst [vmem:[%s6402_s10 + $0x630] sm:$0xff] %v4124_v31  ;;  %4381 = vst [vmem:[%s6402_s10 + $0x638] sm:$0xff] %v4125_v22  ;;  %v7498_v4 = vld [vmem:[#allocation78_spill] sm:$0xff] }
 0x377   : > { %4378 = vst [vmem:[%s6402_s10 + $0x620] sm:$0xff] %v4122_v54  ;;  %4379 = vst [vmem:[%s6402_s10 + $0x628] sm:$0xff] %v4123_v51  ;;  %v3794_v11 = vpop.permute.xlu1 %3793 }
 0x378   : > { %v4128_v61 = vadd.f32 %v3794_v11, %v3104_v9  ;;  %v4129_v57 = vadd.f32 %v3794_v11, %v3105_v25  ;;  %v3789_v7 = vpop.permute.xlu0 %3788  ;;  %v3120_v9 = vmul.f32 %v7491_v63, %v2096_v16  ;;  %v3121_v25 = vmul.f32 %v7491_v63, %v2097_v21  ;;  %v2112_v16 = vld [vmem:[%s6377_s9 + $0x750] sm:$0xff]  ;;  %v2113_v21 = vld [vmem:[%s6377_s9 + $0x758] sm:$0xff]  ;;  %v7499_v63 = vld [vmem:[#allocation79_spill] sm:$0xff] }
 0x379   : > { %v4126_v30 = vadd.f32 %v3789_v7, %v3102_v0  ;;  %v4127_v43 = vadd.f32 %v3789_v7, %v3103_v52  ;;  %v3118_v0 = vmul.f32 %v7492_v32, %v2094_v40  ;;  %v3119_v52 = vmul.f32 %v7492_v32, %v2095_v53  ;;  %v2110_v40 = vld [vmem:[%s6377_s9 + $0x740] sm:$0xff]  ;;  %v2111_v53 = vld [vmem:[%s6377_s9 + $0x748] sm:$0xff]  ;;  %v7500_v32 = vld [vmem:[#allocation80_spill] sm:$0xff] }
 0x37a   : > { %4384 = vst [vmem:[%s6402_s10 + $0x650] sm:$0xff] %v4128_v61  ;;  %4385 = vst [vmem:[%s6402_s10 + $0x658] sm:$0xff] %v4129_v57 }
 0x37b   : > { %4382 = vst [vmem:[%s6402_s10 + $0x640] sm:$0xff] %v4126_v30  ;;  %4383 = vst [vmem:[%s6402_s10 + $0x648] sm:$0xff] %v4127_v43  ;;  %v3804_v2 = vpop.permute.xlu1 %3803 }
 0x37c   : > { %v4132_v56 = vadd.f32 %v3804_v2, %v3108_v10  ;;  %v4133_v49 = vadd.f32 %v3804_v2, %v3109_v41  ;;  %v3799_v27 = vpop.permute.xlu0 %3798  ;;  %v3124_v10 = vmul.f32 %v7493_v12, %v2100_v24  ;;  %v3125_v41 = vmul.f32 %v7493_v12, %v2101_v26  ;;  %v2116_v24 = vld [vmem:[%s6377_s9 + $0x770] sm:$0xff]  ;;  %v2117_v26 = vld [vmem:[%s6377_s9 + $0x778] sm:$0xff] }
 0x37d   : > { %v4130_v38 = vadd.f32 %v3799_v27, %v3106_v44  ;;  %v4131_v18 = vadd.f32 %v3799_v27, %v3107_v55  ;;  %v3122_v44 = vmul.f32 %v7494_v5, %v2098_v29  ;;  %v3123_v55 = vmul.f32 %v7494_v5, %v2099_v42  ;;  %v2114_v29 = vld [vmem:[%s6377_s9 + $0x760] sm:$0xff]  ;;  %v2115_v42 = vld [vmem:[%s6377_s9 + $0x768] sm:$0xff]  ;;  %v7501_v12 = vld [vmem:[#allocation81_spill] sm:$0xff] }
 0x37e   : > { %4388 = vst [vmem:[%s6402_s10 + $0x670] sm:$0xff] %v4132_v56  ;;  %4389 = vst [vmem:[%s6402_s10 + $0x678] sm:$0xff] %v4133_v49  ;;  %v7502_v5 = vld [vmem:[#allocation82_spill] sm:$0xff] }
 0x37f   : > { %4386 = vst [vmem:[%s6402_s10 + $0x660] sm:$0xff] %v4130_v38  ;;  %4387 = vst [vmem:[%s6402_s10 + $0x668] sm:$0xff] %v4131_v18  ;;  %v3814_v1 = vpop.permute.xlu1 %3813 }
 0x380   : > { %v4136_v59 = vadd.f32 %v3814_v1, %v3112_v20  ;;  %v4137_v58 = vadd.f32 %v3814_v1, %v3113_v62  ;;  %v3809_v48 = vpop.permute.xlu0 %3808  ;;  %v3128_v20 = vmul.f32 %v7495_v36, %v2104_v19  ;;  %v3129_v62 = vmul.f32 %v7495_v36, %v2105_v6  ;;  %v2120_v19 = vld [vmem:[%s6377_s9 + $0x790] sm:$0xff]  ;;  %v2121_v6 = vld [vmem:[%s6377_s9 + $0x798] sm:$0xff]  ;;  %v7503_v36 = vld [vmem:[#allocation83_spill] sm:$0xff] }
 0x381   : > { %v4134_v46 = vadd.f32 %v3809_v48, %v3110_v3  ;;  %v4135_v8 = vadd.f32 %v3809_v48, %v3111_v13  ;;  %v3126_v3 = vmul.f32 %v7496_v28, %v2102_v35  ;;  %v3127_v13 = vmul.f32 %v7496_v28, %v2103_v37  ;;  %v2118_v35 = vld [vmem:[%s6377_s9 + $0x780] sm:$0xff]  ;;  %v2119_v37 = vld [vmem:[%s6377_s9 + $0x788] sm:$0xff]  ;;  %v7504_v28 = vld [vmem:[#allocation84_spill] sm:$0xff] }
 0x382   : > { %4392 = vst [vmem:[%s6402_s10 + $0x690] sm:$0xff] %v4136_v59  ;;  %4393 = vst [vmem:[%s6402_s10 + $0x698] sm:$0xff] %v4137_v58 }
 0x383   : > { %4390 = vst [vmem:[%s6402_s10 + $0x680] sm:$0xff] %v4134_v46  ;;  %4391 = vst [vmem:[%s6402_s10 + $0x688] sm:$0xff] %v4135_v8  ;;  %v3824_v23 = vpop.permute.xlu1 %3823 }
 0x384   : > { %v4140_v31 = vadd.f32 %v3824_v23, %v3116_v15  ;;  %v4141_v22 = vadd.f32 %v3824_v23, %v3117_v17  ;;  %v3819_v33 = vpop.permute.xlu0 %3818  ;;  %v3132_v15 = vmul.f32 %v7497_v60, %v2108_v47  ;;  %v3133_v17 = vmul.f32 %v7497_v60, %v2109_v34  ;;  %v2124_v47 = vld [vmem:[%s6377_s9 + $0x7b0] sm:$0xff]  ;;  %v2125_v34 = vld [vmem:[%s6377_s9 + $0x7b8] sm:$0xff] }
 0x385   : > { %v4138_v54 = vadd.f32 %v3819_v33, %v3114_v39  ;;  %v4139_v51 = vadd.f32 %v3819_v33, %v3115_v50  ;;  %v3130_v39 = vmul.f32 %v7498_v4, %v2106_v14  ;;  %v3131_v50 = vmul.f32 %v7498_v4, %v2107_v45  ;;  %v2122_v14 = vld [vmem:[%s6377_s9 + $0x7a0] sm:$0xff]  ;;  %v2123_v45 = vld [vmem:[%s6377_s9 + $0x7a8] sm:$0xff]  ;;  %v7505_v60 = vld [vmem:[#allocation85_spill] sm:$0xff] }
 0x386   : > { %4396 = vst [vmem:[%s6402_s10 + $0x6b0] sm:$0xff] %v4140_v31  ;;  %4397 = vst [vmem:[%s6402_s10 + $0x6b8] sm:$0xff] %v4141_v22  ;;  %v7506_v4 = vld [vmem:[#allocation86_spill] sm:$0xff] }
 0x387   : > { %4394 = vst [vmem:[%s6402_s10 + $0x6a0] sm:$0xff] %v4138_v54  ;;  %4395 = vst [vmem:[%s6402_s10 + $0x6a8] sm:$0xff] %v4139_v51  ;;  %v3834_v11 = vpop.permute.xlu1 %3833 }
 0x388   : > { %v4144_v61 = vadd.f32 %v3834_v11, %v3120_v9  ;;  %v4145_v57 = vadd.f32 %v3834_v11, %v3121_v25  ;;  %v3829_v7 = vpop.permute.xlu0 %3828  ;;  %v3136_v9 = vmul.f32 %v7499_v63, %v2112_v16  ;;  %v3137_v25 = vmul.f32 %v7499_v63, %v2113_v21  ;;  %v2128_v16 = vld [vmem:[%s6377_s9 + $0x7d0] sm:$0xff]  ;;  %v2129_v21 = vld [vmem:[%s6377_s9 + $0x7d8] sm:$0xff]  ;;  %v7507_v63 = vld [vmem:[#allocation87_spill] sm:$0xff] }
 0x389   : > { %v4142_v30 = vadd.f32 %v3829_v7, %v3118_v0  ;;  %v4143_v43 = vadd.f32 %v3829_v7, %v3119_v52  ;;  %v3134_v0 = vmul.f32 %v7500_v32, %v2110_v40  ;;  %v3135_v52 = vmul.f32 %v7500_v32, %v2111_v53  ;;  %v2126_v40 = vld [vmem:[%s6377_s9 + $0x7c0] sm:$0xff]  ;;  %v2127_v53 = vld [vmem:[%s6377_s9 + $0x7c8] sm:$0xff]  ;;  %v7508_v32 = vld [vmem:[#allocation88_spill] sm:$0xff] }
 0x38a   : > { %4400 = vst [vmem:[%s6402_s10 + $0x6d0] sm:$0xff] %v4144_v61  ;;  %4401 = vst [vmem:[%s6402_s10 + $0x6d8] sm:$0xff] %v4145_v57 }
 0x38b   : > { %4398 = vst [vmem:[%s6402_s10 + $0x6c0] sm:$0xff] %v4142_v30  ;;  %4399 = vst [vmem:[%s6402_s10 + $0x6c8] sm:$0xff] %v4143_v43  ;;  %v3844_v2 = vpop.permute.xlu1 %3843 }
 0x38c   : > { %v4148_v56 = vadd.f32 %v3844_v2, %v3124_v10  ;;  %v4149_v49 = vadd.f32 %v3844_v2, %v3125_v41  ;;  %v3839_v27 = vpop.permute.xlu0 %3838  ;;  %v3140_v10 = vmul.f32 %v7501_v12, %v2116_v24  ;;  %v3141_v41 = vmul.f32 %v7501_v12, %v2117_v26  ;;  %v2132_v26 = vld [vmem:[%s6377_s9 + $0x7f0] sm:$0xff]  ;;  %v7509_v12 = vld [vmem:[#allocation89_spill] sm:$0xff] }
 0x38d   : > { %v4146_v38 = vadd.f32 %v3839_v27, %v3122_v44  ;;  %v4147_v18 = vadd.f32 %v3839_v27, %v3123_v55  ;;  %v3138_v44 = vmul.f32 %v7502_v5, %v2114_v29  ;;  %v3139_v55 = vmul.f32 %v7502_v5, %v2115_v42 }
 0x38e   : > { %4404 = vst [vmem:[%s6402_s10 + $0x6f0] sm:$0xff] %v4148_v56  ;;  %4405 = vst [vmem:[%s6402_s10 + $0x6f8] sm:$0xff] %v4149_v49 }
 0x38f   : > { %4402 = vst [vmem:[%s6402_s10 + $0x6e0] sm:$0xff] %v4146_v38  ;;  %4403 = vst [vmem:[%s6402_s10 + $0x6e8] sm:$0xff] %v4147_v18  ;;  %v3854_v1 = vpop.permute.xlu1 %3853 }
 0x390   : > { %v4152_v59 = vadd.f32 %v3854_v1, %v3128_v20  ;;  %v4153_v58 = vadd.f32 %v3854_v1, %v3129_v62  ;;  %v3849_v48 = vpop.permute.xlu0 %3848  ;;  %v3144_v20 = vmul.f32 %v7503_v36, %v2120_v19  ;;  %v3145_v62 = vmul.f32 %v7503_v36, %v2121_v6 }
 0x391   : > { %v4150_v46 = vadd.f32 %v3849_v48, %v3126_v3  ;;  %v4151_v8 = vadd.f32 %v3849_v48, %v3127_v13  ;;  %v3142_v3 = vmul.f32 %v7504_v28, %v2118_v35  ;;  %v3143_v13 = vmul.f32 %v7504_v28, %v2119_v37 }
 0x392   : > { %4408 = vst [vmem:[%s6402_s10 + $0x710] sm:$0xff] %v4152_v59  ;;  %4409 = vst [vmem:[%s6402_s10 + $0x718] sm:$0xff] %v4153_v58 }
 0x393   : > { %4406 = vst [vmem:[%s6402_s10 + $0x700] sm:$0xff] %v4150_v46  ;;  %4407 = vst [vmem:[%s6402_s10 + $0x708] sm:$0xff] %v4151_v8  ;;  %v3864_v23 = vpop.permute.xlu1 %3863 }
 0x394   : > { %v4156_v31 = vadd.f32 %v3864_v23, %v3132_v15  ;;  %v4157_v22 = vadd.f32 %v3864_v23, %v3133_v17  ;;  %v3859_v33 = vpop.permute.xlu0 %3858  ;;  %v3148_v15 = vmul.f32 %v7505_v60, %v2124_v47  ;;  %v3149_v17 = vmul.f32 %v7505_v60, %v2125_v34 }
 0x395   : > { %v4154_v54 = vadd.f32 %v3859_v33, %v3130_v39  ;;  %v4155_v51 = vadd.f32 %v3859_v33, %v3131_v50  ;;  %v3146_v39 = vmul.f32 %v7506_v4, %v2122_v14  ;;  %v3147_v50 = vmul.f32 %v7506_v4, %v2123_v45 }
 0x396   : > { %4412 = vst [vmem:[%s6402_s10 + $0x730] sm:$0xff] %v4156_v31  ;;  %4413 = vst [vmem:[%s6402_s10 + $0x738] sm:$0xff] %v4157_v22 }
 0x397   : > { %4410 = vst [vmem:[%s6402_s10 + $0x720] sm:$0xff] %v4154_v54  ;;  %4411 = vst [vmem:[%s6402_s10 + $0x728] sm:$0xff] %v4155_v51  ;;  %v3874_v11 = vpop.permute.xlu1 %3873 }
 0x398   : > { %v4160_v61 = vadd.f32 %v3874_v11, %v3136_v9  ;;  %v4161_v57 = vadd.f32 %v3874_v11, %v3137_v25  ;;  %v3869_v7 = vpop.permute.xlu0 %3868  ;;  %v3152_v9 = vmul.f32 %v7507_v63, %v2128_v16  ;;  %v3153_v25 = vmul.f32 %v7507_v63, %v2129_v21  ;;  %v2133_v11 = vld [vmem:[%s6377_s9 + $0x7f8] sm:$0xff] }
 0x399   : > { %v4158_v30 = vadd.f32 %v3869_v7, %v3134_v0  ;;  %v4159_v43 = vadd.f32 %v3869_v7, %v3135_v52  ;;  %v3150_v0 = vmul.f32 %v7508_v32, %v2126_v40  ;;  %v3151_v52 = vmul.f32 %v7508_v32, %v2127_v53  ;;  %v2131_v7 = vld [vmem:[%s6377_s9 + $0x7e8] sm:$0xff] }
 0x39a   : > { %4416 = vst [vmem:[%s6402_s10 + $0x750] sm:$0xff] %v4160_v61  ;;  %4417 = vst [vmem:[%s6402_s10 + $0x758] sm:$0xff] %v4161_v57  ;;  %v2130_v57 = vld [vmem:[%s6377_s9 + $0x7e0] sm:$0xff] }
 0x39b   : > { %4414 = vst [vmem:[%s6402_s10 + $0x740] sm:$0xff] %v4158_v30  ;;  %4415 = vst [vmem:[%s6402_s10 + $0x748] sm:$0xff] %v4159_v43  ;;  %v3884_v2 = vpop.permute.xlu1 %3883 }
 0x39c   : > { %v4164_v56 = vadd.f32 %v3884_v2, %v3140_v10  ;;  %v4165_v49 = vadd.f32 %v3884_v2, %v3141_v41  ;;  %v3879_v27 = vpop.permute.xlu0 %3878  ;;  %v3156_v10 = vmul.f32 %v7509_v12, %v2132_v26  ;;  %v3157_v41 = vmul.f32 %v7509_v12, %v2133_v11 }
 0x39d   : > { %v4162_v38 = vadd.f32 %v3879_v27, %v3138_v44  ;;  %v4163_v18 = vadd.f32 %v3879_v27, %v3139_v55  ;;  %v7510_v44 = vld [vmem:[#allocation90_spill] sm:$0xff] }
 0x39e   : > { %4420 = vst [vmem:[%s6402_s10 + $0x770] sm:$0xff] %v4164_v56  ;;  %4421 = vst [vmem:[%s6402_s10 + $0x778] sm:$0xff] %v4165_v49  ;;  %v3154_v55 = vmul.f32 %v7510_v44, %v2130_v57  ;;  %v3155_v19 = vmul.f32 %v7510_v44, %v2131_v7 }
 0x39f   : > { %4418 = vst [vmem:[%s6402_s10 + $0x760] sm:$0xff] %v4162_v38  ;;  %4419 = vst [vmem:[%s6402_s10 + $0x768] sm:$0xff] %v4163_v18  ;;  %v3894_v1 = vpop.permute.xlu1 %3893 }
 0x3a0   : > { %v4168_v59 = vadd.f32 %v3894_v1, %v3144_v20  ;;  %v4169_v58 = vadd.f32 %v3894_v1, %v3145_v62  ;;  %v3889_v48 = vpop.permute.xlu0 %3888 }
 0x3a1   : > { %v4166_v46 = vadd.f32 %v3889_v48, %v3142_v3  ;;  %v4167_v8 = vadd.f32 %v3889_v48, %v3143_v13 }
 0x3a2   : > { %4424 = vst [vmem:[%s6402_s10 + $0x790] sm:$0xff] %v4168_v59  ;;  %4425 = vst [vmem:[%s6402_s10 + $0x798] sm:$0xff] %v4169_v58 }
 0x3a3   : > { %4422 = vst [vmem:[%s6402_s10 + $0x780] sm:$0xff] %v4166_v46  ;;  %4423 = vst [vmem:[%s6402_s10 + $0x788] sm:$0xff] %v4167_v8  ;;  %v3904_v23 = vpop.permute.xlu1 %3903 }
 0x3a4   : > { %v4172_v31 = vadd.f32 %v3904_v23, %v3148_v15  ;;  %v4173_v22 = vadd.f32 %v3904_v23, %v3149_v17  ;;  %v3899_v33 = vpop.permute.xlu0 %3898 }
 0x3a5   : > { %v4170_v54 = vadd.f32 %v3899_v33, %v3146_v39  ;;  %v4171_v51 = vadd.f32 %v3899_v33, %v3147_v50 }
 0x3a6   : > { %4428 = vst [vmem:[%s6402_s10 + $0x7b0] sm:$0xff] %v4172_v31  ;;  %4429 = vst [vmem:[%s6402_s10 + $0x7b8] sm:$0xff] %v4173_v22 }
 0x3a7   : > { %4426 = vst [vmem:[%s6402_s10 + $0x7a0] sm:$0xff] %v4170_v54  ;;  %4427 = vst [vmem:[%s6402_s10 + $0x7a8] sm:$0xff] %v4171_v51  ;;  %v3914_v24 = vpop.permute.xlu1 %3913 }
 0x3a8   : > { %v4176_v29 = vadd.f32 %v3914_v24, %v3152_v9  ;;  %v4177_v42 = vadd.f32 %v3914_v24, %v3153_v25  ;;  %v3909_v61 = vpop.permute.xlu0 %3908 }
 0x3a9   : > { %v4174_v30 = vadd.f32 %v3909_v61, %v3150_v0  ;;  %v4175_v43 = vadd.f32 %v3909_v61, %v3151_v52 }
 0x3aa   : > { %4432 = vst [vmem:[%s6402_s10 + $0x7d0] sm:$0xff] %v4176_v29  ;;  %4433 = vst [vmem:[%s6402_s10 + $0x7d8] sm:$0xff] %v4177_v42 }
 0x3ab   : > { %4430 = vst [vmem:[%s6402_s10 + $0x7c0] sm:$0xff] %v4174_v30  ;;  %4431 = vst [vmem:[%s6402_s10 + $0x7c8] sm:$0xff] %v4175_v43  ;;  %v3924_v5 = vpop.permute.xlu1 %3923 }
 0x3ac   : > { %v4180_v6 = vadd.f32 %v3924_v5, %v3156_v10  ;;  %v4181_v2 = vadd.f32 %v3924_v5, %v3157_v41  ;;  %v3919_v35 = vpop.permute.xlu0 %3918 }
 0x3ad   : > { %v4178_v37 = vadd.f32 %v3919_v35, %v3154_v55  ;;  %v4179_v56 = vadd.f32 %v3919_v35, %v3155_v19 }
 0x3ae   : > { %4436 = vst [vmem:[%s6402_s10 + $0x7f0] sm:$0xff] %v4180_v6  ;;  %4437 = vst [vmem:[%s6402_s10 + $0x7f8] sm:$0xff] %v4181_v2 }
 0x3af   : > { %4434 = vst [vmem:[%s6402_s10 + $0x7e0] sm:$0xff] %v4178_v37  ;;  %4435 = vst [vmem:[%s6402_s10 + $0x7e8] sm:$0xff] %v4179_v56 }
 0x3b0   : > { %s4648_s18 = sshll.u32 %s4762_s15, 14  ;;  %s4474_s19 = sshll.u32 %s6402_s10, 4  ;;  %s4475_s19 = int_to_ptr.vmem [resolvable:$true] %s4474_s19 }
 0x3b1   : > { %s4457_s27 = scalar_lea.hbm %s7264_s3, %s4648_s18  ;;  %s4773_s28 = smov 16384  }
 0x3b2   : > { %4649 = sst [smem:[#allocation8]] (%p4843_p5), %s4773_s28  ;;  %s4774_s29 = smov 65536  }
 0x3b3   : > { %4650 = sst [smem:[#allocation8 + $0x1]] (%p4843_p5), %s4774_s29  ;;  %s4775_s30 = smov 64  }
 0x3b4   : > { %4651 = sst [smem:[#allocation8 + $0x2]] (%p4843_p5), %s4775_s30  ;;  %s4776_s22 = smov 256  }
 0x3b5   : > { %4652 = sst [smem:[#allocation8 + $0x3]] (%p4843_p5), %s4776_s22  ;;  %s4777_s15 = smov 16  }
 0x3b6   : > { %4653 = sst [smem:[#allocation8 + $0x4]] (%p4843_p5), %s4776_s22  ;;  %s4778_s4 = smov [#allocation7]  }
 0x3b7   : > { %4654 = sst [smem:[#allocation8 + $0x5]] (%p4843_p5), %s4777_s15  ;;  %s4779_s5 = smov 0  }
 0x3b8   : > { %4655 = dma.general (%p4843_p5), %s4475_s19, 32768, %s4457_s27, %s4439_s11, %s4778_s4, [#allocation8], %s4779_s5, 0  }
 0x3b9 PF: > { %p4661_p0 = scmp.ge.s32.totalorder %s4770_s17, 2  ;;  %s4502_s6 = sand.u32 1, %s4750_s12  }
 0x3ba   : > { %s4503_s7 = scalar_lea.sflag [#allocation6], %s4502_s6 }
 0x3bb   : > { %p4658_p1 = pnand %p4661_p0, %p4854_p9 }
 0x3bd   : > { %4745 = dma.done.wait (!%p4658_p1), %s4503_s7, 32768  }
 0x3be   : > { %4747 = vsyncadd (!%p4658_p1), %s4503_s7, 4294934528  ;;  %s16_s17 = sadd.s32 1, %s4770_s17   ;;  %s7511_s12 = smov %s4754_s13 }
 0x3bf   : > { %p13_p2 = scmp.ge.s32.totalorder %s16_s17, 6   ;;  %s7512_s13 = smov %s4758_s14 }
 0x3c0   : > { %s7513_s14 = smov %s4852_s25  ;;  %s7514_s15 = smov %s4766_s16 }
 0x3c1   : > { %s7515_s16 = smov %s7517_s20  ;;  %15 = sbr.rel (!%p13_p2) target bundleno = 4 (0x4), region = 192 }
 0x3c8   :  { %4508 = vsyncpa [#allocation6], 1 }
 0x3c9   :  { %4510 = vsyncpa [#allocation6 + $0x1], 1 }

</bundles_post_ra>
